<compile_context>
chip_gen: v7x
topology: tpu7x:2x2x1
jax: 0.10.0
libtpu: 0.0.40
codegen_flags: <defaults>
</compile_context>

<pallas_src>
import jax
import jax.numpy as jnp
from jax.experimental import pallas as pl
from jax.experimental.pallas import tpu as pltpu

VMEM_SPEC = pl.BlockSpec(memory_space=pltpu.MemorySpace.VMEM)


# --------------------------------------------------------------------------
# Fused forward kernel
# --------------------------------------------------------------------------
def deep_risk_kernel(x2d_ref, adj_ref, w_gru_ref, b_gru_ref, gat_ref, head_ref,
                     out_ref):
    N = adj_ref.shape[0]
    TN, P = x2d_ref.shape
    T = TN // N
    H3 = w_gru_ref.shape[1]
    H = H3 // 3
    f32 = jnp.float32

    def mm(a, b):
        return jnp.dot(a, b, preferred_element_type=jnp.float32)

    def gru_cell(gi, gh, h_prev):
        # packed gate order (PyTorch): [r | z | n] along the 3H lane dim
        r = jax.nn.sigmoid(gi[:, :H] + gh[:, :H])
        z = jax.nn.sigmoid(gi[:, H:2 * H] + gh[:, H:2 * H])
        n = jnp.tanh(gi[:, 2 * H:] + r * gh[:, 2 * H:])
        return (1.0 - z) * n + z * h_prev

    # ------------------------------------------------------------------
    # temporal 2-layer GRU; x2d is time-major, rows [t*N:(t+1)*N] = step t.
    # Weight slab (all sublane offsets are multiples of 8):
    #   [0:P] wih0  [P:P+H] whh0  [P+H:P+2H] wih1  [P+2H:P+3H] whh1
    #   [P+3H:2P+3H] cross-sectional wih0     [2P+3H:2P+4H] cross wih1
    # ------------------------------------------------------------------
    wih0 = w_gru_ref[0:P, :]
    whh0 = w_gru_ref[P:P + H, :]
    wih1 = w_gru_ref[P + H:P + 2 * H, :]
    whh1 = w_gru_ref[P + 2 * H:P + 3 * H, :]

    bg = b_gru_ref[...]                                   # (8, 3H), one vreg
    bih0 = bg[0:1, :]
    # loop-invariant bias broadcasts hoisted (JAX does not CSE broadcast)
    bhh0 = jnp.broadcast_to(bg[1:2, :], (N, H3))
    bih1 = jnp.broadcast_to(bg[2:3, :], (N, H3))
    bhh1 = jnp.broadcast_to(bg[3:4, :], (N, H3))

    # hoisted layer-0 input projection for ALL timesteps: one packed matmul
    x2d = x2d_ref[...]                                    # (T*N, P)
    gi0_all = mm(x2d, wih0) + bih0                        # (T*N, 3H)

    h0 = jnp.zeros((N, H), f32)
    h1 = jnp.zeros((N, H), f32)
    for t in range(T):                 # static -> fully unrolled, T=8
        gi0 = gi0_all[t * N:(t + 1) * N]                  # (N, 3H)
        gh0 = mm(h0, whh0) + bhh0                         # 1 matmul (was 3)
        h0 = gru_cell(gi0, gh0, h0)

        gi1 = mm(h0, wih1) + bih1                         # 1 matmul (was 3)
        gh1 = mm(h1, whh1) + bhh1                         # 1 matmul (was 3)
        h1 = gru_cell(gi1, gh1, h1)
    h_t = h1                                              # (N, H)

    # ------------------------------------------------------------------
    # single-head GATConv (concat=False) on the last timestep, dense adj.
    # GAT slab is lane-padded from C=P//2 to P columns, so attn @ xp
    # directly produces [gat_out, 0] and the residual pad is free.
    # ------------------------------------------------------------------
    x_last = x2d_ref[(T - 1) * N:T * N, :]                # (N, P)
    g = gat_ref[...]                                      # (P+8, P)
    gw = g[0:P, :]
    asrc = g[P:P + 1, :]
    adst = g[P + 1:P + 2, :]
    gbias = g[P + 2:P + 3, :]

    xp = mm(x_last, gw)                                   # (N, P), cols C..P-1 = 0
    a_s = jnp.sum(xp * asrc, axis=-1, keepdims=True)      # (N, 1)
    a_d = jnp.sum(xp * adst, axis=-1, keepdims=True)      # (N, 1)
    e = a_d + jnp.transpose(a_s)                          # e[i,j] = a_d_i + a_s_j
    e = jnp.where(e > 0, e, 0.2 * e)                      # LeakyReLU(0.2)
    mask = adj_ref[...] > 0
    e = jnp.where(mask, e, -1e30)
    e = e - jnp.max(e, axis=-1, keepdims=True)
    p = jnp.where(mask, jnp.exp(e), 0.0)
    denom = jnp.sum(p, axis=-1, keepdims=True)            # >= 1 term (self-loops)
    attn = p * pl.reciprocal(denom, approx=True)          # EUP; ~1e-3 rel err
    gat_pad = mm(attn, xp) + gbias                        # (N, P) == [gat_out, 0]

    # ------------------------------------------------------------------
    # cross-sectional 2-layer GRU over the length-1 residual sequence with
    # zero initial state: hidden-to-hidden weights vanish (0 @ Whh == 0),
    # only their biases survive.
    # ------------------------------------------------------------------
    cwi0 = w_gru_ref[P + 3 * H:2 * P + 3 * H, :]
    cwi1 = w_gru_ref[2 * P + 3 * H:2 * P + 4 * H, :]
    cbih0, cbhh0 = bg[4:5, :], bg[5:6, :]
    cbih1, cbhh1 = bg[6:7, :], bg[7:8, :]

    residual = x_last - gat_pad                           # (N, P)
    zero_h = jnp.zeros((N, H), f32)
    gi_c0 = mm(residual, cwi0) + cbih0
    hc0 = gru_cell(gi_c0, cbhh0, zero_h)                  # gh == bhh (h=0)
    gi_c1 = mm(hc0, cwi1) + cbih1
    h_cs = gru_cell(gi_c1, cbhh1, zero_h)                 # (N, H)

    # ------------------------------------------------------------------
    # head: block-diagonal packed projections -> full (N, K) block, then
    # per-column training-mode BatchNorm (== bn1/bn2 of the halves); 1 store.
    # ------------------------------------------------------------------
    hd = head_ref[...]                                    # (2H+8, K)
    wt = hd[0:H, :]
    wc = hd[H:2 * H, :]
    bh = hd[2 * H:2 * H + 1, :]
    gm = hd[2 * H + 1:2 * H + 2, :]
    bt = hd[2 * H + 2:2 * H + 3, :]

    f = mm(h_t, wt) + mm(h_cs, wc) + bh
    mu = jnp.mean(f, axis=0, keepdims=True)
    var = jnp.mean((f - mu) ** 2, axis=0, keepdims=True)
    out_ref[...] = (f - mu) * jax.lax.rsqrt(var + 1e-5) * gm + bt


# --------------------------------------------------------------------------
# Wrapper: a single pallas_call, no extra XLA ops in the jitted graph.
# x2d must be time-major (T*N, P): row block [t*N:(t+1)*N] = all nodes at t.
# N must be a multiple of 8 (sublane alignment of the per-step slices).
# --------------------------------------------------------------------------
@jax.jit
def deep_risk_forward(x2d, adj, params):
    N = adj.shape[0]
    K = params["head_p"].shape[1]
    args = (x2d, adj, params["w_gru"], params["b_gru"],
            params["gat_p"], params["head_p"])
    return pl.pallas_call(
        deep_risk_kernel,
        out_shape=jax.ShapeDtypeStruct((N, K), jnp.float32),
        in_specs=[VMEM_SPEC] * len(args),
        out_specs=VMEM_SPEC,
    )(*args)


# --------------------------------------------------------------------------
# Parameter construction: deterministic synthetic params, packed host-side
# into the 4 slabs the kernel consumes (gate order r, z, n; weights stored
# transposed, ready for x @ W).
# --------------------------------------------------------------------------
def init_params(key, P, H, K):
    C = P // 2
    K1, K2 = K // 2, K - K // 2
    H3 = 3 * H
    ks = jax.random.split(key, 20)
    rnd = lambda i, shape: 0.1 * jax.random.normal(ks[i], shape, jnp.float32)

    # GRU weight slab (all sublane offsets multiples of 8):
    #   temporal wih0 (P,3H), whh0 (H,3H), wih1 (H,3H), whh1 (H,3H),
    #   cross-sectional wih0 (P,3H), wih1 (H,3H).
    # Cross-sectional weight_hh never reaches the output (seq_len=1, h0=0).
    w_gru = jnp.concatenate([
        rnd(0, (P, H3)), rnd(1, (H, H3)), rnd(2, (H, H3)), rnd(3, (H, H3)),
        rnd(4, (P, H3)), rnd(5, (H, H3)),
    ], axis=0)

    # GRU bias slab, one row per bias vector:
    #   t_bih0, t_bhh0, t_bih1, t_bhh1, c_bih0, c_bhh0, c_bih1, c_bhh1
    b_gru = jnp.concatenate([rnd(6 + i, (1, H3)) for i in range(8)], axis=0)

    # GAT slab (single head, concat=False), lane-padded from C to P columns
    # so the kernel's `attn @ xp` directly yields [gat_out, 0].
    pad = lambda a: jnp.pad(a, ((0, 0), (0, P - C)))
    gat_p = jnp.concatenate([
        pad(rnd(14, (P, C))),             # W        rows [0:P]
        pad(rnd(15, (1, C))),             # a_src    row  P
        pad(rnd(16, (1, C))),             # a_dst    row  P+1
        jnp.zeros((1, P), jnp.float32),   # bias     row  P+2
        jnp.zeros((5, P), jnp.float32),   # pad to a multiple of 8 sublanes
    ], axis=0)

    # Head slab: block-diagonal packed projections + BN affine params.
    wt = jnp.concatenate([rnd(17, (H, K1)), jnp.zeros((H, K2), jnp.float32)], 1)
    wc = jnp.concatenate([jnp.zeros((H, K1), jnp.float32), rnd(18, (H, K2))], 1)
    head_p = jnp.concatenate([
        wt,                                   # rows [0:H]
        wc,                                   # rows [H:2H]
        jnp.zeros((1, K), jnp.float32),       # proj bias  row 2H
        jnp.ones((1, K), jnp.float32),        # BN gamma   row 2H+1
        jnp.zeros((1, K), jnp.float32),       # BN beta    row 2H+2
        jnp.zeros((5, K), jnp.float32),       # pad
    ], axis=0)

    return dict(w_gru=w_gru, b_gru=b_gru, gat_p=gat_p, head_p=head_p)


# --------------------------------------------------------------------------
def build_dense_adj(edge_index, N):
    # TODO(synk): edge_index -> dense adjacency scatter stays in plain JAX
    # (data-dependent scatter; fine as one-time glue at this size).
    # edge_index row 0 = source j, row 1 = target i ; A[i, j] = 1 ; + self-loops
    adj = jnp.zeros((N, N), jnp.float32)
    adj = adj.at[edge_index[1], edge_index[0]].set(1.0)
    adj = adj.at[jnp.arange(N), jnp.arange(N)].set(1.0)
    return adj


if __name__ == "__main__":
    N, T, P, H, K = 16, 8, 8, 32, 8   # nodes, seq len, features, hidden, factors

    key = jax.random.PRNGKey(0)
    k_x, k_e, k_p = jax.random.split(key, 3)

    X_seq = jax.random.normal(k_x, (N, T, P), jnp.float32)
    # One-time data-prep layout change (OUTSIDE the jitted forward): time-major
    # (T*N, P) so per-timestep slices inside the kernel are contiguous rows.
    x2d = jnp.transpose(X_seq, (1, 0, 2)).reshape(T * N, P)
    x2d = jax.block_until_ready(x2d)

    # deterministic edge_index: a ring plus a few random edges
    src_ring = jnp.arange(N)
    dst_ring = (jnp.arange(N) + 1) % N
    rnd_src = jax.random.randint(k_e, (2 * N,), 0, N)
    rnd_dst = jax.random.randint(jax.random.fold_in(k_e, 1), (2 * N,), 0, N)
    edge_index = jnp.stack([jnp.concatenate([src_ring, rnd_src]),
                            jnp.concatenate([dst_ring, rnd_dst])], axis=0)

    adj = build_dense_adj(edge_index, N)
    params = init_params(k_p, P, H, K)

    out = deep_risk_forward(x2d, adj, params)
    jax.block_until_ready(out)
    assert out.shape == (N, K)
    assert bool(jnp.all(jnp.isfinite(out)))
    print("KERNEL_OK")
</pallas_src>

<mosaic_0001>
module attributes {stable_mosaic.version = 11 : i64} {
  func.func @deep_risk_kernel(%arg0: memref<128x8xf32, #tpu.memory_space<vmem>>, %arg1: memref<16x16xf32, #tpu.memory_space<vmem>>, %arg2: memref<144x96xf32, #tpu.memory_space<vmem>>, %arg3: memref<8x96xf32, #tpu.memory_space<vmem>>, %arg4: memref<16x8xf32, #tpu.memory_space<vmem>>, %arg5: memref<72x8xf32, #tpu.memory_space<vmem>>, %arg6: memref<16x8xf32, #tpu.memory_space<vmem>>) attributes {dimension_semantics = [], scalar_prefetch = 0 : i64, scratch_operands = 0 : i64, tpu.core_type = #tpu.core_type<tc>} {
    %c0 = arith.constant 0 : index
    %c0_0 = arith.constant 0 : index
    %0 = vector.load %arg2[%c0, %c0_0] : memref<144x96xf32, #tpu.memory_space<vmem>>, vector<8x96xf32>
    %c8 = arith.constant 8 : index
    %c0_1 = arith.constant 0 : index
    %1 = vector.load %arg2[%c8, %c0_1] : memref<144x96xf32, #tpu.memory_space<vmem>>, vector<32x96xf32>
    %c40 = arith.constant 40 : index
    %c0_2 = arith.constant 0 : index
    %2 = vector.load %arg2[%c40, %c0_2] : memref<144x96xf32, #tpu.memory_space<vmem>>, vector<32x96xf32>
    %c72 = arith.constant 72 : index
    %c0_3 = arith.constant 0 : index
    %3 = vector.load %arg2[%c72, %c0_3] : memref<144x96xf32, #tpu.memory_space<vmem>>, vector<32x96xf32>
    %c0_4 = arith.constant 0 : index
    %c0_5 = arith.constant 0 : index
    %4 = vector.load %arg3[%c0_4, %c0_5] : memref<8x96xf32, #tpu.memory_space<vmem>>, vector<8x96xf32>
    %5 = vector.extract_strided_slice %4 {offsets = [0, 0], sizes = [1, 96], strides = [1, 1]} : vector<8x96xf32> to vector<1x96xf32>
    %6 = vector.extract_strided_slice %4 {offsets = [1, 0], sizes = [1, 96], strides = [1, 1]} : vector<8x96xf32> to vector<1x96xf32>
    %7 = vector.shape_cast %6 : vector<1x96xf32> to vector<1x96xf32>
    %8 = vector.broadcast %7 : vector<1x96xf32> to vector<16x96xf32>
    %9 = vector.extract_strided_slice %4 {offsets = [2, 0], sizes = [1, 96], strides = [1, 1]} : vector<8x96xf32> to vector<1x96xf32>
    %10 = vector.shape_cast %9 : vector<1x96xf32> to vector<1x96xf32>
    %11 = vector.broadcast %10 : vector<1x96xf32> to vector<16x96xf32>
    %12 = vector.extract_strided_slice %4 {offsets = [3, 0], sizes = [1, 96], strides = [1, 1]} : vector<8x96xf32> to vector<1x96xf32>
    %13 = vector.shape_cast %12 : vector<1x96xf32> to vector<1x96xf32>
    %14 = vector.broadcast %13 : vector<1x96xf32> to vector<16x96xf32>
    %c0_6 = arith.constant 0 : index
    %c0_7 = arith.constant 0 : index
    %15 = vector.load %arg0[%c0_6, %c0_7] : memref<128x8xf32, #tpu.memory_space<vmem>>, vector<128x8xf32>
    %cst = arith.constant dense<0.000000e+00> : vector<128x96xf32>
    %16 = tpu.matmul %15, %0, %cst {dimension_numbers = #tpu.dot_dimension_numbers<[1], [0], [0], [1], [0, 0, 1, 1], [], []>} : vector<128x8xf32>, vector<8x96xf32>, vector<128x96xf32> -> vector<128x96xf32>
    %17 = vector.broadcast %5 : vector<1x96xf32> to vector<128x96xf32>
    %18 = arith.addf %16, %17 : vector<128x96xf32>
    %cst_8 = arith.constant 0.000000e+00 : f32
    %19 = vector.broadcast %cst_8 : f32 to vector<16x32xf32>
    %cst_9 = arith.constant 0.000000e+00 : f32
    %20 = vector.broadcast %cst_9 : f32 to vector<16x32xf32>
    %21 = vector.extract_strided_slice %18 {offsets = [0, 0], sizes = [16, 96], strides = [1, 1]} : vector<128x96xf32> to vector<16x96xf32>
    %cst_10 = arith.constant dense<0.000000e+00> : vector<16x96xf32>
    %22 = tpu.matmul %19, %1, %cst_10 {dimension_numbers = #tpu.dot_dimension_numbers<[1], [0], [0], [1], [0, 0, 1, 1], [], []>} : vector<16x32xf32>, vector<32x96xf32>, vector<16x96xf32> -> vector<16x96xf32>
    %23 = arith.addf %22, %8 : vector<16x96xf32>
    %24 = vector.extract_strided_slice %21 {offsets = [0, 0], sizes = [16, 32], strides = [1, 1]} : vector<16x96xf32> to vector<16x32xf32>
    %25 = vector.extract_strided_slice %23 {offsets = [0, 0], sizes = [16, 32], strides = [1, 1]} : vector<16x96xf32> to vector<16x32xf32>
    %26 = arith.addf %24, %25 : vector<16x32xf32>
    %27 = arith.negf %26 : vector<16x32xf32>
    %28 = math.exp %27 : vector<16x32xf32>
    %cst_11 = arith.constant 1.000000e+00 : f32
    %29 = vector.broadcast %cst_11 : f32 to vector<16x32xf32>
    %30 = arith.addf %29, %28 : vector<16x32xf32>
    %31 = arith.divf %29, %30 : vector<16x32xf32>
    %32 = vector.extract_strided_slice %21 {offsets = [0, 32], sizes = [16, 32], strides = [1, 1]} : vector<16x96xf32> to vector<16x32xf32>
    %33 = vector.extract_strided_slice %23 {offsets = [0, 32], sizes = [16, 32], strides = [1, 1]} : vector<16x96xf32> to vector<16x32xf32>
    %34 = arith.addf %32, %33 : vector<16x32xf32>
    %35 = arith.negf %34 : vector<16x32xf32>
    %36 = math.exp %35 : vector<16x32xf32>
    %cst_12 = arith.constant 1.000000e+00 : f32
    %37 = vector.broadcast %cst_12 : f32 to vector<16x32xf32>
    %38 = arith.addf %37, %36 : vector<16x32xf32>
    %39 = arith.divf %37, %38 : vector<16x32xf32>
    %40 = vector.extract_strided_slice %21 {offsets = [0, 64], sizes = [16, 32], strides = [1, 1]} : vector<16x96xf32> to vector<16x32xf32>
    %41 = vector.extract_strided_slice %23 {offsets = [0, 64], sizes = [16, 32], strides = [1, 1]} : vector<16x96xf32> to vector<16x32xf32>
    %42 = arith.mulf %31, %41 : vector<16x32xf32>
    %43 = arith.addf %40, %42 : vector<16x32xf32>
    %44 = math.tanh %43 : vector<16x32xf32>
    %cst_13 = arith.constant 1.000000e+00 : f32
    %45 = vector.broadcast %cst_13 : f32 to vector<16x32xf32>
    %46 = arith.subf %45, %39 : vector<16x32xf32>
    %47 = arith.mulf %46, %44 : vector<16x32xf32>
    %48 = arith.mulf %39, %19 : vector<16x32xf32>
    %49 = arith.addf %47, %48 : vector<16x32xf32>
    %cst_14 = arith.constant dense<0.000000e+00> : vector<16x96xf32>
    %50 = tpu.matmul %49, %2, %cst_14 {dimension_numbers = #tpu.dot_dimension_numbers<[1], [0], [0], [1], [0, 0, 1, 1], [], []>} : vector<16x32xf32>, vector<32x96xf32>, vector<16x96xf32> -> vector<16x96xf32>
    %51 = arith.addf %50, %11 : vector<16x96xf32>
    %cst_15 = arith.constant dense<0.000000e+00> : vector<16x96xf32>
    %52 = tpu.matmul %20, %3, %cst_15 {dimension_numbers = #tpu.dot_dimension_numbers<[1], [0], [0], [1], [0, 0, 1, 1], [], []>} : vector<16x32xf32>, vector<32x96xf32>, vector<16x96xf32> -> vector<16x96xf32>
    %53 = arith.addf %52, %14 : vector<16x96xf32>
    %54 = vector.extract_strided_slice %51 {offsets = [0, 0], sizes = [16, 32], strides = [1, 1]} : vector<16x96xf32> to vector<16x32xf32>
    %55 = vector.extract_strided_slice %53 {offsets = [0, 0], sizes = [16, 32], strides = [1, 1]} : vector<16x96xf32> to vector<16x32xf32>
    %56 = arith.addf %54, %55 : vector<16x32xf32>
    %57 = arith.negf %56 : vector<16x32xf32>
    %58 = math.exp %57 : vector<16x32xf32>
    %cst_16 = arith.constant 1.000000e+00 : f32
    %59 = vector.broadcast %cst_16 : f32 to vector<16x32xf32>
    %60 = arith.addf %59, %58 : vector<16x32xf32>
    %61 = arith.divf %59, %60 : vector<16x32xf32>
    %62 = vector.extract_strided_slice %51 {offsets = [0, 32], sizes = [16, 32], strides = [1, 1]} : vector<16x96xf32> to vector<16x32xf32>
    %63 = vector.extract_strided_slice %53 {offsets = [0, 32], sizes = [16, 32], strides = [1, 1]} : vector<16x96xf32> to vector<16x32xf32>
    %64 = arith.addf %62, %63 : vector<16x32xf32>
    %65 = arith.negf %64 : vector<16x32xf32>
    %66 = math.exp %65 : vector<16x32xf32>
    %cst_17 = arith.constant 1.000000e+00 : f32
    %67 = vector.broadcast %cst_17 : f32 to vector<16x32xf32>
    %68 = arith.addf %67, %66 : vector<16x32xf32>
    %69 = arith.divf %67, %68 : vector<16x32xf32>
    %70 = vector.extract_strided_slice %51 {offsets = [0, 64], sizes = [16, 32], strides = [1, 1]} : vector<16x96xf32> to vector<16x32xf32>
    %71 = vector.extract_strided_slice %53 {offsets = [0, 64], sizes = [16, 32], strides = [1, 1]} : vector<16x96xf32> to vector<16x32xf32>
    %72 = arith.mulf %61, %71 : vector<16x32xf32>
    %73 = arith.addf %70, %72 : vector<16x32xf32>
    %74 = math.tanh %73 : vector<16x32xf32>
    %cst_18 = arith.constant 1.000000e+00 : f32
    %75 = vector.broadcast %cst_18 : f32 to vector<16x32xf32>
    %76 = arith.subf %75, %69 : vector<16x32xf32>
    %77 = arith.mulf %76, %74 : vector<16x32xf32>
    %78 = arith.mulf %69, %20 : vector<16x32xf32>
    %79 = arith.addf %77, %78 : vector<16x32xf32>
    %80 = vector.extract_strided_slice %18 {offsets = [16, 0], sizes = [16, 96], strides = [1, 1]} : vector<128x96xf32> to vector<16x96xf32>
    %cst_19 = arith.constant dense<0.000000e+00> : vector<16x96xf32>
    %81 = tpu.matmul %49, %1, %cst_19 {dimension_numbers = #tpu.dot_dimension_numbers<[1], [0], [0], [1], [0, 0, 1, 1], [], []>} : vector<16x32xf32>, vector<32x96xf32>, vector<16x96xf32> -> vector<16x96xf32>
    %82 = arith.addf %81, %8 : vector<16x96xf32>
    %83 = vector.extract_strided_slice %80 {offsets = [0, 0], sizes = [16, 32], strides = [1, 1]} : vector<16x96xf32> to vector<16x32xf32>
    %84 = vector.extract_strided_slice %82 {offsets = [0, 0], sizes = [16, 32], strides = [1, 1]} : vector<16x96xf32> to vector<16x32xf32>
    %85 = arith.addf %83, %84 : vector<16x32xf32>
    %86 = arith.negf %85 : vector<16x32xf32>
    %87 = math.exp %86 : vector<16x32xf32>
    %cst_20 = arith.constant 1.000000e+00 : f32
    %88 = vector.broadcast %cst_20 : f32 to vector<16x32xf32>
    %89 = arith.addf %88, %87 : vector<16x32xf32>
    %90 = arith.divf %88, %89 : vector<16x32xf32>
    %91 = vector.extract_strided_slice %80 {offsets = [0, 32], sizes = [16, 32], strides = [1, 1]} : vector<16x96xf32> to vector<16x32xf32>
    %92 = vector.extract_strided_slice %82 {offsets = [0, 32], sizes = [16, 32], strides = [1, 1]} : vector<16x96xf32> to vector<16x32xf32>
    %93 = arith.addf %91, %92 : vector<16x32xf32>
    %94 = arith.negf %93 : vector<16x32xf32>
    %95 = math.exp %94 : vector<16x32xf32>
    %cst_21 = arith.constant 1.000000e+00 : f32
    %96 = vector.broadcast %cst_21 : f32 to vector<16x32xf32>
    %97 = arith.addf %96, %95 : vector<16x32xf32>
    %98 = arith.divf %96, %97 : vector<16x32xf32>
    %99 = vector.extract_strided_slice %80 {offsets = [0, 64], sizes = [16, 32], strides = [1, 1]} : vector<16x96xf32> to vector<16x32xf32>
    %100 = vector.extract_strided_slice %82 {offsets = [0, 64], sizes = [16, 32], strides = [1, 1]} : vector<16x96xf32> to vector<16x32xf32>
    %101 = arith.mulf %90, %100 : vector<16x32xf32>
    %102 = arith.addf %99, %101 : vector<16x32xf32>
    %103 = math.tanh %102 : vector<16x32xf32>
    %cst_22 = arith.constant 1.000000e+00 : f32
    %104 = vector.broadcast %cst_22 : f32 to vector<16x32xf32>
    %105 = arith.subf %104, %98 : vector<16x32xf32>
    %106 = arith.mulf %105, %103 : vector<16x32xf32>
    %107 = arith.mulf %98, %49 : vector<16x32xf32>
    %108 = arith.addf %106, %107 : vector<16x32xf32>
    %cst_23 = arith.constant dense<0.000000e+00> : vector<16x96xf32>
    %109 = tpu.matmul %108, %2, %cst_23 {dimension_numbers = #tpu.dot_dimension_numbers<[1], [0], [0], [1], [0, 0, 1, 1], [], []>} : vector<16x32xf32>, vector<32x96xf32>, vector<16x96xf32> -> vector<16x96xf32>
    %110 = arith.addf %109, %11 : vector<16x96xf32>
    %cst_24 = arith.constant dense<0.000000e+00> : vector<16x96xf32>
    %111 = tpu.matmul %79, %3, %cst_24 {dimension_numbers = #tpu.dot_dimension_numbers<[1], [0], [0], [1], [0, 0, 1, 1], [], []>} : vector<16x32xf32>, vector<32x96xf32>, vector<16x96xf32> -> vector<16x96xf32>
    %112 = arith.addf %111, %14 : vector<16x96xf32>
    %113 = vector.extract_strided_slice %110 {offsets = [0, 0], sizes = [16, 32], strides = [1, 1]} : vector<16x96xf32> to vector<16x32xf32>
    %114 = vector.extract_strided_slice %112 {offsets = [0, 0], sizes = [16, 32], strides = [1, 1]} : vector<16x96xf32> to vector<16x32xf32>
    %115 = arith.addf %113, %114 : vector<16x32xf32>
    %116 = arith.negf %115 : vector<16x32xf32>
    %117 = math.exp %116 : vector<16x32xf32>
    %cst_25 = arith.constant 1.000000e+00 : f32
    %118 = vector.broadcast %cst_25 : f32 to vector<16x32xf32>
    %119 = arith.addf %118, %117 : vector<16x32xf32>
    %120 = arith.divf %118, %119 : vector<16x32xf32>
    %121 = vector.extract_strided_slice %110 {offsets = [0, 32], sizes = [16, 32], strides = [1, 1]} : vector<16x96xf32> to vector<16x32xf32>
    %122 = vector.extract_strided_slice %112 {offsets = [0, 32], sizes = [16, 32], strides = [1, 1]} : vector<16x96xf32> to vector<16x32xf32>
    %123 = arith.addf %121, %122 : vector<16x32xf32>
    %124 = arith.negf %123 : vector<16x32xf32>
    %125 = math.exp %124 : vector<16x32xf32>
    %cst_26 = arith.constant 1.000000e+00 : f32
    %126 = vector.broadcast %cst_26 : f32 to vector<16x32xf32>
    %127 = arith.addf %126, %125 : vector<16x32xf32>
    %128 = arith.divf %126, %127 : vector<16x32xf32>
    %129 = vector.extract_strided_slice %110 {offsets = [0, 64], sizes = [16, 32], strides = [1, 1]} : vector<16x96xf32> to vector<16x32xf32>
    %130 = vector.extract_strided_slice %112 {offsets = [0, 64], sizes = [16, 32], strides = [1, 1]} : vector<16x96xf32> to vector<16x32xf32>
    %131 = arith.mulf %120, %130 : vector<16x32xf32>
    %132 = arith.addf %129, %131 : vector<16x32xf32>
    %133 = math.tanh %132 : vector<16x32xf32>
    %cst_27 = arith.constant 1.000000e+00 : f32
    %134 = vector.broadcast %cst_27 : f32 to vector<16x32xf32>
    %135 = arith.subf %134, %128 : vector<16x32xf32>
    %136 = arith.mulf %135, %133 : vector<16x32xf32>
    %137 = arith.mulf %128, %79 : vector<16x32xf32>
    %138 = arith.addf %136, %137 : vector<16x32xf32>
    %139 = vector.extract_strided_slice %18 {offsets = [32, 0], sizes = [16, 96], strides = [1, 1]} : vector<128x96xf32> to vector<16x96xf32>
    %cst_28 = arith.constant dense<0.000000e+00> : vector<16x96xf32>
    %140 = tpu.matmul %108, %1, %cst_28 {dimension_numbers = #tpu.dot_dimension_numbers<[1], [0], [0], [1], [0, 0, 1, 1], [], []>} : vector<16x32xf32>, vector<32x96xf32>, vector<16x96xf32> -> vector<16x96xf32>
    %141 = arith.addf %140, %8 : vector<16x96xf32>
    %142 = vector.extract_strided_slice %139 {offsets = [0, 0], sizes = [16, 32], strides = [1, 1]} : vector<16x96xf32> to vector<16x32xf32>
    %143 = vector.extract_strided_slice %141 {offsets = [0, 0], sizes = [16, 32], strides = [1, 1]} : vector<16x96xf32> to vector<16x32xf32>
    %144 = arith.addf %142, %143 : vector<16x32xf32>
    %145 = arith.negf %144 : vector<16x32xf32>
    %146 = math.exp %145 : vector<16x32xf32>
    %cst_29 = arith.constant 1.000000e+00 : f32
    %147 = vector.broadcast %cst_29 : f32 to vector<16x32xf32>
    %148 = arith.addf %147, %146 : vector<16x32xf32>
    %149 = arith.divf %147, %148 : vector<16x32xf32>
    %150 = vector.extract_strided_slice %139 {offsets = [0, 32], sizes = [16, 32], strides = [1, 1]} : vector<16x96xf32> to vector<16x32xf32>
    %151 = vector.extract_strided_slice %141 {offsets = [0, 32], sizes = [16, 32], strides = [1, 1]} : vector<16x96xf32> to vector<16x32xf32>
    %152 = arith.addf %150, %151 : vector<16x32xf32>
    %153 = arith.negf %152 : vector<16x32xf32>
    %154 = math.exp %153 : vector<16x32xf32>
    %cst_30 = arith.constant 1.000000e+00 : f32
    %155 = vector.broadcast %cst_30 : f32 to vector<16x32xf32>
    %156 = arith.addf %155, %154 : vector<16x32xf32>
    %157 = arith.divf %155, %156 : vector<16x32xf32>
    %158 = vector.extract_strided_slice %139 {offsets = [0, 64], sizes = [16, 32], strides = [1, 1]} : vector<16x96xf32> to vector<16x32xf32>
    %159 = vector.extract_strided_slice %141 {offsets = [0, 64], sizes = [16, 32], strides = [1, 1]} : vector<16x96xf32> to vector<16x32xf32>
    %160 = arith.mulf %149, %159 : vector<16x32xf32>
    %161 = arith.addf %158, %160 : vector<16x32xf32>
    %162 = math.tanh %161 : vector<16x32xf32>
    %cst_31 = arith.constant 1.000000e+00 : f32
    %163 = vector.broadcast %cst_31 : f32 to vector<16x32xf32>
    %164 = arith.subf %163, %157 : vector<16x32xf32>
    %165 = arith.mulf %164, %162 : vector<16x32xf32>
    %166 = arith.mulf %157, %108 : vector<16x32xf32>
    %167 = arith.addf %165, %166 : vector<16x32xf32>
    %cst_32 = arith.constant dense<0.000000e+00> : vector<16x96xf32>
    %168 = tpu.matmul %167, %2, %cst_32 {dimension_numbers = #tpu.dot_dimension_numbers<[1], [0], [0], [1], [0, 0, 1, 1], [], []>} : vector<16x32xf32>, vector<32x96xf32>, vector<16x96xf32> -> vector<16x96xf32>
    %169 = arith.addf %168, %11 : vector<16x96xf32>
    %cst_33 = arith.constant dense<0.000000e+00> : vector<16x96xf32>
    %170 = tpu.matmul %138, %3, %cst_33 {dimension_numbers = #tpu.dot_dimension_numbers<[1], [0], [0], [1], [0, 0, 1, 1], [], []>} : vector<16x32xf32>, vector<32x96xf32>, vector<16x96xf32> -> vector<16x96xf32>
    %171 = arith.addf %170, %14 : vector<16x96xf32>
    %172 = vector.extract_strided_slice %169 {offsets = [0, 0], sizes = [16, 32], strides = [1, 1]} : vector<16x96xf32> to vector<16x32xf32>
    %173 = vector.extract_strided_slice %171 {offsets = [0, 0], sizes = [16, 32], strides = [1, 1]} : vector<16x96xf32> to vector<16x32xf32>
    %174 = arith.addf %172, %173 : vector<16x32xf32>
    %175 = arith.negf %174 : vector<16x32xf32>
    %176 = math.exp %175 : vector<16x32xf32>
    %cst_34 = arith.constant 1.000000e+00 : f32
    %177 = vector.broadcast %cst_34 : f32 to vector<16x32xf32>
    %178 = arith.addf %177, %176 : vector<16x32xf32>
    %179 = arith.divf %177, %178 : vector<16x32xf32>
    %180 = vector.extract_strided_slice %169 {offsets = [0, 32], sizes = [16, 32], strides = [1, 1]} : vector<16x96xf32> to vector<16x32xf32>
    %181 = vector.extract_strided_slice %171 {offsets = [0, 32], sizes = [16, 32], strides = [1, 1]} : vector<16x96xf32> to vector<16x32xf32>
    %182 = arith.addf %180, %181 : vector<16x32xf32>
    %183 = arith.negf %182 : vector<16x32xf32>
    %184 = math.exp %183 : vector<16x32xf32>
    %cst_35 = arith.constant 1.000000e+00 : f32
    %185 = vector.broadcast %cst_35 : f32 to vector<16x32xf32>
    %186 = arith.addf %185, %184 : vector<16x32xf32>
    %187 = arith.divf %185, %186 : vector<16x32xf32>
    %188 = vector.extract_strided_slice %169 {offsets = [0, 64], sizes = [16, 32], strides = [1, 1]} : vector<16x96xf32> to vector<16x32xf32>
    %189 = vector.extract_strided_slice %171 {offsets = [0, 64], sizes = [16, 32], strides = [1, 1]} : vector<16x96xf32> to vector<16x32xf32>
    %190 = arith.mulf %179, %189 : vector<16x32xf32>
    %191 = arith.addf %188, %190 : vector<16x32xf32>
    %192 = math.tanh %191 : vector<16x32xf32>
    %cst_36 = arith.constant 1.000000e+00 : f32
    %193 = vector.broadcast %cst_36 : f32 to vector<16x32xf32>
    %194 = arith.subf %193, %187 : vector<16x32xf32>
    %195 = arith.mulf %194, %192 : vector<16x32xf32>
    %196 = arith.mulf %187, %138 : vector<16x32xf32>
    %197 = arith.addf %195, %196 : vector<16x32xf32>
    %198 = vector.extract_strided_slice %18 {offsets = [48, 0], sizes = [16, 96], strides = [1, 1]} : vector<128x96xf32> to vector<16x96xf32>
    %cst_37 = arith.constant dense<0.000000e+00> : vector<16x96xf32>
    %199 = tpu.matmul %167, %1, %cst_37 {dimension_numbers = #tpu.dot_dimension_numbers<[1], [0], [0], [1], [0, 0, 1, 1], [], []>} : vector<16x32xf32>, vector<32x96xf32>, vector<16x96xf32> -> vector<16x96xf32>
    %200 = arith.addf %199, %8 : vector<16x96xf32>
    %201 = vector.extract_strided_slice %198 {offsets = [0, 0], sizes = [16, 32], strides = [1, 1]} : vector<16x96xf32> to vector<16x32xf32>
    %202 = vector.extract_strided_slice %200 {offsets = [0, 0], sizes = [16, 32], strides = [1, 1]} : vector<16x96xf32> to vector<16x32xf32>
    %203 = arith.addf %201, %202 : vector<16x32xf32>
    %204 = arith.negf %203 : vector<16x32xf32>
    %205 = math.exp %204 : vector<16x32xf32>
    %cst_38 = arith.constant 1.000000e+00 : f32
    %206 = vector.broadcast %cst_38 : f32 to vector<16x32xf32>
    %207 = arith.addf %206, %205 : vector<16x32xf32>
    %208 = arith.divf %206, %207 : vector<16x32xf32>
    %209 = vector.extract_strided_slice %198 {offsets = [0, 32], sizes = [16, 32], strides = [1, 1]} : vector<16x96xf32> to vector<16x32xf32>
    %210 = vector.extract_strided_slice %200 {offsets = [0, 32], sizes = [16, 32], strides = [1, 1]} : vector<16x96xf32> to vector<16x32xf32>
    %211 = arith.addf %209, %210 : vector<16x32xf32>
    %212 = arith.negf %211 : vector<16x32xf32>
    %213 = math.exp %212 : vector<16x32xf32>
    %cst_39 = arith.constant 1.000000e+00 : f32
    %214 = vector.broadcast %cst_39 : f32 to vector<16x32xf32>
    %215 = arith.addf %214, %213 : vector<16x32xf32>
    %216 = arith.divf %214, %215 : vector<16x32xf32>
    %217 = vector.extract_strided_slice %198 {offsets = [0, 64], sizes = [16, 32], strides = [1, 1]} : vector<16x96xf32> to vector<16x32xf32>
    %218 = vector.extract_strided_slice %200 {offsets = [0, 64], sizes = [16, 32], strides = [1, 1]} : vector<16x96xf32> to vector<16x32xf32>
    %219 = arith.mulf %208, %218 : vector<16x32xf32>
    %220 = arith.addf %217, %219 : vector<16x32xf32>
    %221 = math.tanh %220 : vector<16x32xf32>
    %cst_40 = arith.constant 1.000000e+00 : f32
    %222 = vector.broadcast %cst_40 : f32 to vector<16x32xf32>
    %223 = arith.subf %222, %216 : vector<16x32xf32>
    %224 = arith.mulf %223, %221 : vector<16x32xf32>
    %225 = arith.mulf %216, %167 : vector<16x32xf32>
    %226 = arith.addf %224, %225 : vector<16x32xf32>
    %cst_41 = arith.constant dense<0.000000e+00> : vector<16x96xf32>
    %227 = tpu.matmul %226, %2, %cst_41 {dimension_numbers = #tpu.dot_dimension_numbers<[1], [0], [0], [1], [0, 0, 1, 1], [], []>} : vector<16x32xf32>, vector<32x96xf32>, vector<16x96xf32> -> vector<16x96xf32>
    %228 = arith.addf %227, %11 : vector<16x96xf32>
    %cst_42 = arith.constant dense<0.000000e+00> : vector<16x96xf32>
    %229 = tpu.matmul %197, %3, %cst_42 {dimension_numbers = #tpu.dot_dimension_numbers<[1], [0], [0], [1], [0, 0, 1, 1], [], []>} : vector<16x32xf32>, vector<32x96xf32>, vector<16x96xf32> -> vector<16x96xf32>
    %230 = arith.addf %229, %14 : vector<16x96xf32>
    %231 = vector.extract_strided_slice %228 {offsets = [0, 0], sizes = [16, 32], strides = [1, 1]} : vector<16x96xf32> to vector<16x32xf32>
    %232 = vector.extract_strided_slice %230 {offsets = [0, 0], sizes = [16, 32], strides = [1, 1]} : vector<16x96xf32> to vector<16x32xf32>
    %233 = arith.addf %231, %232 : vector<16x32xf32>
    %234 = arith.negf %233 : vector<16x32xf32>
    %235 = math.exp %234 : vector<16x32xf32>
    %cst_43 = arith.constant 1.000000e+00 : f32
    %236 = vector.broadcast %cst_43 : f32 to vector<16x32xf32>
    %237 = arith.addf %236, %235 : vector<16x32xf32>
    %238 = arith.divf %236, %237 : vector<16x32xf32>
    %239 = vector.extract_strided_slice %228 {offsets = [0, 32], sizes = [16, 32], strides = [1, 1]} : vector<16x96xf32> to vector<16x32xf32>
    %240 = vector.extract_strided_slice %230 {offsets = [0, 32], sizes = [16, 32], strides = [1, 1]} : vector<16x96xf32> to vector<16x32xf32>
    %241 = arith.addf %239, %240 : vector<16x32xf32>
    %242 = arith.negf %241 : vector<16x32xf32>
    %243 = math.exp %242 : vector<16x32xf32>
    %cst_44 = arith.constant 1.000000e+00 : f32
    %244 = vector.broadcast %cst_44 : f32 to vector<16x32xf32>
    %245 = arith.addf %244, %243 : vector<16x32xf32>
    %246 = arith.divf %244, %245 : vector<16x32xf32>
    %247 = vector.extract_strided_slice %228 {offsets = [0, 64], sizes = [16, 32], strides = [1, 1]} : vector<16x96xf32> to vector<16x32xf32>
    %248 = vector.extract_strided_slice %230 {offsets = [0, 64], sizes = [16, 32], strides = [1, 1]} : vector<16x96xf32> to vector<16x32xf32>
    %249 = arith.mulf %238, %248 : vector<16x32xf32>
    %250 = arith.addf %247, %249 : vector<16x32xf32>
    %251 = math.tanh %250 : vector<16x32xf32>
    %cst_45 = arith.constant 1.000000e+00 : f32
    %252 = vector.broadcast %cst_45 : f32 to vector<16x32xf32>
    %253 = arith.subf %252, %246 : vector<16x32xf32>
    %254 = arith.mulf %253, %251 : vector<16x32xf32>
    %255 = arith.mulf %246, %197 : vector<16x32xf32>
    %256 = arith.addf %254, %255 : vector<16x32xf32>
    %257 = vector.extract_strided_slice %18 {offsets = [64, 0], sizes = [16, 96], strides = [1, 1]} : vector<128x96xf32> to vector<16x96xf32>
    %cst_46 = arith.constant dense<0.000000e+00> : vector<16x96xf32>
    %258 = tpu.matmul %226, %1, %cst_46 {dimension_numbers = #tpu.dot_dimension_numbers<[1], [0], [0], [1], [0, 0, 1, 1], [], []>} : vector<16x32xf32>, vector<32x96xf32>, vector<16x96xf32> -> vector<16x96xf32>
    %259 = arith.addf %258, %8 : vector<16x96xf32>
    %260 = vector.extract_strided_slice %257 {offsets = [0, 0], sizes = [16, 32], strides = [1, 1]} : vector<16x96xf32> to vector<16x32xf32>
    %261 = vector.extract_strided_slice %259 {offsets = [0, 0], sizes = [16, 32], strides = [1, 1]} : vector<16x96xf32> to vector<16x32xf32>
    %262 = arith.addf %260, %261 : vector<16x32xf32>
    %263 = arith.negf %262 : vector<16x32xf32>
    %264 = math.exp %263 : vector<16x32xf32>
    %cst_47 = arith.constant 1.000000e+00 : f32
    %265 = vector.broadcast %cst_47 : f32 to vector<16x32xf32>
    %266 = arith.addf %265, %264 : vector<16x32xf32>
    %267 = arith.divf %265, %266 : vector<16x32xf32>
    %268 = vector.extract_strided_slice %257 {offsets = [0, 32], sizes = [16, 32], strides = [1, 1]} : vector<16x96xf32> to vector<16x32xf32>
    %269 = vector.extract_strided_slice %259 {offsets = [0, 32], sizes = [16, 32], strides = [1, 1]} : vector<16x96xf32> to vector<16x32xf32>
    %270 = arith.addf %268, %269 : vector<16x32xf32>
    %271 = arith.negf %270 : vector<16x32xf32>
    %272 = math.exp %271 : vector<16x32xf32>
    %cst_48 = arith.constant 1.000000e+00 : f32
    %273 = vector.broadcast %cst_48 : f32 to vector<16x32xf32>
    %274 = arith.addf %273, %272 : vector<16x32xf32>
    %275 = arith.divf %273, %274 : vector<16x32xf32>
    %276 = vector.extract_strided_slice %257 {offsets = [0, 64], sizes = [16, 32], strides = [1, 1]} : vector<16x96xf32> to vector<16x32xf32>
    %277 = vector.extract_strided_slice %259 {offsets = [0, 64], sizes = [16, 32], strides = [1, 1]} : vector<16x96xf32> to vector<16x32xf32>
    %278 = arith.mulf %267, %277 : vector<16x32xf32>
    %279 = arith.addf %276, %278 : vector<16x32xf32>
    %280 = math.tanh %279 : vector<16x32xf32>
    %cst_49 = arith.constant 1.000000e+00 : f32
    %281 = vector.broadcast %cst_49 : f32 to vector<16x32xf32>
    %282 = arith.subf %281, %275 : vector<16x32xf32>
    %283 = arith.mulf %282, %280 : vector<16x32xf32>
    %284 = arith.mulf %275, %226 : vector<16x32xf32>
    %285 = arith.addf %283, %284 : vector<16x32xf32>
    %cst_50 = arith.constant dense<0.000000e+00> : vector<16x96xf32>
    %286 = tpu.matmul %285, %2, %cst_50 {dimension_numbers = #tpu.dot_dimension_numbers<[1], [0], [0], [1], [0, 0, 1, 1], [], []>} : vector<16x32xf32>, vector<32x96xf32>, vector<16x96xf32> -> vector<16x96xf32>
    %287 = arith.addf %286, %11 : vector<16x96xf32>
    %cst_51 = arith.constant dense<0.000000e+00> : vector<16x96xf32>
    %288 = tpu.matmul %256, %3, %cst_51 {dimension_numbers = #tpu.dot_dimension_numbers<[1], [0], [0], [1], [0, 0, 1, 1], [], []>} : vector<16x32xf32>, vector<32x96xf32>, vector<16x96xf32> -> vector<16x96xf32>
    %289 = arith.addf %288, %14 : vector<16x96xf32>
    %290 = vector.extract_strided_slice %287 {offsets = [0, 0], sizes = [16, 32], strides = [1, 1]} : vector<16x96xf32> to vector<16x32xf32>
    %291 = vector.extract_strided_slice %289 {offsets = [0, 0], sizes = [16, 32], strides = [1, 1]} : vector<16x96xf32> to vector<16x32xf32>
    %292 = arith.addf %290, %291 : vector<16x32xf32>
    %293 = arith.negf %292 : vector<16x32xf32>
    %294 = math.exp %293 : vector<16x32xf32>
    %cst_52 = arith.constant 1.000000e+00 : f32
    %295 = vector.broadcast %cst_52 : f32 to vector<16x32xf32>
    %296 = arith.addf %295, %294 : vector<16x32xf32>
    %297 = arith.divf %295, %296 : vector<16x32xf32>
    %298 = vector.extract_strided_slice %287 {offsets = [0, 32], sizes = [16, 32], strides = [1, 1]} : vector<16x96xf32> to vector<16x32xf32>
    %299 = vector.extract_strided_slice %289 {offsets = [0, 32], sizes = [16, 32], strides = [1, 1]} : vector<16x96xf32> to vector<16x32xf32>
    %300 = arith.addf %298, %299 : vector<16x32xf32>
    %301 = arith.negf %300 : vector<16x32xf32>
    %302 = math.exp %301 : vector<16x32xf32>
    %cst_53 = arith.constant 1.000000e+00 : f32
    %303 = vector.broadcast %cst_53 : f32 to vector<16x32xf32>
    %304 = arith.addf %303, %302 : vector<16x32xf32>
    %305 = arith.divf %303, %304 : vector<16x32xf32>
    %306 = vector.extract_strided_slice %287 {offsets = [0, 64], sizes = [16, 32], strides = [1, 1]} : vector<16x96xf32> to vector<16x32xf32>
    %307 = vector.extract_strided_slice %289 {offsets = [0, 64], sizes = [16, 32], strides = [1, 1]} : vector<16x96xf32> to vector<16x32xf32>
    %308 = arith.mulf %297, %307 : vector<16x32xf32>
    %309 = arith.addf %306, %308 : vector<16x32xf32>
    %310 = math.tanh %309 : vector<16x32xf32>
    %cst_54 = arith.constant 1.000000e+00 : f32
    %311 = vector.broadcast %cst_54 : f32 to vector<16x32xf32>
    %312 = arith.subf %311, %305 : vector<16x32xf32>
    %313 = arith.mulf %312, %310 : vector<16x32xf32>
    %314 = arith.mulf %305, %256 : vector<16x32xf32>
    %315 = arith.addf %313, %314 : vector<16x32xf32>
    %316 = vector.extract_strided_slice %18 {offsets = [80, 0], sizes = [16, 96], strides = [1, 1]} : vector<128x96xf32> to vector<16x96xf32>
    %cst_55 = arith.constant dense<0.000000e+00> : vector<16x96xf32>
    %317 = tpu.matmul %285, %1, %cst_55 {dimension_numbers = #tpu.dot_dimension_numbers<[1], [0], [0], [1], [0, 0, 1, 1], [], []>} : vector<16x32xf32>, vector<32x96xf32>, vector<16x96xf32> -> vector<16x96xf32>
    %318 = arith.addf %317, %8 : vector<16x96xf32>
    %319 = vector.extract_strided_slice %316 {offsets = [0, 0], sizes = [16, 32], strides = [1, 1]} : vector<16x96xf32> to vector<16x32xf32>
    %320 = vector.extract_strided_slice %318 {offsets = [0, 0], sizes = [16, 32], strides = [1, 1]} : vector<16x96xf32> to vector<16x32xf32>
    %321 = arith.addf %319, %320 : vector<16x32xf32>
    %322 = arith.negf %321 : vector<16x32xf32>
    %323 = math.exp %322 : vector<16x32xf32>
    %cst_56 = arith.constant 1.000000e+00 : f32
    %324 = vector.broadcast %cst_56 : f32 to vector<16x32xf32>
    %325 = arith.addf %324, %323 : vector<16x32xf32>
    %326 = arith.divf %324, %325 : vector<16x32xf32>
    %327 = vector.extract_strided_slice %316 {offsets = [0, 32], sizes = [16, 32], strides = [1, 1]} : vector<16x96xf32> to vector<16x32xf32>
    %328 = vector.extract_strided_slice %318 {offsets = [0, 32], sizes = [16, 32], strides = [1, 1]} : vector<16x96xf32> to vector<16x32xf32>
    %329 = arith.addf %327, %328 : vector<16x32xf32>
    %330 = arith.negf %329 : vector<16x32xf32>
    %331 = math.exp %330 : vector<16x32xf32>
    %cst_57 = arith.constant 1.000000e+00 : f32
    %332 = vector.broadcast %cst_57 : f32 to vector<16x32xf32>
    %333 = arith.addf %332, %331 : vector<16x32xf32>
    %334 = arith.divf %332, %333 : vector<16x32xf32>
    %335 = vector.extract_strided_slice %316 {offsets = [0, 64], sizes = [16, 32], strides = [1, 1]} : vector<16x96xf32> to vector<16x32xf32>
    %336 = vector.extract_strided_slice %318 {offsets = [0, 64], sizes = [16, 32], strides = [1, 1]} : vector<16x96xf32> to vector<16x32xf32>
    %337 = arith.mulf %326, %336 : vector<16x32xf32>
    %338 = arith.addf %335, %337 : vector<16x32xf32>
    %339 = math.tanh %338 : vector<16x32xf32>
    %cst_58 = arith.constant 1.000000e+00 : f32
    %340 = vector.broadcast %cst_58 : f32 to vector<16x32xf32>
    %341 = arith.subf %340, %334 : vector<16x32xf32>
    %342 = arith.mulf %341, %339 : vector<16x32xf32>
    %343 = arith.mulf %334, %285 : vector<16x32xf32>
    %344 = arith.addf %342, %343 : vector<16x32xf32>
    %cst_59 = arith.constant dense<0.000000e+00> : vector<16x96xf32>
    %345 = tpu.matmul %344, %2, %cst_59 {dimension_numbers = #tpu.dot_dimension_numbers<[1], [0], [0], [1], [0, 0, 1, 1], [], []>} : vector<16x32xf32>, vector<32x96xf32>, vector<16x96xf32> -> vector<16x96xf32>
    %346 = arith.addf %345, %11 : vector<16x96xf32>
    %cst_60 = arith.constant dense<0.000000e+00> : vector<16x96xf32>
    %347 = tpu.matmul %315, %3, %cst_60 {dimension_numbers = #tpu.dot_dimension_numbers<[1], [0], [0], [1], [0, 0, 1, 1], [], []>} : vector<16x32xf32>, vector<32x96xf32>, vector<16x96xf32> -> vector<16x96xf32>
    %348 = arith.addf %347, %14 : vector<16x96xf32>
    %349 = vector.extract_strided_slice %346 {offsets = [0, 0], sizes = [16, 32], strides = [1, 1]} : vector<16x96xf32> to vector<16x32xf32>
    %350 = vector.extract_strided_slice %348 {offsets = [0, 0], sizes = [16, 32], strides = [1, 1]} : vector<16x96xf32> to vector<16x32xf32>
    %351 = arith.addf %349, %350 : vector<16x32xf32>
    %352 = arith.negf %351 : vector<16x32xf32>
    %353 = math.exp %352 : vector<16x32xf32>
    %cst_61 = arith.constant 1.000000e+00 : f32
    %354 = vector.broadcast %cst_61 : f32 to vector<16x32xf32>
    %355 = arith.addf %354, %353 : vector<16x32xf32>
    %356 = arith.divf %354, %355 : vector<16x32xf32>
    %357 = vector.extract_strided_slice %346 {offsets = [0, 32], sizes = [16, 32], strides = [1, 1]} : vector<16x96xf32> to vector<16x32xf32>
    %358 = vector.extract_strided_slice %348 {offsets = [0, 32], sizes = [16, 32], strides = [1, 1]} : vector<16x96xf32> to vector<16x32xf32>
    %359 = arith.addf %357, %358 : vector<16x32xf32>
    %360 = arith.negf %359 : vector<16x32xf32>
    %361 = math.exp %360 : vector<16x32xf32>
    %cst_62 = arith.constant 1.000000e+00 : f32
    %362 = vector.broadcast %cst_62 : f32 to vector<16x32xf32>
    %363 = arith.addf %362, %361 : vector<16x32xf32>
    %364 = arith.divf %362, %363 : vector<16x32xf32>
    %365 = vector.extract_strided_slice %346 {offsets = [0, 64], sizes = [16, 32], strides = [1, 1]} : vector<16x96xf32> to vector<16x32xf32>
    %366 = vector.extract_strided_slice %348 {offsets = [0, 64], sizes = [16, 32], strides = [1, 1]} : vector<16x96xf32> to vector<16x32xf32>
    %367 = arith.mulf %356, %366 : vector<16x32xf32>
    %368 = arith.addf %365, %367 : vector<16x32xf32>
    %369 = math.tanh %368 : vector<16x32xf32>
    %cst_63 = arith.constant 1.000000e+00 : f32
    %370 = vector.broadcast %cst_63 : f32 to vector<16x32xf32>
    %371 = arith.subf %370, %364 : vector<16x32xf32>
    %372 = arith.mulf %371, %369 : vector<16x32xf32>
    %373 = arith.mulf %364, %315 : vector<16x32xf32>
    %374 = arith.addf %372, %373 : vector<16x32xf32>
    %375 = vector.extract_strided_slice %18 {offsets = [96, 0], sizes = [16, 96], strides = [1, 1]} : vector<128x96xf32> to vector<16x96xf32>
    %cst_64 = arith.constant dense<0.000000e+00> : vector<16x96xf32>
    %376 = tpu.matmul %344, %1, %cst_64 {dimension_numbers = #tpu.dot_dimension_numbers<[1], [0], [0], [1], [0, 0, 1, 1], [], []>} : vector<16x32xf32>, vector<32x96xf32>, vector<16x96xf32> -> vector<16x96xf32>
    %377 = arith.addf %376, %8 : vector<16x96xf32>
    %378 = vector.extract_strided_slice %375 {offsets = [0, 0], sizes = [16, 32], strides = [1, 1]} : vector<16x96xf32> to vector<16x32xf32>
    %379 = vector.extract_strided_slice %377 {offsets = [0, 0], sizes = [16, 32], strides = [1, 1]} : vector<16x96xf32> to vector<16x32xf32>
    %380 = arith.addf %378, %379 : vector<16x32xf32>
    %381 = arith.negf %380 : vector<16x32xf32>
    %382 = math.exp %381 : vector<16x32xf32>
    %cst_65 = arith.constant 1.000000e+00 : f32
    %383 = vector.broadcast %cst_65 : f32 to vector<16x32xf32>
    %384 = arith.addf %383, %382 : vector<16x32xf32>
    %385 = arith.divf %383, %384 : vector<16x32xf32>
    %386 = vector.extract_strided_slice %375 {offsets = [0, 32], sizes = [16, 32], strides = [1, 1]} : vector<16x96xf32> to vector<16x32xf32>
    %387 = vector.extract_strided_slice %377 {offsets = [0, 32], sizes = [16, 32], strides = [1, 1]} : vector<16x96xf32> to vector<16x32xf32>
    %388 = arith.addf %386, %387 : vector<16x32xf32>
    %389 = arith.negf %388 : vector<16x32xf32>
    %390 = math.exp %389 : vector<16x32xf32>
    %cst_66 = arith.constant 1.000000e+00 : f32
    %391 = vector.broadcast %cst_66 : f32 to vector<16x32xf32>
    %392 = arith.addf %391, %390 : vector<16x32xf32>
    %393 = arith.divf %391, %392 : vector<16x32xf32>
    %394 = vector.extract_strided_slice %375 {offsets = [0, 64], sizes = [16, 32], strides = [1, 1]} : vector<16x96xf32> to vector<16x32xf32>
    %395 = vector.extract_strided_slice %377 {offsets = [0, 64], sizes = [16, 32], strides = [1, 1]} : vector<16x96xf32> to vector<16x32xf32>
    %396 = arith.mulf %385, %395 : vector<16x32xf32>
    %397 = arith.addf %394, %396 : vector<16x32xf32>
    %398 = math.tanh %397 : vector<16x32xf32>
    %cst_67 = arith.constant 1.000000e+00 : f32
    %399 = vector.broadcast %cst_67 : f32 to vector<16x32xf32>
    %400 = arith.subf %399, %393 : vector<16x32xf32>
    %401 = arith.mulf %400, %398 : vector<16x32xf32>
    %402 = arith.mulf %393, %344 : vector<16x32xf32>
    %403 = arith.addf %401, %402 : vector<16x32xf32>
    %cst_68 = arith.constant dense<0.000000e+00> : vector<16x96xf32>
    %404 = tpu.matmul %403, %2, %cst_68 {dimension_numbers = #tpu.dot_dimension_numbers<[1], [0], [0], [1], [0, 0, 1, 1], [], []>} : vector<16x32xf32>, vector<32x96xf32>, vector<16x96xf32> -> vector<16x96xf32>
    %405 = arith.addf %404, %11 : vector<16x96xf32>
    %cst_69 = arith.constant dense<0.000000e+00> : vector<16x96xf32>
    %406 = tpu.matmul %374, %3, %cst_69 {dimension_numbers = #tpu.dot_dimension_numbers<[1], [0], [0], [1], [0, 0, 1, 1], [], []>} : vector<16x32xf32>, vector<32x96xf32>, vector<16x96xf32> -> vector<16x96xf32>
    %407 = arith.addf %406, %14 : vector<16x96xf32>
    %408 = vector.extract_strided_slice %405 {offsets = [0, 0], sizes = [16, 32], strides = [1, 1]} : vector<16x96xf32> to vector<16x32xf32>
    %409 = vector.extract_strided_slice %407 {offsets = [0, 0], sizes = [16, 32], strides = [1, 1]} : vector<16x96xf32> to vector<16x32xf32>
    %410 = arith.addf %408, %409 : vector<16x32xf32>
    %411 = arith.negf %410 : vector<16x32xf32>
    %412 = math.exp %411 : vector<16x32xf32>
    %cst_70 = arith.constant 1.000000e+00 : f32
    %413 = vector.broadcast %cst_70 : f32 to vector<16x32xf32>
    %414 = arith.addf %413, %412 : vector<16x32xf32>
    %415 = arith.divf %413, %414 : vector<16x32xf32>
    %416 = vector.extract_strided_slice %405 {offsets = [0, 32], sizes = [16, 32], strides = [1, 1]} : vector<16x96xf32> to vector<16x32xf32>
    %417 = vector.extract_strided_slice %407 {offsets = [0, 32], sizes = [16, 32], strides = [1, 1]} : vector<16x96xf32> to vector<16x32xf32>
    %418 = arith.addf %416, %417 : vector<16x32xf32>
    %419 = arith.negf %418 : vector<16x32xf32>
    %420 = math.exp %419 : vector<16x32xf32>
    %cst_71 = arith.constant 1.000000e+00 : f32
    %421 = vector.broadcast %cst_71 : f32 to vector<16x32xf32>
    %422 = arith.addf %421, %420 : vector<16x32xf32>
    %423 = arith.divf %421, %422 : vector<16x32xf32>
    %424 = vector.extract_strided_slice %405 {offsets = [0, 64], sizes = [16, 32], strides = [1, 1]} : vector<16x96xf32> to vector<16x32xf32>
    %425 = vector.extract_strided_slice %407 {offsets = [0, 64], sizes = [16, 32], strides = [1, 1]} : vector<16x96xf32> to vector<16x32xf32>
    %426 = arith.mulf %415, %425 : vector<16x32xf32>
    %427 = arith.addf %424, %426 : vector<16x32xf32>
    %428 = math.tanh %427 : vector<16x32xf32>
    %cst_72 = arith.constant 1.000000e+00 : f32
    %429 = vector.broadcast %cst_72 : f32 to vector<16x32xf32>
    %430 = arith.subf %429, %423 : vector<16x32xf32>
    %431 = arith.mulf %430, %428 : vector<16x32xf32>
    %432 = arith.mulf %423, %374 : vector<16x32xf32>
    %433 = arith.addf %431, %432 : vector<16x32xf32>
    %434 = vector.extract_strided_slice %18 {offsets = [112, 0], sizes = [16, 96], strides = [1, 1]} : vector<128x96xf32> to vector<16x96xf32>
    %cst_73 = arith.constant dense<0.000000e+00> : vector<16x96xf32>
    %435 = tpu.matmul %403, %1, %cst_73 {dimension_numbers = #tpu.dot_dimension_numbers<[1], [0], [0], [1], [0, 0, 1, 1], [], []>} : vector<16x32xf32>, vector<32x96xf32>, vector<16x96xf32> -> vector<16x96xf32>
    %436 = arith.addf %435, %8 : vector<16x96xf32>
    %437 = vector.extract_strided_slice %434 {offsets = [0, 0], sizes = [16, 32], strides = [1, 1]} : vector<16x96xf32> to vector<16x32xf32>
    %438 = vector.extract_strided_slice %436 {offsets = [0, 0], sizes = [16, 32], strides = [1, 1]} : vector<16x96xf32> to vector<16x32xf32>
    %439 = arith.addf %437, %438 : vector<16x32xf32>
    %440 = arith.negf %439 : vector<16x32xf32>
    %441 = math.exp %440 : vector<16x32xf32>
    %cst_74 = arith.constant 1.000000e+00 : f32
    %442 = vector.broadcast %cst_74 : f32 to vector<16x32xf32>
    %443 = arith.addf %442, %441 : vector<16x32xf32>
    %444 = arith.divf %442, %443 : vector<16x32xf32>
    %445 = vector.extract_strided_slice %434 {offsets = [0, 32], sizes = [16, 32], strides = [1, 1]} : vector<16x96xf32> to vector<16x32xf32>
    %446 = vector.extract_strided_slice %436 {offsets = [0, 32], sizes = [16, 32], strides = [1, 1]} : vector<16x96xf32> to vector<16x32xf32>
    %447 = arith.addf %445, %446 : vector<16x32xf32>
    %448 = arith.negf %447 : vector<16x32xf32>
    %449 = math.exp %448 : vector<16x32xf32>
    %cst_75 = arith.constant 1.000000e+00 : f32
    %450 = vector.broadcast %cst_75 : f32 to vector<16x32xf32>
    %451 = arith.addf %450, %449 : vector<16x32xf32>
    %452 = arith.divf %450, %451 : vector<16x32xf32>
    %453 = vector.extract_strided_slice %434 {offsets = [0, 64], sizes = [16, 32], strides = [1, 1]} : vector<16x96xf32> to vector<16x32xf32>
    %454 = vector.extract_strided_slice %436 {offsets = [0, 64], sizes = [16, 32], strides = [1, 1]} : vector<16x96xf32> to vector<16x32xf32>
    %455 = arith.mulf %444, %454 : vector<16x32xf32>
    %456 = arith.addf %453, %455 : vector<16x32xf32>
    %457 = math.tanh %456 : vector<16x32xf32>
    %cst_76 = arith.constant 1.000000e+00 : f32
    %458 = vector.broadcast %cst_76 : f32 to vector<16x32xf32>
    %459 = arith.subf %458, %452 : vector<16x32xf32>
    %460 = arith.mulf %459, %457 : vector<16x32xf32>
    %461 = arith.mulf %452, %403 : vector<16x32xf32>
    %462 = arith.addf %460, %461 : vector<16x32xf32>
    %cst_77 = arith.constant dense<0.000000e+00> : vector<16x96xf32>
    %463 = tpu.matmul %462, %2, %cst_77 {dimension_numbers = #tpu.dot_dimension_numbers<[1], [0], [0], [1], [0, 0, 1, 1], [], []>} : vector<16x32xf32>, vector<32x96xf32>, vector<16x96xf32> -> vector<16x96xf32>
    %464 = arith.addf %463, %11 : vector<16x96xf32>
    %cst_78 = arith.constant dense<0.000000e+00> : vector<16x96xf32>
    %465 = tpu.matmul %433, %3, %cst_78 {dimension_numbers = #tpu.dot_dimension_numbers<[1], [0], [0], [1], [0, 0, 1, 1], [], []>} : vector<16x32xf32>, vector<32x96xf32>, vector<16x96xf32> -> vector<16x96xf32>
    %466 = arith.addf %465, %14 : vector<16x96xf32>
    %467 = vector.extract_strided_slice %464 {offsets = [0, 0], sizes = [16, 32], strides = [1, 1]} : vector<16x96xf32> to vector<16x32xf32>
    %468 = vector.extract_strided_slice %466 {offsets = [0, 0], sizes = [16, 32], strides = [1, 1]} : vector<16x96xf32> to vector<16x32xf32>
    %469 = arith.addf %467, %468 : vector<16x32xf32>
    %470 = arith.negf %469 : vector<16x32xf32>
    %471 = math.exp %470 : vector<16x32xf32>
    %cst_79 = arith.constant 1.000000e+00 : f32
    %472 = vector.broadcast %cst_79 : f32 to vector<16x32xf32>
    %473 = arith.addf %472, %471 : vector<16x32xf32>
    %474 = arith.divf %472, %473 : vector<16x32xf32>
    %475 = vector.extract_strided_slice %464 {offsets = [0, 32], sizes = [16, 32], strides = [1, 1]} : vector<16x96xf32> to vector<16x32xf32>
    %476 = vector.extract_strided_slice %466 {offsets = [0, 32], sizes = [16, 32], strides = [1, 1]} : vector<16x96xf32> to vector<16x32xf32>
    %477 = arith.addf %475, %476 : vector<16x32xf32>
    %478 = arith.negf %477 : vector<16x32xf32>
    %479 = math.exp %478 : vector<16x32xf32>
    %cst_80 = arith.constant 1.000000e+00 : f32
    %480 = vector.broadcast %cst_80 : f32 to vector<16x32xf32>
    %481 = arith.addf %480, %479 : vector<16x32xf32>
    %482 = arith.divf %480, %481 : vector<16x32xf32>
    %483 = vector.extract_strided_slice %464 {offsets = [0, 64], sizes = [16, 32], strides = [1, 1]} : vector<16x96xf32> to vector<16x32xf32>
    %484 = vector.extract_strided_slice %466 {offsets = [0, 64], sizes = [16, 32], strides = [1, 1]} : vector<16x96xf32> to vector<16x32xf32>
    %485 = arith.mulf %474, %484 : vector<16x32xf32>
    %486 = arith.addf %483, %485 : vector<16x32xf32>
    %487 = math.tanh %486 : vector<16x32xf32>
    %cst_81 = arith.constant 1.000000e+00 : f32
    %488 = vector.broadcast %cst_81 : f32 to vector<16x32xf32>
    %489 = arith.subf %488, %482 : vector<16x32xf32>
    %490 = arith.mulf %489, %487 : vector<16x32xf32>
    %491 = arith.mulf %482, %433 : vector<16x32xf32>
    %492 = arith.addf %490, %491 : vector<16x32xf32>
    %c112 = arith.constant 112 : index
    %c0_82 = arith.constant 0 : index
    %493 = vector.load %arg0[%c112, %c0_82] : memref<128x8xf32, #tpu.memory_space<vmem>>, vector<16x8xf32>
    %c0_83 = arith.constant 0 : index
    %c0_84 = arith.constant 0 : index
    %494 = vector.load %arg4[%c0_83, %c0_84] : memref<16x8xf32, #tpu.memory_space<vmem>>, vector<16x8xf32>
    %495 = vector.extract_strided_slice %494 {offsets = [0, 0], sizes = [8, 8], strides = [1, 1]} : vector<16x8xf32> to vector<8x8xf32>
    %496 = vector.extract_strided_slice %494 {offsets = [8, 0], sizes = [1, 8], strides = [1, 1]} : vector<16x8xf32> to vector<1x8xf32>
    %497 = vector.extract_strided_slice %494 {offsets = [9, 0], sizes = [1, 8], strides = [1, 1]} : vector<16x8xf32> to vector<1x8xf32>
    %498 = vector.extract_strided_slice %494 {offsets = [10, 0], sizes = [1, 8], strides = [1, 1]} : vector<16x8xf32> to vector<1x8xf32>
    %cst_85 = arith.constant dense<0.000000e+00> : vector<16x8xf32>
    %499 = tpu.matmul %493, %495, %cst_85 {dimension_numbers = #tpu.dot_dimension_numbers<[1], [0], [0], [1], [0, 0, 1, 1], [], []>} : vector<16x8xf32>, vector<8x8xf32>, vector<16x8xf32> -> vector<16x8xf32>
    %500 = vector.broadcast %496 : vector<1x8xf32> to vector<16x8xf32>
    %501 = arith.mulf %499, %500 : vector<16x8xf32>
    %cst_86 = arith.constant dense<0.000000e+00> : vector<16xf32>
    %502 = vector.multi_reduction <add>, %501, %cst_86 [1] : vector<16x8xf32> to vector<16xf32>
    %503 = vector.shape_cast %502 : vector<16xf32> to vector<16x1xf32>
    %504 = vector.broadcast %497 : vector<1x8xf32> to vector<16x8xf32>
    %505 = arith.mulf %499, %504 : vector<16x8xf32>
    %cst_87 = arith.constant dense<0.000000e+00> : vector<16xf32>
    %506 = vector.multi_reduction <add>, %505, %cst_87 [1] : vector<16x8xf32> to vector<16xf32>
    %507 = vector.shape_cast %506 : vector<16xf32> to vector<16x1xf32>
    %508 = tpu.transpose %503, [1, 0] : vector<16x1xf32> -> vector<1x16xf32>
    %509 = vector.broadcast %507 : vector<16x1xf32> to vector<16x16xf32>
    %510 = vector.broadcast %508 : vector<1x16xf32> to vector<16x16xf32>
    %511 = arith.addf %509, %510 : vector<16x16xf32>
    %cst_88 = arith.constant 0.000000e+00 : f32
    %512 = vector.broadcast %cst_88 : f32 to vector<16x16xf32>
    %513 = arith.cmpf ogt, %511, %512 : vector<16x16xf32>
    %cst_89 = arith.constant 2.000000e-01 : f32
    %514 = vector.broadcast %cst_89 : f32 to vector<16x16xf32>
    %515 = arith.mulf %514, %511 : vector<16x16xf32>
    %516 = arith.select %513, %511, %515 : vector<16x16xi1>, vector<16x16xf32>
    %c0_90 = arith.constant 0 : index
    %c0_91 = arith.constant 0 : index
    %517 = vector.load %arg1[%c0_90, %c0_91] : memref<16x16xf32, #tpu.memory_space<vmem>>, vector<16x16xf32>
    %cst_92 = arith.constant 0.000000e+00 : f32
    %518 = vector.broadcast %cst_92 : f32 to vector<16x16xf32>
    %519 = arith.cmpf ogt, %517, %518 : vector<16x16xf32>
    %cst_93 = arith.constant -1.000000e+30 : f32
    %520 = vector.broadcast %cst_93 : f32 to vector<16x16xf32>
    %521 = arith.select %519, %516, %520 : vector<16x16xi1>, vector<16x16xf32>
    %cst_94 = arith.constant dense<0xFF800000> : vector<16xf32>
    %522 = vector.multi_reduction <maximumf>, %521, %cst_94 [1] : vector<16x16xf32> to vector<16xf32>
    %523 = vector.shape_cast %522 : vector<16xf32> to vector<16x1xf32>
    %524 = vector.broadcast %523 : vector<16x1xf32> to vector<16x16xf32>
    %525 = arith.subf %521, %524 : vector<16x16xf32>
    %526 = math.exp %525 : vector<16x16xf32>
    %cst_95 = arith.constant 0.000000e+00 : f32
    %527 = vector.broadcast %cst_95 : f32 to vector<16x16xf32>
    %528 = arith.select %519, %526, %527 : vector<16x16xi1>, vector<16x16xf32>
    %cst_96 = arith.constant dense<0.000000e+00> : vector<16xf32>
    %529 = vector.multi_reduction <add>, %528, %cst_96 [1] : vector<16x16xf32> to vector<16xf32>
    %530 = vector.shape_cast %529 : vector<16xf32> to vector<16x1xf32>
    %531 = tpu.reciprocal %530 {approx = true} : vector<16x1xf32> -> vector<16x1xf32>
    %532 = vector.broadcast %531 : vector<16x1xf32> to vector<16x16xf32>
    %533 = arith.mulf %528, %532 : vector<16x16xf32>
    %cst_97 = arith.constant dense<0.000000e+00> : vector<16x8xf32>
    %534 = tpu.matmul %533, %499, %cst_97 {dimension_numbers = #tpu.dot_dimension_numbers<[1], [0], [0], [1], [0, 0, 1, 1], [], []>} : vector<16x16xf32>, vector<16x8xf32>, vector<16x8xf32> -> vector<16x8xf32>
    %535 = vector.broadcast %498 : vector<1x8xf32> to vector<16x8xf32>
    %536 = arith.addf %534, %535 : vector<16x8xf32>
    %c104 = arith.constant 104 : index
    %c0_98 = arith.constant 0 : index
    %537 = vector.load %arg2[%c104, %c0_98] : memref<144x96xf32, #tpu.memory_space<vmem>>, vector<8x96xf32>
    %c112_99 = arith.constant 112 : index
    %c0_100 = arith.constant 0 : index
    %538 = vector.load %arg2[%c112_99, %c0_100] : memref<144x96xf32, #tpu.memory_space<vmem>>, vector<32x96xf32>
    %539 = vector.extract_strided_slice %4 {offsets = [4, 0], sizes = [1, 96], strides = [1, 1]} : vector<8x96xf32> to vector<1x96xf32>
    %540 = vector.extract_strided_slice %4 {offsets = [5, 0], sizes = [1, 96], strides = [1, 1]} : vector<8x96xf32> to vector<1x96xf32>
    %541 = vector.extract_strided_slice %4 {offsets = [6, 0], sizes = [1, 96], strides = [1, 1]} : vector<8x96xf32> to vector<1x96xf32>
    %542 = vector.extract_strided_slice %4 {offsets = [7, 0], sizes = [1, 96], strides = [1, 1]} : vector<8x96xf32> to vector<1x96xf32>
    %543 = arith.subf %493, %536 : vector<16x8xf32>
    %cst_101 = arith.constant 0.000000e+00 : f32
    %544 = vector.broadcast %cst_101 : f32 to vector<16x32xf32>
    %cst_102 = arith.constant dense<0.000000e+00> : vector<16x96xf32>
    %545 = tpu.matmul %543, %537, %cst_102 {dimension_numbers = #tpu.dot_dimension_numbers<[1], [0], [0], [1], [0, 0, 1, 1], [], []>} : vector<16x8xf32>, vector<8x96xf32>, vector<16x96xf32> -> vector<16x96xf32>
    %546 = vector.broadcast %539 : vector<1x96xf32> to vector<16x96xf32>
    %547 = arith.addf %545, %546 : vector<16x96xf32>
    %548 = vector.extract_strided_slice %547 {offsets = [0, 0], sizes = [16, 32], strides = [1, 1]} : vector<16x96xf32> to vector<16x32xf32>
    %549 = vector.extract_strided_slice %540 {offsets = [0, 0], sizes = [1, 32], strides = [1, 1]} : vector<1x96xf32> to vector<1x32xf32>
    %550 = vector.broadcast %549 : vector<1x32xf32> to vector<16x32xf32>
    %551 = arith.addf %548, %550 : vector<16x32xf32>
    %552 = arith.negf %551 : vector<16x32xf32>
    %553 = math.exp %552 : vector<16x32xf32>
    %cst_103 = arith.constant 1.000000e+00 : f32
    %554 = vector.broadcast %cst_103 : f32 to vector<16x32xf32>
    %555 = arith.addf %554, %553 : vector<16x32xf32>
    %556 = arith.divf %554, %555 : vector<16x32xf32>
    %557 = vector.extract_strided_slice %547 {offsets = [0, 32], sizes = [16, 32], strides = [1, 1]} : vector<16x96xf32> to vector<16x32xf32>
    %558 = vector.extract_strided_slice %540 {offsets = [0, 32], sizes = [1, 32], strides = [1, 1]} : vector<1x96xf32> to vector<1x32xf32>
    %559 = vector.broadcast %558 : vector<1x32xf32> to vector<16x32xf32>
    %560 = arith.addf %557, %559 : vector<16x32xf32>
    %561 = arith.negf %560 : vector<16x32xf32>
    %562 = math.exp %561 : vector<16x32xf32>
    %cst_104 = arith.constant 1.000000e+00 : f32
    %563 = vector.broadcast %cst_104 : f32 to vector<16x32xf32>
    %564 = arith.addf %563, %562 : vector<16x32xf32>
    %565 = arith.divf %563, %564 : vector<16x32xf32>
    %566 = vector.extract_strided_slice %547 {offsets = [0, 64], sizes = [16, 32], strides = [1, 1]} : vector<16x96xf32> to vector<16x32xf32>
    %567 = vector.extract_strided_slice %540 {offsets = [0, 64], sizes = [1, 32], strides = [1, 1]} : vector<1x96xf32> to vector<1x32xf32>
    %568 = vector.broadcast %567 : vector<1x32xf32> to vector<16x32xf32>
    %569 = arith.mulf %556, %568 : vector<16x32xf32>
    %570 = arith.addf %566, %569 : vector<16x32xf32>
    %571 = math.tanh %570 : vector<16x32xf32>
    %cst_105 = arith.constant 1.000000e+00 : f32
    %572 = vector.broadcast %cst_105 : f32 to vector<16x32xf32>
    %573 = arith.subf %572, %565 : vector<16x32xf32>
    %574 = arith.mulf %573, %571 : vector<16x32xf32>
    %575 = arith.mulf %565, %544 : vector<16x32xf32>
    %576 = arith.addf %574, %575 : vector<16x32xf32>
    %cst_106 = arith.constant dense<0.000000e+00> : vector<16x96xf32>
    %577 = tpu.matmul %576, %538, %cst_106 {dimension_numbers = #tpu.dot_dimension_numbers<[1], [0], [0], [1], [0, 0, 1, 1], [], []>} : vector<16x32xf32>, vector<32x96xf32>, vector<16x96xf32> -> vector<16x96xf32>
    %578 = vector.broadcast %541 : vector<1x96xf32> to vector<16x96xf32>
    %579 = arith.addf %577, %578 : vector<16x96xf32>
    %580 = vector.extract_strided_slice %579 {offsets = [0, 0], sizes = [16, 32], strides = [1, 1]} : vector<16x96xf32> to vector<16x32xf32>
    %581 = vector.extract_strided_slice %542 {offsets = [0, 0], sizes = [1, 32], strides = [1, 1]} : vector<1x96xf32> to vector<1x32xf32>
    %582 = vector.broadcast %581 : vector<1x32xf32> to vector<16x32xf32>
    %583 = arith.addf %580, %582 : vector<16x32xf32>
    %584 = arith.negf %583 : vector<16x32xf32>
    %585 = math.exp %584 : vector<16x32xf32>
    %cst_107 = arith.constant 1.000000e+00 : f32
    %586 = vector.broadcast %cst_107 : f32 to vector<16x32xf32>
    %587 = arith.addf %586, %585 : vector<16x32xf32>
    %588 = arith.divf %586, %587 : vector<16x32xf32>
    %589 = vector.extract_strided_slice %579 {offsets = [0, 32], sizes = [16, 32], strides = [1, 1]} : vector<16x96xf32> to vector<16x32xf32>
    %590 = vector.extract_strided_slice %542 {offsets = [0, 32], sizes = [1, 32], strides = [1, 1]} : vector<1x96xf32> to vector<1x32xf32>
    %591 = vector.broadcast %590 : vector<1x32xf32> to vector<16x32xf32>
    %592 = arith.addf %589, %591 : vector<16x32xf32>
    %593 = arith.negf %592 : vector<16x32xf32>
    %594 = math.exp %593 : vector<16x32xf32>
    %cst_108 = arith.constant 1.000000e+00 : f32
    %595 = vector.broadcast %cst_108 : f32 to vector<16x32xf32>
    %596 = arith.addf %595, %594 : vector<16x32xf32>
    %597 = arith.divf %595, %596 : vector<16x32xf32>
    %598 = vector.extract_strided_slice %579 {offsets = [0, 64], sizes = [16, 32], strides = [1, 1]} : vector<16x96xf32> to vector<16x32xf32>
    %599 = vector.extract_strided_slice %542 {offsets = [0, 64], sizes = [1, 32], strides = [1, 1]} : vector<1x96xf32> to vector<1x32xf32>
    %600 = vector.broadcast %599 : vector<1x32xf32> to vector<16x32xf32>
    %601 = arith.mulf %588, %600 : vector<16x32xf32>
    %602 = arith.addf %598, %601 : vector<16x32xf32>
    %603 = math.tanh %602 : vector<16x32xf32>
    %cst_109 = arith.constant 1.000000e+00 : f32
    %604 = vector.broadcast %cst_109 : f32 to vector<16x32xf32>
    %605 = arith.subf %604, %597 : vector<16x32xf32>
    %606 = arith.mulf %605, %603 : vector<16x32xf32>
    %607 = arith.mulf %597, %544 : vector<16x32xf32>
    %608 = arith.addf %606, %607 : vector<16x32xf32>
    %c0_110 = arith.constant 0 : index
    %c0_111 = arith.constant 0 : index
    %609 = vector.load %arg5[%c0_110, %c0_111] : memref<72x8xf32, #tpu.memory_space<vmem>>, vector<72x8xf32>
    %610 = vector.extract_strided_slice %609 {offsets = [0, 0], sizes = [32, 8], strides = [1, 1]} : vector<72x8xf32> to vector<32x8xf32>
    %611 = vector.extract_strided_slice %609 {offsets = [32, 0], sizes = [32, 8], strides = [1, 1]} : vector<72x8xf32> to vector<32x8xf32>
    %612 = vector.extract_strided_slice %609 {offsets = [64, 0], sizes = [1, 8], strides = [1, 1]} : vector<72x8xf32> to vector<1x8xf32>
    %613 = vector.extract_strided_slice %609 {offsets = [65, 0], sizes = [1, 8], strides = [1, 1]} : vector<72x8xf32> to vector<1x8xf32>
    %614 = vector.extract_strided_slice %609 {offsets = [66, 0], sizes = [1, 8], strides = [1, 1]} : vector<72x8xf32> to vector<1x8xf32>
    %cst_112 = arith.constant dense<0.000000e+00> : vector<16x8xf32>
    %615 = tpu.matmul %492, %610, %cst_112 {dimension_numbers = #tpu.dot_dimension_numbers<[1], [0], [0], [1], [0, 0, 1, 1], [], []>} : vector<16x32xf32>, vector<32x8xf32>, vector<16x8xf32> -> vector<16x8xf32>
    %cst_113 = arith.constant dense<0.000000e+00> : vector<16x8xf32>
    %616 = tpu.matmul %608, %611, %cst_113 {dimension_numbers = #tpu.dot_dimension_numbers<[1], [0], [0], [1], [0, 0, 1, 1], [], []>} : vector<16x32xf32>, vector<32x8xf32>, vector<16x8xf32> -> vector<16x8xf32>
    %617 = arith.addf %615, %616 : vector<16x8xf32>
    %618 = vector.broadcast %612 : vector<1x8xf32> to vector<16x8xf32>
    %619 = arith.addf %617, %618 : vector<16x8xf32>
    %cst_114 = arith.constant dense<0.000000e+00> : vector<8xf32>
    %620 = vector.multi_reduction <add>, %619, %cst_114 [0] : vector<16x8xf32> to vector<8xf32>
    %621 = vector.shape_cast %620 : vector<8xf32> to vector<1x8xf32>
    %cst_115 = arith.constant 1.600000e+01 : f32
    %622 = vector.broadcast %cst_115 : f32 to vector<1x8xf32>
    %623 = arith.divf %621, %622 : vector<1x8xf32>
    %624 = vector.broadcast %623 : vector<1x8xf32> to vector<16x8xf32>
    %625 = arith.subf %619, %624 : vector<16x8xf32>
    %626 = arith.mulf %625, %625 : vector<16x8xf32>
    %cst_116 = arith.constant dense<0.000000e+00> : vector<8xf32>
    %627 = vector.multi_reduction <add>, %626, %cst_116 [0] : vector<16x8xf32> to vector<8xf32>
    %628 = vector.shape_cast %627 : vector<8xf32> to vector<1x8xf32>
    %cst_117 = arith.constant 1.600000e+01 : f32
    %629 = vector.broadcast %cst_117 : f32 to vector<1x8xf32>
    %630 = arith.divf %628, %629 : vector<1x8xf32>
    %631 = vector.broadcast %623 : vector<1x8xf32> to vector<16x8xf32>
    %632 = arith.subf %619, %631 : vector<16x8xf32>
    %cst_118 = arith.constant 9.99999974E-6 : f32
    %633 = vector.broadcast %cst_118 : f32 to vector<1x8xf32>
    %634 = arith.addf %630, %633 : vector<1x8xf32>
    %635 = math.rsqrt %634 : vector<1x8xf32>
    %636 = vector.broadcast %635 : vector<1x8xf32> to vector<16x8xf32>
    %637 = arith.mulf %632, %636 : vector<16x8xf32>
    %638 = vector.broadcast %613 : vector<1x8xf32> to vector<16x8xf32>
    %639 = arith.mulf %637, %638 : vector<16x8xf32>
    %640 = vector.broadcast %614 : vector<1x8xf32> to vector<16x8xf32>
    %641 = arith.addf %639, %640 : vector<16x8xf32>
    %c0_119 = arith.constant 0 : index
    %c0_120 = arith.constant 0 : index
    %642 = vector.load %arg6[%c0_119, %c0_120] : memref<16x8xf32, #tpu.memory_space<vmem>>, vector<16x8xf32>
    tpu.vector_store %arg6[%c0_119, %c0_120], %641 {strides = array<i32>} : memref<16x8xf32, #tpu.memory_space<vmem>>, vector<16x8xf32>,
    return
  }
}

</mosaic_0001>

<bundles_post_ra>
// kernel: deep_risk_forward.1
= control target key start
LH: loop header
LB: loop body
LE: loop exit
PB: predicated region body
PF: predicated region fallthrough
CT: control target
= control target key end

     0   :  { %vm69_vm0 = vcmask 64512   ;;  %v4918_v3 = vmov 0.0   ;;  %v37_v10 = vlaneseq  ;;  %s4919_s13 = smov 64   ;;  %s4920_s22 = smov 96   ;;  %vm263_vm1 = vcmask 261120   ;;  %s5802_s2 = inlined_call_operand.vmem [shape: f32[144,96], index: 2, kind: input, shape index: {}]   ;;  %s5803_s0 = inlined_call_operand.vmem [shape: f32[128,8], index: 0, kind: input, shape index: {}]   ;;  %s5804_s3 = inlined_call_operand.vmem [shape: f32[8,96], index: 3, kind: input, shape index: {}]   ;;  %s5805_s4 = inlined_call_operand.vmem [shape: f32[16,8], index: 4, kind: input, shape index: {}]   ;;  %s5806_s1 = inlined_call_operand.vmem [shape: f32[16,16], index: 1, kind: input, shape index: {}]   ;;  %s5807_s5 = inlined_call_operand.vmem [shape: f32[72,8], index: 5, kind: input, shape index: {}]   ;;  %s5808_s6 = inlined_call_operand.vmem [shape: f32[16,8], index: 6, kind: output, shape index: {}]  }
   0x1   :  { %v24_v0 = vld [vmem:[%s5802_s2 + $0x8] sm:$0xff]  ;;  %v25_v1 = vld [vmem:[%s5802_s2 + $0x10] sm:$0xff]  ;;  %v26_v2 = vld [vmem:[%s5802_s2 + $0x18] sm:$0xff]  ;;  %4158 = vmatprep.mubr.f32.mxu1 %v4918_v3  ;;  %vm3200_vm5 = vcmask 130048  }
   0x2   :  { %v4966_v4 = vpack.c.bf16 %v25_v1, %v24_v0  ;;  %v27_v5 = vld [vmem:[%s5802_s2 + $0x20] sm:$0xff]  ;;  %v50_v9 = vld [vmem:[%s5803_s0 + $0x8] sm:$0xff]  ;;  %v4989_v11 = vshrl.u32 %v37_v10, 7  ;;  %v29_v44 = vld [vmem:[%s5802_s2 + $0x30] sm:$0xff] }
   0x3   :  { %v23_v6 = vld [vmem:[%s5802_s2] sm:$0xff]  ;;  %v4977_v8 = vpack.c.bf16 %v27_v5, %v26_v2  ;;  %v28_v43 = vld [vmem:[%s5802_s2 + $0x28] sm:$0xff]  ;;  %v30_v45 = vld [vmem:[%s5802_s2 + $0x38] sm:$0xff] }
   0x4   :  { %v49_v7 = vld [vmem:[%s5803_s0] sm:$0xff]  ;;  %4124 = vmatprep.subr.mxu0 %v23_v6  ;;  %4465 = vmatprep.subr.bf16.mxu1 %v4966_v4  ;;  %v4992_v13 = vsub.s32 1, %v4989_v11  ;;  %v5008_v21 = vsub.s32 0, %v4989_v11  ;;  %v5027_v46 = vpack.c.bf16 %v29_v44, %v28_v43  ;;  %v32_v51 = vld [vmem:[%s5802_s2 + $0x48] sm:$0xff]  ;;  %v33_v52 = vld [vmem:[%s5802_s2 + $0x50] sm:$0xff] }
   0x5   :  { %4126 = vmatprep.mubr.msk.f32.mxu0 %vm69_vm0, %v49_v7  ;;  %4125 = vmatpush3.msra.mxu0 %v23_v6  ;;  %v4997_v15 = vld [vmem:[%s5804_s3] sm:$0xff]  ;;  %v5051_v53 = vpack.c.bf16 %v33_v52, %v32_v51  ;;  %v51_v0 = vld [vmem:[%s5803_s0 + $0x10] sm:$0xff]  ;;  %v52_v1 = vld [vmem:[%s5803_s0 + $0x18] sm:$0xff] }
   0x6   :  { %4467 = vmatpush3.bf16.msra.mxu1 %v4966_v4  ;;  %4127 = vmatmul.mubr.msk.f32.vlgmr.msra.gmra.mrb[0].mxu0 %vm69_vm0, %v50_v9  ;;  %v5001_v16 = vrot.slane %v4997_v15, %v4992_v13  ;;  %v5012_v22 = vrot.slane %v4997_v15, %v5008_v21  ;;  %v31_v47 = vld [vmem:[%s5802_s2 + $0x40] sm:$0xff]  ;;  %v34_v5 = vld [vmem:[%s5802_s2 + $0x58] sm:$0xff] }
   0x7   :  { %4469 = vmatprep.subr.bf16.mxu1 %v4977_v8  ;;  %v5032_v48 = vpack.c.bf16 %v31_v47, %v30_v45  ;;  %4497 = vmatprep.subr.bf16.mxu0 %v5027_v46  ;;  %v35_v6 = vld [vmem:[%s5802_s2 + $0x60] sm:$0xff]  ;;  %v54_v47 = vld [vmem:[%s5803_s0 + $0x28] sm:$0xff]  ;;  %v56_v51 = vld [vmem:[%s5803_s0 + $0x38] sm:$0xff] }
   0x8   :  { %4499 = vmatpush3.bf16.msra.mxu0 %v5027_v46  ;;  %4129 = vmatprep.mubr.msk.f32.mxu0 %vm69_vm0, %v51_v0  ;;  %v5077_v7 = vpack.c.bf16 %v35_v6, %v34_v5  ;;  %v53_v45 = vld [vmem:[%s5803_s0 + $0x20] sm:$0xff]  ;;  %v47_v0 = vsub.s32 3, %v4989_v11 }
   0x9   :  { %4501 = vmatprep.subr.bf16.mxu0 %v5032_v48 }
   0xa   :  { %4471 = vmatpush3.bf16.msra.mxu1 %v4977_v8  ;;  %4130 = vmatmul.mubr.msk.f32.gmra.mrb[2].mxu0 %vm69_vm0, %v52_v1 }
   0xb   :  { %4473 = vmatprep.subr.bf16.mxu1 %v5027_v46  ;;  %4132 = vmatprep.mubr.msk.f32.mxu0 %vm69_vm0, %v53_v45 }
   0xc   :  { %4503 = vmatpush3.bf16.msra.mxu0 %v5032_v48 }
   0xd   :  { %4159 = vmatmul.mubr.f32.vlgmr.msra.gmra.mrb[0].mxu1 %v4918_v3  ;;  %4513 = vmatprep.subr.bf16.mxu0 %v4966_v4 }
   0xe   :  { %4475 = vmatpush3.bf16.msra.mxu1 %v5027_v46  ;;  %4133 = vmatmul.mubr.msk.f32.gmra.mrb[4].mxu0 %vm69_vm0, %v54_v47 }
   0xf   :  { %4477 = vmatprep.subr.bf16.mxu1 %v5032_v48 }
  0x12   :  { %4479 = vmatpush3.bf16.msra.mxu1 %v5032_v48 }
  0x13   :  { %4481 = vmatprep.subr.bf16.mxu1 %v5051_v53 }
  0xd9   :  { %v4128_v12 = vpop.f32.mrb[0].mxu0 }
  0xda   :  { %v184_v14 = vpop.f32.mrb[1].mxu0  ;;  %v190_v24 = vadd.f32 %v4128_v12, %v5012_v22 }
  0xdb   :  { %v185_v23 = vadd.f32 %v184_v14, %v5012_v22 }
  0xe0   :  { %v4160_v17 = vpop.f32.mrb[0].mxu1 }
  0xe1   :  { %v333_v18 = vpop.f32.mrb[1].mxu1  ;;  %v339_v20 = vadd.f32 %v4160_v17, %v5001_v16 }
  0xe2   :  { %v334_v19 = vadd.f32 %v333_v18, %v5001_v16 }
  0xe3   :  { %v343_v26 = vadd.f32 %v339_v20, %v190_v24 }
  0xe4   :  { %358 = vrot.lane.b32.xlu0 %v334_v19, %s4919_s13  ;;  %v342_v25 = vadd.f32 %v334_v19, %v185_v23 }
  0xe5   :  { %v3844_v28 = vmul.f32 -1.442695, %v343_v26 }
  0xe6   :  { %v3843_v27 = vmul.f32 -1.442695, %v342_v25 }
  0xe8   :  { %360 = vrot.lane.b32.xlu0 %v339_v20, %s4919_s13  ;;  %4689 = vpow2.f32 %v3843_v27 }
  0xe9   :  { %4691 = vpow2.f32 %v3844_v28 }
  0xf2   :  { %v4690_v29 = vpop.eup %4689 }
  0xf3   :  { %v350_v30 = vadd.f32 1.0, %v4690_v29  ;;  %v4692_v31 = vpop.eup %4691 }
  0xf4   :  { %v351_v32 = vadd.f32 1.0, %v4692_v31 }
  0xf5   :  { %4693 = vrcp.f32 %v350_v30 }
  0xf6   :  { %4695 = vrcp.f32 %v351_v32 }
  0xff   :  { %v4694_v33 = vpop.eup %4693 }
 0x100   :  { %v4696_v36 = vpop.eup %4695  ;;  %v378_v54 = vsub.f32 1.0, %v4694_v33  ;;  %v390_v56 = vmul.f32 0.0, %v4694_v33 }
 0x101   :  { %v379_v59 = vsub.f32 1.0, %v4696_v36  ;;  %v391_v61 = vmul.f32 0.0, %v4696_v36 }
 0x156   :  { %v359_v34 = vpop.permute.xlu0 %358 }
 0x157   :  { %v364_v35 = vmul.f32 %v4694_v33, %v359_v34 }
 0x159   :  { %368 = vrot.lane.b32.xlu1 %v364_v35, %s4919_s13 }
 0x15a   :  { %v361_v37 = vpop.permute.xlu0 %360 }
 0x15b   :  { %v365_v38 = vmul.f32 %v4696_v36, %v361_v37 }
 0x15d   :  { %370 = vrot.lane.b32.xlu1 %v365_v38, %s4919_s13 }
 0x1cb   :  { %v369_v39 = vpop.permute.xlu1 %368 }
 0x1cc   :  { %v374_v40 = vadd.f32 %v369_v39, %v185_v23 }
 0x1ce   :  { %4697 = vtanh.f32 %v374_v40 }
 0x1cf   :  { %v371_v41 = vpop.permute.xlu1 %370 }
 0x1d0   :  { %v375_v42 = vadd.f32 %v371_v41, %v190_v24 }
 0x1d2   :  { %4699 = vtanh.f32 %v375_v42 }
 0x1d8   :  { %v4698_v49 = vpop.eup %4697 }
 0x1d9   :  { %382 = vrot.lane.b32.xlu0 %v4698_v49, %s4920_s22  ;;  %v55_v49 = vld [vmem:[%s5803_s0 + $0x30] sm:$0xff] }
 0x1da   :  { %4135 = vmatprep.mubr.msk.f32.mxu0 %vm69_vm0, %v55_v49 }
 0x1db   :  { %4136 = vmatmul.mubr.msk.f32.gmra.mrb[6].mxu0 %vm69_vm0, %v56_v51 }
 0x1dc   :  { %v4700_v50 = vpop.eup %4699 }
 0x1dd   :  { %384 = vrot.lane.b32.xlu1 %v4700_v50, %s4920_s22 }
 0x24b   :  { %v383_v55 = vpop.permute.xlu0 %382 }
 0x24c   :  { %v388_v57 = vmul.f32 %v383_v55, %v378_v54  ;;  %v57_v54 = vld [vmem:[%s5803_s0 + $0x40] sm:$0xff]  ;;  %v58_v55 = vld [vmem:[%s5803_s0 + $0x48] sm:$0xff] }
 0x24d   :  { %4138 = vmatprep.mubr.msk.f32.mxu0 %vm69_vm0, %v57_v54 }
 0x24e   :  { %v5054_v58 = vadd.f32 %v390_v56, %v388_v57  ;;  %v59_v56 = vld [vmem:[%s5803_s0 + $0x50] sm:$0xff]  ;;  %4139 = vmatmul.mubr.msk.f32.gmra.mrb[8].mxu0 %vm69_vm0, %v58_v55  ;;  %v60_v57 = vld [vmem:[%s5803_s0 + $0x58] sm:$0xff] }
 0x24f   :  { %v385_v60 = vpop.permute.xlu1 %384  ;;  %4141 = vmatprep.mubr.msk.f32.mxu0 %vm69_vm0, %v59_v56 }
 0x250   :  { %v389_v62 = vmul.f32 %v385_v60, %v379_v59  ;;  %396 = vrot.lane.b32.xlu0 %v5054_v58, %s4920_s22  ;;  %v61_v59 = vld [vmem:[%s5803_s0 + $0x60] sm:$0xff]  ;;  %v62_v60 = vld [vmem:[%s5803_s0 + $0x68] sm:$0xff] }
 0x252   :  { %v5058_v63 = vadd.f32 %v391_v61, %v389_v62  ;;  %4142 = vmatmul.mubr.msk.f32.gmra.mrb[10].mxu0 %vm69_vm0, %v60_v57  ;;  %v63_v61 = vld [vmem:[%s5803_s0 + $0x70] sm:$0xff]  ;;  %v64_v62 = vld [vmem:[%s5803_s0 + $0x78] sm:$0xff] }
 0x253   :  { %4144 = vmatprep.mubr.msk.f32.mxu0 %vm69_vm0, %v61_v59 }
 0x254   :  { %398 = vrot.lane.b32.xlu1 %v5058_v63, %s4920_s22 }
 0x256   :  { %4145 = vmatmul.mubr.msk.f32.gmra.mrb[12].mxu0 %vm69_vm0, %v62_v60 }
 0x257   :  { %4147 = vmatprep.mubr.msk.f32.mxu0 %vm69_vm0, %v63_v61 }
 0x25a   :  { %4148 = vmatmul.mubr.msk.f32.gmra.mrb[14].mxu0 %vm69_vm0, %v64_v62 }
 0x2c2   :  { %v397_v2 = vpop.permute.xlu0 %396 }
 0x2c3   :  { %4169 = vmatprep.mubr.msk.f32.mxu1 %vm263_vm1, %v397_v2 }
 0x2c6   :  { %v399_v9 = vpop.permute.xlu1 %398 }
 0x2c7   :  { %4170 = vmatmul.mubr.msk.f32.vlgmr.msra.gmra.mrb[2].mxu1 %vm263_vm1, %v399_v9 }
 0x2c8   :  { %4483 = vmatpush3.bf16.msra.mxu1 %v5051_v53  ;;  %4180 = vmatprep.mubr.f32.mxu1 %v4918_v3 }
 0x2c9   :  { %4485 = vmatprep.subr.bf16.mxu1 %v5077_v7 }
 0x2cc   :  { %4487 = vmatpush3.bf16.msra.mxu1 %v5077_v7 }
 0x2cd   :  { %4489 = vmatprep.subr.bf16.mxu1 %v4966_v4 }
 0x2cf   :  { %4181 = vmatmul.mubr.f32.vlgmr.msra.gmra.mrb[4].mxu1 %v4918_v3  ;;  %v4131_v3 = vpop.f32.mrb[2].mxu0 }
 0x2d0   :  { %4491 = vmatpush3.bf16.msra.mxu1 %v4966_v4  ;;  %4191 = vmatprep.mubr.msk.f32.mxu1 %vm263_vm1, %v397_v2  ;;  %v194_v10 = vpop.f32.mrb[3].mxu0  ;;  %v200_v25 = vadd.f32 %v4131_v3, %v5012_v22 }
 0x2d1   :  { %4493 = vmatprep.subr.bf16.mxu1 %v4977_v8  ;;  %v195_v26 = vadd.f32 %v194_v10, %v5012_v22 }
 0x2d4   :  { %4495 = vmatpush3.bf16.msra.mxu1 %v4977_v8 }
 0x2d5   :  { %4505 = vmatprep.subr.bf16.mxu1 %v5051_v53 }
 0x2d7   :  { %4192 = vmatmul.mubr.msk.f32.vlgmr.msra.gmra.mrb[6].mxu1 %vm263_vm1, %v399_v9 }
 0x2d8   :  { %4507 = vmatpush3.bf16.msra.mxu1 %v5051_v53 }
 0x2d9   :  { %4509 = vmatprep.subr.bf16.mxu1 %v5077_v7 }
 0x2dc   :  { %4511 = vmatpush3.bf16.msra.mxu1 %v5077_v7 }
 0x2dd   :  { %4521 = vmatprep.subr.bf16.mxu1 %v5027_v46 }
 0x39a   :  { %v5096_v12 = vpop.f32.mrb[2].mxu1 }
 0x39b   :  { %v5098_v14 = vpop.f32.mrb[3].mxu1 }
 0x3a2   :  { %v5100_v17 = vpop.f32.mrb[4].mxu1 }
 0x3a3   :  { %v5102_v18 = vpop.f32.mrb[5].mxu1 }
 0x3aa   :  { %v4193_v19 = vpop.f32.mrb[6].mxu1 }
 0x3ab   :  { %v678_v20 = vadd.f32 %v4193_v19, %v5001_v16  ;;  %v672_v23 = vpop.f32.mrb[7].mxu1 }
 0x3ac   :  { %v673_v24 = vadd.f32 %v672_v23, %v5001_v16 }
 0x3ad   :  { %699 = vrot.lane.b32.xlu1 %v678_v20, %s4919_s13  ;;  %v682_v27 = vadd.f32 %v678_v20, %v200_v25  ;;  %v5166_v20 = vrot.slane %v4997_v15, %v47_v0 }
 0x3ae   :  { %697 = vrot.lane.b32.xlu0 %v673_v24, %s4919_s13  ;;  %v681_v28 = vadd.f32 %v673_v24, %v195_v26 }
 0x3af   :  { %v3852_v29 = vmul.f32 -1.442695, %v682_v27 }
 0x3b0   :  { %v3851_v30 = vmul.f32 -1.442695, %v681_v28 }
 0x3b1   :  { %4701 = vpow2.f32 %v3852_v29 }
 0x3b2   :  { %4703 = vpow2.f32 %v3851_v30 }
 0x3bb   :  { %v4702_v31 = vpop.eup %4701 }
 0x3bc   :  { %v4704_v32 = vpop.eup %4703  ;;  %v690_v33 = vadd.f32 1.0, %v4702_v31 }
 0x3bd   :  { %v689_v34 = vadd.f32 1.0, %v4704_v32 }
 0x3be   :  { %4705 = vrcp.f32 %v690_v33 }
 0x3bf   :  { %4707 = vrcp.f32 %v689_v34 }
 0x3c8   :  { %v4706_v35 = vpop.eup %4705 }
 0x3c9   :  { %v4708_v37 = vpop.eup %4707  ;;  %v718_v1 = vsub.f32 1.0, %v4706_v35  ;;  %v730_v6 = vmul.f32 %v4706_v35, %v5058_v63  ;;  %v551_v63 = vadd.f32 %v5100_v17, %v5166_v20 }
 0x3ca   :  { %v717_v5 = vsub.f32 1.0, %v4708_v37  ;;  %v729_v10 = vmul.f32 %v4708_v37, %v5054_v58  ;;  %v546_v58 = vadd.f32 %v5102_v18, %v5166_v20 }
 0x41f   :  { %v700_v36 = vpop.permute.xlu1 %699 }
 0x420   :  { %v704_v38 = vmul.f32 %v4706_v35, %v700_v36  ;;  %v698_v39 = vpop.permute.xlu0 %697 }
 0x421   :  { %v703_v40 = vmul.f32 %v4708_v37, %v698_v39  ;;  %v5215_v37 = vsub.s32 2, %v4989_v11 }
 0x422   :  { %709 = vrot.lane.b32.xlu1 %v704_v38, %s4919_s13 }
 0x423   :  { %707 = vrot.lane.b32.xlu0 %v703_v40, %s4919_s13  ;;  %v5219_v38 = vrot.slane %v4997_v15, %v5215_v37 }
 0x425   :  { %v476_v39 = vadd.f32 %v5096_v12, %v5219_v38  ;;  %v471_v40 = vadd.f32 %v5098_v14, %v5219_v38 }
 0x494   :  { %v710_v41 = vpop.permute.xlu1 %709 }
 0x495   :  { %v714_v42 = vadd.f32 %v710_v41, %v200_v25  ;;  %v708_v43 = vpop.permute.xlu0 %707  ;;  %v4134_v25 = vpop.f32.mrb[4].mxu0  ;;  %v555_v41 = vadd.f32 %v551_v63, %v476_v39 }
 0x496   :  { %v713_v44 = vadd.f32 %v708_v43, %v195_v26  ;;  %v204_v26 = vpop.f32.mrb[5].mxu0  ;;  %v210_v62 = vadd.f32 %v4134_v25, %v5012_v22 }
 0x497   :  { %4709 = vtanh.f32 %v714_v42  ;;  %v5182_v27 = vpop.f32.mrb[6].mxu0  ;;  %v554_v42 = vadd.f32 %v546_v58, %v471_v40  ;;  %v3848_v43 = vmul.f32 -1.442695, %v555_v41  ;;  %v205_v0 = vadd.f32 %v204_v26, %v5012_v22 }
 0x498   :  { %4711 = vtanh.f32 %v713_v44  ;;  %v5184_v28 = vpop.f32.mrb[7].mxu0 }
 0x499   :  { %v5186_v29 = vpop.f32.mrb[8].mxu0  ;;  %v3847_v44 = vmul.f32 -1.442695, %v554_v42  ;;  %4713 = vpow2.f32 %v3848_v43 }
 0x49a   :  { %v5188_v30 = vpop.f32.mrb[9].mxu0 }
 0x49b   :  { %v5190_v31 = vpop.f32.mrb[10].mxu0  ;;  %4715 = vpow2.f32 %v3847_v44 }
 0x49c   :  { %v5192_v17 = vpop.f32.mrb[11].mxu0 }
 0x49d   :  { %v5194_v32 = vpop.f32.mrb[12].mxu0 }
 0x49e   :  { %v5196_v18 = vpop.f32.mrb[13].mxu0 }
 0x49f   :  { %v5198_v33 = vpop.f32.mrb[14].mxu0 }
 0x4a0   :  { %v5200_v34 = vpop.f32.mrb[15].mxu0 }
 0x4a1   :  { %v4710_v50 = vpop.eup %4709 }
 0x4a2   :  { %v4712_v52 = vpop.eup %4711  ;;  %723 = vrot.lane.b32.xlu1 %v4710_v50, %s4920_s22 }
 0x4a3   :  { %721 = vrot.lane.b32.xlu0 %v4712_v52, %s4920_s22  ;;  %v4714_v45 = vpop.eup %4713 }
 0x4a4   :  { %v563_v49 = vadd.f32 1.0, %v4714_v45 }
 0x4a5   :  { %v4716_v47 = vpop.eup %4715 }
 0x4a6   :  { %v562_v50 = vadd.f32 1.0, %v4716_v47  ;;  %4717 = vrcp.f32 %v563_v49 }
 0x4a8   :  { %4719 = vrcp.f32 %v562_v50 }
 0x4b0   :  { %v4718_v57 = vpop.eup %4717 }
 0x4b2   :  { %v4720_v59 = vpop.eup %4719 }
 0x514   :  { %v724_v2 = vpop.permute.xlu1 %723 }
 0x515   :  { %v728_v9 = vmul.f32 %v724_v2, %v718_v1  ;;  %v722_v3 = vpop.permute.xlu0 %721 }
 0x516   :  { %v727_v19 = vmul.f32 %v722_v3, %v717_v5 }
 0x517   :  { %v5168_v23 = vadd.f32 %v730_v6, %v728_v9 }
 0x518   :  { %v5170_v24 = vadd.f32 %v729_v10, %v727_v19 }
 0x519   :  { %737 = vrot.lane.b32.xlu1 %v5168_v23, %s4920_s22 }
 0x51a   :  { %735 = vrot.lane.b32.xlu0 %v5170_v24, %s4920_s22 }
 0x51d   :  { %572 = vrot.lane.b32.xlu1 %v551_v63, %s4919_s13 }
 0x51e   :  { %570 = vrot.lane.b32.xlu0 %v546_v58, %s4919_s13 }
 0x58b   :  { %v738_v36 = vpop.permute.xlu1 %737 }
 0x58c   :  { %v736_v35 = vpop.permute.xlu0 %735 }
 0x58d   :  { %4202 = vmatprep.mubr.msk.f32.mxu0 %vm263_vm1, %v736_v35 }
 0x58e   :  { %4203 = vmatmul.mubr.msk.f32.vlgmr.msra.gmra.mrb[16].mxu0 %vm263_vm1, %v738_v36 }
 0x58f   :  { %4515 = vmatpush3.bf16.msra.mxu0 %v4966_v4  ;;  %4224 = vmatprep.mubr.msk.f32.mxu0 %vm263_vm1, %v736_v35  ;;  %v573_v54 = vpop.permute.xlu1 %572 }
 0x590   :  { %4517 = vmatprep.subr.bf16.mxu0 %v4977_v8  ;;  %v571_v56 = vpop.permute.xlu0 %570  ;;  %v577_v60 = vmul.f32 %v4718_v57, %v573_v54 }
 0x591   :  { %v576_v61 = vmul.f32 %v4720_v59, %v571_v56  ;;  %v603_v56 = vmul.f32 0.0, %v4718_v57 }
 0x593   :  { %4519 = vmatpush3.bf16.msra.mxu0 %v4977_v8 }
 0x594   :  { %4529 = vmatprep.subr.bf16.mxu0 %v5051_v53 }
 0x596   :  { %4225 = vmatmul.mubr.msk.f32.vlgmr.msra.gmra.mrb[18].mxu0 %vm263_vm1, %v738_v36 }
 0x597   :  { %4531 = vmatpush3.bf16.msra.mxu0 %v5051_v53 }
 0x598   :  { %4533 = vmatprep.subr.bf16.mxu0 %v5077_v7 }
 0x59b   :  { %4535 = vmatpush3.bf16.msra.mxu0 %v5077_v7 }
 0x59c   :  { %4545 = vmatprep.subr.bf16.mxu0 %v5027_v46 }
 0x661   :  { %v5225_v51 = vpop.f32.mrb[16].mxu0 }
 0x662   :  { %v5227_v15 = vpop.f32.mrb[17].mxu0 }
 0x669   :  { %v4226_v12 = vpop.f32.mrb[18].mxu0 }
 0x66a   :  { %v1027_v52 = vadd.f32 %v4226_v12, %v5001_v16  ;;  %v1021_v14 = vpop.f32.mrb[19].mxu0 }
 0x66b   :  { %v1022_v55 = vadd.f32 %v1021_v14, %v5001_v16 }
 0x66c   :  { %1048 = vrot.lane.b32.xlu1 %v1027_v52, %s4919_s13  ;;  %v1031_v1 = vadd.f32 %v1027_v52, %v210_v62 }
 0x66d   :  { %1046 = vrot.lane.b32.xlu0 %v1022_v55, %s4919_s13  ;;  %v1030_v2 = vadd.f32 %v1022_v55, %v205_v0  ;;  %v590_v55 = vsub.f32 1.0, %v4720_v59 }
 0x66e   :  { %v3862_v5 = vmul.f32 -1.442695, %v1031_v1  ;;  %v602_v1 = vmul.f32 0.0, %v4720_v59 }
 0x66f   :  { %v3861_v6 = vmul.f32 -1.442695, %v1030_v2 }
 0x670   :  { %582 = vrot.lane.b32.xlu1 %v577_v60, %s4919_s13  ;;  %4721 = vpow2.f32 %v3862_v5 }
 0x671   :  { %580 = vrot.lane.b32.xlu0 %v576_v61, %s4919_s13  ;;  %4723 = vpow2.f32 %v3861_v6 }
 0x67a   :  { %v4722_v9 = vpop.eup %4721 }
 0x67b   :  { %v4724_v3 = vpop.eup %4723  ;;  %v1039_v10 = vadd.f32 1.0, %v4722_v9 }
 0x67c   :  { %v1038_v19 = vadd.f32 1.0, %v4724_v3 }
 0x67d   :  { %4725 = vrcp.f32 %v1039_v10 }
 0x67e   :  { %4727 = vrcp.f32 %v1038_v19 }
 0x687   :  { %v4726_v63 = vpop.eup %4725 }
 0x688   :  { %v4728_v35 = vpop.eup %4727  ;;  %v1079_v3 = vmul.f32 %v4726_v63, %v5168_v23 }
 0x689   :  { %v1066_v9 = vsub.f32 1.0, %v4728_v35  ;;  %v1078_v59 = vmul.f32 %v4728_v35, %v5170_v24 }
 0x6de   :  { %v1049_v58 = vpop.permute.xlu1 %1048 }
 0x6df   :  { %v1053_v36 = vmul.f32 %v4726_v63, %v1049_v58  ;;  %v1047_v41 = vpop.permute.xlu0 %1046 }
 0x6e0   :  { %v1052_v25 = vmul.f32 %v4728_v35, %v1047_v41 }
 0x6e1   :  { %1058 = vrot.lane.b32.xlu1 %v1053_v36, %s4919_s13 }
 0x6e2   :  { %v583_v26 = vpop.permute.xlu1 %582  ;;  %1056 = vrot.lane.b32.xlu0 %v1052_v25, %s4919_s13 }
 0x6e3   :  { %v587_v42 = vadd.f32 %v583_v26, %v476_v39  ;;  %v581_v43 = vpop.permute.xlu0 %580  ;;  %v591_v39 = vsub.f32 1.0, %v4718_v57 }
 0x6e4   :  { %v586_v44 = vadd.f32 %v581_v43, %v471_v40  ;;  %v815_v43 = vadd.f32 %v5225_v51, %v5219_v38 }
 0x6e5   :  { %4729 = vtanh.f32 %v587_v42 }
 0x6e6   :  { %4731 = vtanh.f32 %v586_v44  ;;  %v810_v44 = vadd.f32 %v5227_v15, %v5219_v38 }
 0x6ef   :  { %v4730_v45 = vpop.eup %4729 }
 0x6f0   :  { %v4732_v47 = vpop.eup %4731  ;;  %596 = vrot.lane.b32.xlu1 %v4730_v45, %s4920_s22 }
 0x6f1   :  { %594 = vrot.lane.b32.xlu0 %v4732_v47, %s4920_s22 }
 0x753   :  { %v1059_v49 = vpop.permute.xlu1 %1058 }
 0x754   :  { %v1063_v50 = vadd.f32 %v1059_v49, %v210_v62  ;;  %v1057_v12 = vpop.permute.xlu0 %1056 }
 0x755   :  { %v1062_v52 = vadd.f32 %v1057_v12, %v205_v0  ;;  %v1067_v0 = vsub.f32 1.0, %v4726_v63 }
 0x756   :  { %4733 = vtanh.f32 %v1063_v50 }
 0x757   :  { %4735 = vtanh.f32 %v1062_v52 }
 0x760   :  { %v4734_v14 = vpop.eup %4733 }
 0x761   :  { %v4736_v54 = vpop.eup %4735  ;;  %1072 = vrot.lane.b32.xlu1 %v4734_v14, %s4920_s22 }
 0x762   :  { %v597_v40 = vpop.permute.xlu1 %596  ;;  %1070 = vrot.lane.b32.xlu0 %v4736_v54, %s4920_s22 }
 0x763   :  { %v601_v60 = vmul.f32 %v597_v40, %v591_v39  ;;  %v595_v61 = vpop.permute.xlu0 %594 }
 0x764   :  { %v600_v2 = vmul.f32 %v595_v61, %v590_v55 }
 0x765   :  { %v5243_v5 = vadd.f32 %v603_v56, %v601_v60 }
 0x766   :  { %v5245_v62 = vadd.f32 %v602_v1, %v600_v2 }
 0x767   :  { %822 = vrot.lane.b32.xlu1 %v5243_v5, %s4920_s22 }
 0x768   :  { %820 = vrot.lane.b32.xlu0 %v5245_v62, %s4920_s22 }
 0x7d3   :  { %v1073_v6 = vpop.permute.xlu1 %1072 }
 0x7d4   :  { %v1077_v57 = vmul.f32 %v1073_v6, %v1067_v0  ;;  %v1071_v10 = vpop.permute.xlu0 %1070 }
 0x7d5   :  { %v1076_v19 = vmul.f32 %v1071_v10, %v1066_v9  ;;  %v220_v9 = vadd.f32 %v5182_v27, %v5012_v22 }
 0x7d6   :  { %v5253_v58 = vadd.f32 %v1079_v3, %v1077_v57  ;;  %v215_v3 = vadd.f32 %v5184_v28, %v5012_v22 }
 0x7d7   :  { %v5255_v36 = vadd.f32 %v1078_v59, %v1076_v19 }
 0x7d8   :  { %1086 = vrot.lane.b32.xlu1 %v5253_v58, %s4920_s22 }
 0x7d9   :  { %1084 = vrot.lane.b32.xlu0 %v5255_v36, %s4920_s22  ;;  %v823_v25 = vpop.permute.xlu1 %822 }
 0x7da   :  { %v821_v41 = vpop.permute.xlu0 %820 }
 0x7db   :  { %4213 = vmatprep.mubr.msk.f32.mxu1 %vm263_vm1, %v821_v41 }
 0x7dc   :  { %4214 = vmatmul.mubr.msk.f32.vlgmr.msra.gmra.mrb[8].mxu1 %vm263_vm1, %v823_v25 }
 0x7dd   :  { %4523 = vmatpush3.bf16.msra.mxu1 %v5027_v46 }
 0x7de   :  { %4525 = vmatprep.subr.bf16.mxu1 %v5032_v48 }
 0x7e1   :  { %4527 = vmatpush3.bf16.msra.mxu1 %v5032_v48 }
 0x7e2   :  { %4537 = vmatprep.subr.bf16.mxu1 %v4966_v4 }
 0x84a   :  { %v1087_v24 = vpop.permute.xlu1 %1086 }
 0x84b   :  { %v1085_v23 = vpop.permute.xlu0 %1084 }
 0x84c   :  { %4235 = vmatprep.mubr.msk.f32.mxu1 %vm263_vm1, %v1085_v23 }
 0x84d   :  { %4236 = vmatmul.mubr.msk.f32.vlgmr.msra.gmra.mrb[10].mxu1 %vm263_vm1, %v1087_v24 }
 0x84e   :  { %4539 = vmatpush3.bf16.msra.mxu1 %v4966_v4  ;;  %4257 = vmatprep.mubr.msk.f32.mxu1 %vm263_vm1, %v1085_v23 }
 0x84f   :  { %4541 = vmatprep.subr.bf16.mxu1 %v4977_v8 }
 0x852   :  { %4543 = vmatpush3.bf16.msra.mxu1 %v4977_v8 }
 0x853   :  { %4553 = vmatprep.subr.bf16.mxu1 %v5051_v53 }
 0x855   :  { %4258 = vmatmul.mubr.msk.f32.vlgmr.msra.gmra.mrb[12].mxu1 %vm263_vm1, %v1087_v24 }
 0x856   :  { %4555 = vmatpush3.bf16.msra.mxu1 %v5051_v53 }
 0x857   :  { %4557 = vmatprep.subr.bf16.mxu1 %v5077_v7 }
 0x85a   :  { %4559 = vmatpush3.bf16.msra.mxu1 %v5077_v7 }
 0x85b   :  { %4569 = vmatprep.subr.bf16.mxu1 %v5027_v46 }
 0x8af   :  { %v4215_v63 = vpop.f32.mrb[8].mxu1 }
 0x8b0   :  { %v900_v35 = vadd.f32 %v4215_v63, %v5166_v20  ;;  %v894_v26 = vpop.f32.mrb[9].mxu1 }
 0x8b1   :  { %v895_v42 = vadd.f32 %v894_v26, %v5166_v20 }
 0x8b2   :  { %921 = vrot.lane.b32.xlu1 %v900_v35, %s4919_s13  ;;  %v904_v45 = vadd.f32 %v900_v35, %v815_v43 }
 0x8b3   :  { %919 = vrot.lane.b32.xlu0 %v895_v42, %s4919_s13  ;;  %v903_v47 = vadd.f32 %v895_v42, %v810_v44 }
 0x8b4   :  { %v3858_v49 = vmul.f32 -1.442695, %v904_v45 }
 0x8b5   :  { %v3857_v50 = vmul.f32 -1.442695, %v903_v47 }
 0x8b6   :  { %4737 = vpow2.f32 %v3858_v49 }
 0x8b7   :  { %4739 = vpow2.f32 %v3857_v50 }
 0x8c0   :  { %v4738_v12 = vpop.eup %4737 }
 0x8c1   :  { %v4740_v52 = vpop.eup %4739  ;;  %v912_v14 = vadd.f32 1.0, %v4738_v12 }
 0x8c2   :  { %v911_v54 = vadd.f32 1.0, %v4740_v52 }
 0x8c3   :  { %4741 = vrcp.f32 %v912_v14 }
 0x8c4   :  { %4743 = vrcp.f32 %v911_v54 }
 0x8cd   :  { %v4742_v1 = vpop.eup %4741 }
 0x8ce   :  { %v4744_v2 = vpop.eup %4743 }
 0x920   :  { %v5287_v39 = vpop.f32.mrb[10].mxu1 }
 0x921   :  { %v5289_v40 = vpop.f32.mrb[11].mxu1 }
 0x924   :  { %v922_v56 = vpop.permute.xlu1 %921 }
 0x925   :  { %v920_v61 = vpop.permute.xlu0 %919  ;;  %v926_v0 = vmul.f32 %v4742_v1, %v922_v56 }
 0x926   :  { %v925_v6 = vmul.f32 %v4744_v2, %v920_v61  ;;  %v952_v61 = vmul.f32 %v4742_v1, %v5243_v5 }
 0x928   :  { %v4259_v51 = vpop.f32.mrb[12].mxu1 }
 0x929   :  { %v1376_v55 = vadd.f32 %v4259_v51, %v5001_v16  ;;  %v1370_v15 = vpop.f32.mrb[13].mxu1 }
 0x92a   :  { %v1371_v60 = vadd.f32 %v1370_v15, %v5001_v16 }
 0x92b   :  { %1397 = vrot.lane.b32.xlu1 %v1376_v55, %s4919_s13  ;;  %v1380_v57 = vadd.f32 %v1376_v55, %v220_v9 }
 0x92c   :  { %1395 = vrot.lane.b32.xlu0 %v1371_v60, %s4919_s13  ;;  %v1379_v10 = vadd.f32 %v1371_v60, %v215_v3  ;;  %v939_v60 = vsub.f32 1.0, %v4744_v2 }
 0x92d   :  { %v3872_v59 = vmul.f32 -1.442695, %v1380_v57  ;;  %v951_v57 = vmul.f32 %v4744_v2, %v5245_v62 }
 0x92e   :  { %v3871_v19 = vmul.f32 -1.442695, %v1379_v10 }
 0x92f   :  { %931 = vrot.lane.b32.xlu1 %v926_v0, %s4919_s13  ;;  %4745 = vpow2.f32 %v3872_v59 }
 0x930   :  { %929 = vrot.lane.b32.xlu0 %v925_v6, %s4919_s13  ;;  %4747 = vpow2.f32 %v3871_v19 }
 0x939   :  { %v4746_v41 = vpop.eup %4745 }
 0x93a   :  { %v4748_v25 = vpop.eup %4747  ;;  %v1388_v23 = vadd.f32 1.0, %v4746_v41 }
 0x93b   :  { %v1387_v24 = vadd.f32 1.0, %v4748_v25 }
 0x93c   :  { %4749 = vrcp.f32 %v1388_v23 }
 0x93d   :  { %4751 = vrcp.f32 %v1387_v24 }
 0x946   :  { %v4750_v63 = vpop.eup %4749 }
 0x947   :  { %v4752_v26 = vpop.eup %4751  ;;  %v1416_v59 = vsub.f32 1.0, %v4750_v63  ;;  %v1428_v5 = vmul.f32 %v4750_v63, %v5253_v58 }
 0x948   :  { %v1415_v41 = vsub.f32 1.0, %v4752_v26  ;;  %v1427_v62 = vmul.f32 %v4752_v26, %v5255_v36 }
 0x99d   :  { %v1398_v35 = vpop.permute.xlu1 %1397 }
 0x99e   :  { %v1402_v42 = vmul.f32 %v4750_v63, %v1398_v35  ;;  %v1396_v27 = vpop.permute.xlu0 %1395 }
 0x99f   :  { %v1401_v45 = vmul.f32 %v4752_v26, %v1396_v27 }
 0x9a0   :  { %1407 = vrot.lane.b32.xlu1 %v1402_v42, %s4919_s13 }
 0x9a1   :  { %v932_v28 = vpop.permute.xlu1 %931  ;;  %1405 = vrot.lane.b32.xlu0 %v1401_v45, %s4919_s13 }
 0x9a2   :  { %v936_v47 = vadd.f32 %v932_v28, %v815_v43  ;;  %v930_v49 = vpop.permute.xlu0 %929  ;;  %v940_v43 = vsub.f32 1.0, %v4742_v1  ;;  %v1164_v28 = vadd.f32 %v5287_v39, %v5219_v38 }
 0x9a3   :  { %v935_v50 = vadd.f32 %v930_v49, %v810_v44 }
 0x9a4   :  { %4753 = vtanh.f32 %v936_v47  ;;  %v1159_v47 = vadd.f32 %v5289_v40, %v5219_v38 }
 0x9a5   :  { %4755 = vtanh.f32 %v935_v50 }
 0x9ae   :  { %v4754_v12 = vpop.eup %4753 }
 0x9af   :  { %v4756_v52 = vpop.eup %4755  ;;  %945 = vrot.lane.b32.xlu1 %v4754_v12, %s4920_s22 }
 0x9b0   :  { %943 = vrot.lane.b32.xlu0 %v4756_v52, %s4920_s22 }
 0xa12   :  { %v1408_v14 = vpop.permute.xlu1 %1407 }
 0xa13   :  { %v1412_v54 = vadd.f32 %v1408_v14, %v220_v9  ;;  %v1406_v51 = vpop.permute.xlu0 %1405 }
 0xa14   :  { %v1411_v55 = vadd.f32 %v1406_v51, %v215_v3 }
 0xa15   :  { %4757 = vtanh.f32 %v1412_v54 }
 0xa16   :  { %4759 = vtanh.f32 %v1411_v55 }
 0xa1f   :  { %v4758_v15 = vpop.eup %4757 }
 0xa20   :  { %v4760_v56 = vpop.eup %4759  ;;  %1421 = vrot.lane.b32.xlu1 %v4758_v15, %s4920_s22 }
 0xa21   :  { %v946_v44 = vpop.permute.xlu1 %945  ;;  %1419 = vrot.lane.b32.xlu0 %v4760_v56, %s4920_s22 }
 0xa22   :  { %v950_v0 = vmul.f32 %v946_v44, %v940_v43  ;;  %v944_v6 = vpop.permute.xlu0 %943 }
 0xa23   :  { %v949_v9 = vmul.f32 %v944_v6, %v939_v60 }
 0xa24   :  { %v5309_v10 = vadd.f32 %v952_v61, %v950_v0 }
 0xa25   :  { %v5311_v3 = vadd.f32 %v951_v57, %v949_v9 }
 0xa26   :  { %1171 = vrot.lane.b32.xlu1 %v5309_v10, %s4920_s22 }
 0xa27   :  { %1169 = vrot.lane.b32.xlu0 %v5311_v3, %s4920_s22 }
 0xa92   :  { %v1422_v19 = vpop.permute.xlu1 %1421 }
 0xa93   :  { %v1426_v1 = vmul.f32 %v1422_v19, %v1416_v59  ;;  %v1420_v25 = vpop.permute.xlu0 %1419  ;;  %v230_v59 = vadd.f32 %v5186_v29, %v5012_v22  ;;  %v225_v19 = vadd.f32 %v5188_v30, %v5012_v22 }
 0xa94   :  { %v1425_v2 = vmul.f32 %v1420_v25, %v1415_v41 }
 0xa95   :  { %v5319_v23 = vadd.f32 %v1428_v5, %v1426_v1 }
 0xa96   :  { %v5321_v24 = vadd.f32 %v1427_v62, %v1425_v2 }
 0xa97   :  { %1435 = vrot.lane.b32.xlu1 %v5319_v23, %s4920_s22 }
 0xa98   :  { %1433 = vrot.lane.b32.xlu0 %v5321_v24, %s4920_s22  ;;  %v1172_v42 = vpop.permute.xlu1 %1171 }
 0xa99   :  { %v1170_v35 = vpop.permute.xlu0 %1169 }
 0xa9a   :  { %4246 = vmatprep.mubr.msk.f32.mxu0 %vm263_vm1, %v1170_v35 }
 0xa9b   :  { %4247 = vmatmul.mubr.msk.f32.vlgmr.msra.gmra.mrb[20].mxu0 %vm263_vm1, %v1172_v42 }
 0xa9c   :  { %4547 = vmatpush3.bf16.msra.mxu0 %v5027_v46 }
 0xa9d   :  { %4549 = vmatprep.subr.bf16.mxu0 %v5032_v48 }
 0xaa0   :  { %4551 = vmatpush3.bf16.msra.mxu0 %v5032_v48 }
 0xaa1   :  { %4561 = vmatprep.subr.bf16.mxu0 %v4966_v4 }
 0xb09   :  { %v1436_v36 = vpop.permute.xlu1 %1435 }
 0xb0a   :  { %v1434_v58 = vpop.permute.xlu0 %1433 }
 0xb0b   :  { %4268 = vmatprep.mubr.msk.f32.mxu0 %vm263_vm1, %v1434_v58 }
 0xb0c   :  { %4269 = vmatmul.mubr.msk.f32.vlgmr.msra.gmra.mrb[22].mxu0 %vm263_vm1, %v1436_v36 }
 0xb0d   :  { %4563 = vmatpush3.bf16.msra.mxu0 %v4966_v4  ;;  %4290 = vmatprep.mubr.msk.f32.mxu0 %vm263_vm1, %v1434_v58 }
 0xb0e   :  { %4565 = vmatprep.subr.bf16.mxu0 %v4977_v8 }
 0xb11   :  { %4567 = vmatpush3.bf16.msra.mxu0 %v4977_v8 }
 0xb12   :  { %4577 = vmatprep.subr.bf16.mxu0 %v5051_v53 }
 0xb14   :  { %4291 = vmatmul.mubr.msk.f32.vlgmr.msra.gmra.mrb[24].mxu0 %vm263_vm1, %v1436_v36 }
 0xb15   :  { %4579 = vmatpush3.bf16.msra.mxu0 %v5051_v53 }
 0xb16   :  { %4581 = vmatprep.subr.bf16.mxu0 %v5077_v7 }
 0xb19   :  { %4583 = vmatpush3.bf16.msra.mxu0 %v5077_v7 }
 0xb1a   :  { %4593 = vmatprep.subr.bf16.mxu0 %v5027_v46 }
 0xb6e   :  { %v4248_v63 = vpop.f32.mrb[20].mxu0 }
 0xb6f   :  { %v1249_v26 = vadd.f32 %v4248_v63, %v5166_v20  ;;  %v1243_v27 = vpop.f32.mrb[21].mxu0 }
 0xb70   :  { %v1244_v45 = vadd.f32 %v1243_v27, %v5166_v20 }
 0xb71   :  { %1270 = vrot.lane.b32.xlu1 %v1249_v26, %s4919_s13  ;;  %v1253_v49 = vadd.f32 %v1249_v26, %v1164_v28 }
 0xb72   :  { %1268 = vrot.lane.b32.xlu0 %v1244_v45, %s4919_s13  ;;  %v1252_v50 = vadd.f32 %v1244_v45, %v1159_v47 }
 0xb73   :  { %v3868_v12 = vmul.f32 -1.442695, %v1253_v49 }
 0xb74   :  { %v3867_v52 = vmul.f32 -1.442695, %v1252_v50 }
 0xb75   :  { %4761 = vpow2.f32 %v3868_v12 }
 0xb76   :  { %4763 = vpow2.f32 %v3867_v52 }
 0xb7f   :  { %v4762_v14 = vpop.eup %4761 }
 0xb80   :  { %v4764_v54 = vpop.eup %4763  ;;  %v1261_v51 = vadd.f32 1.0, %v4762_v14 }
 0xb81   :  { %v1260_v55 = vadd.f32 1.0, %v4764_v54 }
 0xb82   :  { %4765 = vrcp.f32 %v1261_v51 }
 0xb83   :  { %4767 = vrcp.f32 %v1260_v55 }
 0xb8c   :  { %v4766_v0 = vpop.eup %4765 }
 0xb8d   :  { %v4768_v6 = vpop.eup %4767 }
 0xbdf   :  { %v5353_v15 = vpop.f32.mrb[22].mxu0 }
 0xbe0   :  { %v5355_v56 = vpop.f32.mrb[23].mxu0 }
 0xbe3   :  { %v1271_v44 = vpop.permute.xlu1 %1270 }
 0xbe4   :  { %v1269_v61 = vpop.permute.xlu0 %1268  ;;  %v1275_v57 = vmul.f32 %v4766_v0, %v1271_v44  ;;  %v1301_v44 = vmul.f32 %v4766_v0, %v5309_v10 }
 0xbe5   :  { %v1274_v9 = vmul.f32 %v4768_v6, %v1269_v61 }
 0xbe7   :  { %v4292_v39 = vpop.f32.mrb[24].mxu0 }
 0xbe8   :  { %v1725_v43 = vadd.f32 %v4292_v39, %v5001_v16  ;;  %v1719_v40 = vpop.f32.mrb[25].mxu0 }
 0xbe9   :  { %v1720_v60 = vadd.f32 %v1719_v40, %v5001_v16  ;;  %v1288_v40 = vsub.f32 1.0, %v4768_v6 }
 0xbea   :  { %1746 = vrot.lane.b32.xlu1 %v1725_v43, %s4919_s13  ;;  %v1729_v41 = vadd.f32 %v1725_v43, %v230_v59 }
 0xbeb   :  { %1744 = vrot.lane.b32.xlu0 %v1720_v60, %s4919_s13  ;;  %v1728_v5 = vadd.f32 %v1720_v60, %v225_v19 }
 0xbec   :  { %v3882_v1 = vmul.f32 -1.442695, %v1729_v41 }
 0xbed   :  { %v3881_v25 = vmul.f32 -1.442695, %v1728_v5 }
 0xbee   :  { %1280 = vrot.lane.b32.xlu1 %v1275_v57, %s4919_s13  ;;  %4769 = vpow2.f32 %v3882_v1  ;;  %v1300_v57 = vmul.f32 %v4768_v6, %v5311_v3 }
 0xbef   :  { %1278 = vrot.lane.b32.xlu0 %v1274_v9, %s4919_s13  ;;  %4771 = vpow2.f32 %v3881_v25 }
 0xbf8   :  { %v4770_v62 = vpop.eup %4769 }
 0xbf9   :  { %v4772_v2 = vpop.eup %4771  ;;  %v1737_v35 = vadd.f32 1.0, %v4770_v62 }
 0xbfa   :  { %v1736_v42 = vadd.f32 1.0, %v4772_v2 }
 0xbfb   :  { %4773 = vrcp.f32 %v1737_v35 }
 0xbfc   :  { %4775 = vrcp.f32 %v1736_v42 }
 0xc05   :  { %v4774_v58 = vpop.eup %4773 }
 0xc06   :  { %v4776_v63 = vpop.eup %4775  ;;  %v1765_v41 = vsub.f32 1.0, %v4774_v58  ;;  %v1777_v10 = vmul.f32 %v4774_v58, %v5319_v23 }
 0xc07   :  { %v1764_v1 = vsub.f32 1.0, %v4776_v63  ;;  %v1776_v3 = vmul.f32 %v4776_v63, %v5321_v24 }
 0xc5c   :  { %v1747_v36 = vpop.permute.xlu1 %1746 }
 0xc5d   :  { %v1751_v26 = vmul.f32 %v4774_v58, %v1747_v36  ;;  %v1745_v29 = vpop.permute.xlu0 %1744 }
 0xc5e   :  { %v1750_v27 = vmul.f32 %v4776_v63, %v1745_v29  ;;  %v1513_v29 = vadd.f32 %v5353_v15, %v5219_v38 }
 0xc5f   :  { %1756 = vrot.lane.b32.xlu1 %v1751_v26, %s4919_s13 }
 0xc60   :  { %v1281_v30 = vpop.permute.xlu1 %1280  ;;  %1754 = vrot.lane.b32.xlu0 %v1750_v27, %s4919_s13  ;;  %v1508_v27 = vadd.f32 %v5355_v56, %v5219_v38 }
 0xc61   :  { %v1285_v45 = vadd.f32 %v1281_v30, %v1164_v28  ;;  %v1279_v49 = vpop.permute.xlu0 %1278  ;;  %v1289_v28 = vsub.f32 1.0, %v4766_v0 }
 0xc62   :  { %v1284_v50 = vadd.f32 %v1279_v49, %v1159_v47 }
 0xc63   :  { %4777 = vtanh.f32 %v1285_v45 }
 0xc64   :  { %4779 = vtanh.f32 %v1284_v50 }
 0xc6d   :  { %v4778_v12 = vpop.eup %4777 }
 0xc6e   :  { %v4780_v52 = vpop.eup %4779  ;;  %1294 = vrot.lane.b32.xlu1 %v4778_v12, %s4920_s22 }
 0xc6f   :  { %1292 = vrot.lane.b32.xlu0 %v4780_v52, %s4920_s22 }
 0xcd1   :  { %v1757_v14 = vpop.permute.xlu1 %1756 }
 0xcd2   :  { %v1761_v54 = vadd.f32 %v1757_v14, %v230_v59  ;;  %v1755_v51 = vpop.permute.xlu0 %1754 }
 0xcd3   :  { %v1760_v55 = vadd.f32 %v1755_v51, %v225_v19 }
 0xcd4   :  { %4781 = vtanh.f32 %v1761_v54 }
 0xcd5   :  { %4783 = vtanh.f32 %v1760_v55 }
 0xcde   :  { %v4782_v39 = vpop.eup %4781 }
 0xcdf   :  { %v4784_v43 = vpop.eup %4783  ;;  %1770 = vrot.lane.b32.xlu1 %v4782_v39, %s4920_s22 }
 0xce0   :  { %v1295_v47 = vpop.permute.xlu1 %1294  ;;  %1768 = vrot.lane.b32.xlu0 %v4784_v43, %s4920_s22 }
 0xce1   :  { %v1299_v60 = vmul.f32 %v1295_v47, %v1289_v28  ;;  %v1293_v61 = vpop.permute.xlu0 %1292 }
 0xce2   :  { %v1298_v9 = vmul.f32 %v1293_v61, %v1288_v40 }
 0xce3   :  { %v5375_v59 = vadd.f32 %v1301_v44, %v1299_v60 }
 0xce4   :  { %v5377_v19 = vadd.f32 %v1300_v57, %v1298_v9  ;;  %v240_v57 = vadd.f32 %v5190_v31, %v5012_v22  ;;  %v235_v9 = vadd.f32 %v5192_v17, %v5012_v22 }
 0xce5   :  { %1520 = vrot.lane.b32.xlu1 %v5375_v59, %s4920_s22 }
 0xce6   :  { %1518 = vrot.lane.b32.xlu0 %v5377_v19, %s4920_s22 }
 0xd51   :  { %v1771_v5 = vpop.permute.xlu1 %1770 }
 0xd52   :  { %v1775_v0 = vmul.f32 %v1771_v5, %v1765_v41  ;;  %v1769_v25 = vpop.permute.xlu0 %1768 }
 0xd53   :  { %v1774_v6 = vmul.f32 %v1769_v25, %v1764_v1 }
 0xd54   :  { %v5385_v62 = vadd.f32 %v1777_v10, %v1775_v0 }
 0xd55   :  { %v5387_v2 = vadd.f32 %v1776_v3, %v1774_v6 }
 0xd56   :  { %1784 = vrot.lane.b32.xlu1 %v5385_v62, %s4920_s22 }
 0xd57   :  { %1782 = vrot.lane.b32.xlu0 %v5387_v2, %s4920_s22  ;;  %v1521_v42 = vpop.permute.xlu1 %1520 }
 0xd58   :  { %v1519_v35 = vpop.permute.xlu0 %1518 }
 0xd59   :  { %4279 = vmatprep.mubr.msk.f32.mxu1 %vm263_vm1, %v1519_v35 }
 0xd5a   :  { %4280 = vmatmul.mubr.msk.f32.vlgmr.msra.gmra.mrb[14].mxu1 %vm263_vm1, %v1521_v42 }
 0xd5b   :  { %4571 = vmatpush3.bf16.msra.mxu1 %v5027_v46 }
 0xd5c   :  { %4573 = vmatprep.subr.bf16.mxu1 %v5032_v48 }
 0xd5f   :  { %4575 = vmatpush3.bf16.msra.mxu1 %v5032_v48 }
 0xd60   :  { %4585 = vmatprep.subr.bf16.mxu1 %v4966_v4 }
 0xdc8   :  { %v1785_v24 = vpop.permute.xlu1 %1784 }
 0xdc9   :  { %v1783_v23 = vpop.permute.xlu0 %1782 }
 0xdca   :  { %4301 = vmatprep.mubr.msk.f32.mxu1 %vm263_vm1, %v1783_v23 }
 0xdcb   :  { %4302 = vmatmul.mubr.msk.f32.vlgmr.msra.gmra.mrb[16].mxu1 %vm263_vm1, %v1785_v24 }
 0xdcc   :  { %4587 = vmatpush3.bf16.msra.mxu1 %v4966_v4  ;;  %4323 = vmatprep.mubr.msk.f32.mxu1 %vm263_vm1, %v1783_v23 }
 0xdcd   :  { %4589 = vmatprep.subr.bf16.mxu1 %v4977_v8 }
 0xdd0   :  { %4591 = vmatpush3.bf16.msra.mxu1 %v4977_v8 }
 0xdd1   :  { %4601 = vmatprep.subr.bf16.mxu1 %v5051_v53 }
 0xdd3   :  { %4324 = vmatmul.mubr.msk.f32.vlgmr.msra.gmra.mrb[18].mxu1 %vm263_vm1, %v1785_v24 }
 0xdd4   :  { %4603 = vmatpush3.bf16.msra.mxu1 %v5051_v53 }
 0xdd5   :  { %4605 = vmatprep.subr.bf16.mxu1 %v5077_v7 }
 0xdd8   :  { %4607 = vmatpush3.bf16.msra.mxu1 %v5077_v7 }
 0xdd9   :  { %4617 = vmatprep.subr.bf16.mxu1 %v5027_v46 }
 0xe2d   :  { %v4281_v58 = vpop.f32.mrb[14].mxu1 }
 0xe2e   :  { %v1598_v36 = vadd.f32 %v4281_v58, %v5166_v20  ;;  %v1592_v63 = vpop.f32.mrb[15].mxu1 }
 0xe2f   :  { %v1593_v26 = vadd.f32 %v1592_v63, %v5166_v20 }
 0xe30   :  { %1619 = vrot.lane.b32.xlu1 %v1598_v36, %s4919_s13  ;;  %v1602_v30 = vadd.f32 %v1598_v36, %v1513_v29 }
 0xe31   :  { %1617 = vrot.lane.b32.xlu0 %v1593_v26, %s4919_s13  ;;  %v1601_v45 = vadd.f32 %v1593_v26, %v1508_v27 }
 0xe32   :  { %v3878_v49 = vmul.f32 -1.442695, %v1602_v30 }
 0xe33   :  { %v3877_v50 = vmul.f32 -1.442695, %v1601_v45 }
 0xe34   :  { %4785 = vpow2.f32 %v3878_v49 }
 0xe35   :  { %4787 = vpow2.f32 %v3877_v50 }
 0xe3e   :  { %v4786_v12 = vpop.eup %4785 }
 0xe3f   :  { %v4788_v52 = vpop.eup %4787  ;;  %v1610_v14 = vadd.f32 1.0, %v4786_v12 }
 0xe40   :  { %v1609_v54 = vadd.f32 1.0, %v4788_v52 }
 0xe41   :  { %4789 = vrcp.f32 %v1610_v14 }
 0xe42   :  { %4791 = vrcp.f32 %v1609_v54 }
 0xe4b   :  { %v4790_v40 = vpop.eup %4789 }
 0xe4c   :  { %v4792_v44 = vpop.eup %4791 }
 0xe9e   :  { %v5419_v51 = vpop.f32.mrb[16].mxu1 }
 0xe9f   :  { %v5421_v55 = vpop.f32.mrb[17].mxu1 }
 0xea2   :  { %v1620_v43 = vpop.permute.xlu1 %1619 }
 0xea3   :  { %v1618_v47 = vpop.permute.xlu0 %1617  ;;  %v1624_v60 = vmul.f32 %v4790_v40, %v1620_v43 }
 0xea4   :  { %v1623_v61 = vmul.f32 %v4792_v44, %v1618_v47 }
 0xea6   :  { %v4325_v15 = vpop.f32.mrb[18].mxu1 }
 0xea7   :  { %v2074_v39 = vadd.f32 %v4325_v15, %v5001_v16  ;;  %v2068_v56 = vpop.f32.mrb[19].mxu1  ;;  %v1637_v15 = vsub.f32 1.0, %v4792_v44 }
 0xea8   :  { %v2069_v28 = vadd.f32 %v2068_v56, %v5001_v16 }
 0xea9   :  { %2095 = vrot.lane.b32.xlu1 %v2074_v39, %s4919_s13  ;;  %v2078_v41 = vadd.f32 %v2074_v39, %v240_v57  ;;  %v1650_v39 = vmul.f32 %v4790_v40, %v5375_v59 }
 0xeaa   :  { %2093 = vrot.lane.b32.xlu0 %v2069_v28, %s4919_s13  ;;  %v2077_v5 = vadd.f32 %v2069_v28, %v235_v9  ;;  %v1649_v28 = vmul.f32 %v4792_v44, %v5377_v19 }
 0xeab   :  { %v3892_v1 = vmul.f32 -1.442695, %v2078_v41 }
 0xeac   :  { %v3891_v10 = vmul.f32 -1.442695, %v2077_v5 }
 0xead   :  { %1629 = vrot.lane.b32.xlu1 %v1624_v60, %s4919_s13  ;;  %4793 = vpow2.f32 %v3892_v1 }
 0xeae   :  { %1627 = vrot.lane.b32.xlu0 %v1623_v61, %s4919_s13  ;;  %4795 = vpow2.f32 %v3891_v10 }
 0xeb7   :  { %v4794_v0 = vpop.eup %4793 }
 0xeb8   :  { %v4796_v25 = vpop.eup %4795  ;;  %v2086_v3 = vadd.f32 1.0, %v4794_v0 }
 0xeb9   :  { %v2085_v6 = vadd.f32 1.0, %v4796_v25 }
 0xeba   :  { %4797 = vrcp.f32 %v2086_v3 }
 0xebb   :  { %4799 = vrcp.f32 %v2085_v6 }
 0xec4   :  { %v4798_v35 = vpop.eup %4797 }
 0xec5   :  { %v4800_v23 = vpop.eup %4799  ;;  %v2126_v59 = vmul.f32 %v4798_v35, %v5385_v62 }
 0xec6   :  { %v2113_v41 = vsub.f32 1.0, %v4800_v23  ;;  %v2125_v19 = vmul.f32 %v4800_v23, %v5387_v2 }
 0xf1b   :  { %v2096_v42 = vpop.permute.xlu1 %2095 }
 0xf1c   :  { %v2100_v24 = vmul.f32 %v4798_v35, %v2096_v42  ;;  %v2094_v31 = vpop.permute.xlu0 %2093 }
 0xf1d   :  { %v2099_v58 = vmul.f32 %v4800_v23, %v2094_v31  ;;  %v1862_v23 = vadd.f32 %v5419_v51, %v5219_v38 }
 0xf1e   :  { %2105 = vrot.lane.b32.xlu1 %v2100_v24, %s4919_s13  ;;  %v1857_v24 = vadd.f32 %v5421_v55, %v5219_v38 }
 0xf1f   :  { %v1630_v17 = vpop.permute.xlu1 %1629  ;;  %2103 = vrot.lane.b32.xlu0 %v2099_v58, %s4919_s13 }
 0xf20   :  { %v1634_v36 = vadd.f32 %v1630_v17, %v1513_v29  ;;  %v1628_v63 = vpop.permute.xlu0 %1627  ;;  %v1638_v29 = vsub.f32 1.0, %v4790_v40 }
 0xf21   :  { %v1633_v26 = vadd.f32 %v1628_v63, %v1508_v27 }
 0xf22   :  { %4801 = vtanh.f32 %v1634_v36 }
 0xf23   :  { %4803 = vtanh.f32 %v1633_v26 }
 0xf2c   :  { %v4802_v30 = vpop.eup %4801 }
 0xf2d   :  { %v4804_v45 = vpop.eup %4803  ;;  %1643 = vrot.lane.b32.xlu1 %v4802_v30, %s4920_s22 }
 0xf2e   :  { %1641 = vrot.lane.b32.xlu0 %v4804_v45, %s4920_s22 }
 0xf90   :  { %v2106_v49 = vpop.permute.xlu1 %2105 }
 0xf91   :  { %v2110_v50 = vadd.f32 %v2106_v49, %v240_v57  ;;  %v2104_v12 = vpop.permute.xlu0 %2103  ;;  %v2114_v57 = vsub.f32 1.0, %v4798_v35 }
 0xf92   :  { %v2109_v52 = vadd.f32 %v2104_v12, %v235_v9 }
 0xf93   :  { %4805 = vtanh.f32 %v2110_v50 }
 0xf94   :  { %4807 = vtanh.f32 %v2109_v52 }
 0xf9d   :  { %v4806_v14 = vpop.eup %4805 }
 0xf9e   :  { %v4808_v54 = vpop.eup %4807  ;;  %2119 = vrot.lane.b32.xlu1 %v4806_v14, %s4920_s22 }
 0xf9f   :  { %v1644_v27 = vpop.permute.xlu1 %1643  ;;  %2117 = vrot.lane.b32.xlu0 %v4808_v54, %s4920_s22 }
 0xfa0   :  { %v1648_v56 = vmul.f32 %v1644_v27, %v1638_v29  ;;  %v1642_v43 = vpop.permute.xlu0 %1641 }
 0xfa1   :  { %v1647_v47 = vmul.f32 %v1642_v43, %v1637_v15  ;;  %v245_v43 = vadd.f32 %v5196_v18, %v5012_v22 }
 0xfa2   :  { %v5441_v60 = vadd.f32 %v1650_v39, %v1648_v56  ;;  %v250_v56 = vadd.f32 %v5194_v32, %v5012_v22 }
 0xfa3   :  { %v5443_v61 = vadd.f32 %v1649_v28, %v1647_v47 }
 0xfa4   :  { %1869 = vrot.lane.b32.xlu1 %v5441_v60, %s4920_s22 }
 0xfa5   :  { %1867 = vrot.lane.b32.xlu0 %v5443_v61, %s4920_s22 }
0x1010   :  { %v2120_v9 = vpop.permute.xlu1 %2119 }
0x1011   :  { %v2124_v40 = vmul.f32 %v2120_v9, %v2114_v57  ;;  %v2118_v5 = vpop.permute.xlu0 %2117 }
0x1012   :  { %v2123_v44 = vmul.f32 %v2118_v5, %v2113_v41 }
0x1013   :  { %v5451_v1 = vadd.f32 %v2126_v59, %v2124_v40 }
0x1014   :  { %v5453_v10 = vadd.f32 %v2125_v19, %v2123_v44 }
0x1015   :  { %2133 = vrot.lane.b32.xlu1 %v5451_v1, %s4920_s22 }
0x1016   :  { %2131 = vrot.lane.b32.xlu0 %v5453_v10, %s4920_s22  ;;  %v1870_v25 = vpop.permute.xlu1 %1869 }
0x1017   :  { %v1868_v0 = vpop.permute.xlu0 %1867 }
0x1018   :  { %4312 = vmatprep.mubr.msk.f32.mxu0 %vm263_vm1, %v1868_v0 }
0x1019   :  { %4313 = vmatmul.mubr.msk.f32.vlgmr.msra.gmra.mrb[26].mxu0 %vm263_vm1, %v1870_v25 }
0x101a   :  { %4595 = vmatpush3.bf16.msra.mxu0 %v5027_v46 }
0x101b   :  { %4597 = vmatprep.subr.bf16.mxu0 %v5032_v48 }
0x101e   :  { %4599 = vmatpush3.bf16.msra.mxu0 %v5032_v48 }
0x101f   :  { %4609 = vmatprep.subr.bf16.mxu0 %v4966_v4 }
0x1087   :  { %v2134_v2 = vpop.permute.xlu1 %2133 }
0x1088   :  { %v2132_v62 = vpop.permute.xlu0 %2131 }
0x1089   :  { %4334 = vmatprep.mubr.msk.f32.mxu0 %vm263_vm1, %v2132_v62 }
0x108a   :  { %4335 = vmatmul.mubr.msk.f32.vlgmr.msra.gmra.mrb[28].mxu0 %vm263_vm1, %v2134_v2 }
0x108b   :  { %4611 = vmatpush3.bf16.msra.mxu0 %v4966_v4  ;;  %4356 = vmatprep.mubr.msk.f32.mxu0 %vm263_vm1, %v2132_v62 }
0x108c   :  { %4613 = vmatprep.subr.bf16.mxu0 %v4977_v8 }
0x108f   :  { %4615 = vmatpush3.bf16.msra.mxu0 %v4977_v8 }
0x1090   :  { %4625 = vmatprep.subr.bf16.mxu0 %v5051_v53 }
0x1092   :  { %4357 = vmatmul.mubr.msk.f32.vlgmr.msra.gmra.mrb[30].mxu0 %vm263_vm1, %v2134_v2 }
0x1093   :  { %4627 = vmatpush3.bf16.msra.mxu0 %v5051_v53 }
0x1094   :  { %4629 = vmatprep.subr.bf16.mxu0 %v5077_v7 }
0x1097   :  { %4631 = vmatpush3.bf16.msra.mxu0 %v5077_v7 }
0x1098   :  { %4641 = vmatprep.subr.bf16.mxu0 %v5027_v46 }
0x10ec   :  { %v4314_v3 = vpop.f32.mrb[26].mxu0 }
0x10ed   :  { %v1947_v6 = vadd.f32 %v4314_v3, %v5166_v20  ;;  %v1941_v35 = vpop.f32.mrb[27].mxu0 }
0x10ee   :  { %v1942_v42 = vadd.f32 %v1941_v35, %v5166_v20 }
0x10ef   :  { %1968 = vrot.lane.b32.xlu1 %v1947_v6, %s4919_s13  ;;  %v1951_v31 = vadd.f32 %v1947_v6, %v1862_v23 }
0x10f0   :  { %1966 = vrot.lane.b32.xlu0 %v1942_v42, %s4919_s13  ;;  %v1950_v58 = vadd.f32 %v1942_v42, %v1857_v24 }
0x10f1   :  { %v3888_v17 = vmul.f32 -1.442695, %v1951_v31 }
0x10f2   :  { %v3887_v36 = vmul.f32 -1.442695, %v1950_v58 }
0x10f3   :  { %4809 = vpow2.f32 %v3888_v17 }
0x10f4   :  { %4811 = vpow2.f32 %v3887_v36 }
0x10fd   :  { %v4810_v63 = vpop.eup %4809 }
0x10fe   :  { %v4812_v26 = vpop.eup %4811  ;;  %v1959_v30 = vadd.f32 1.0, %v4810_v63 }
0x10ff   :  { %v1958_v45 = vadd.f32 1.0, %v4812_v26 }
0x1100   :  { %4813 = vrcp.f32 %v1959_v30 }
0x1101   :  { %4815 = vrcp.f32 %v1958_v45 }
0x110a   :  { %v4814_v29 = vpop.eup %4813 }
0x110b   :  { %v4816_v27 = vpop.eup %4815  ;;  %v1999_v45 = vmul.f32 %v4814_v29, %v5441_v60 }
0x110c   :  { %v1986_v30 = vsub.f32 1.0, %v4816_v27 }
0x115d   :  { %v5485_v49 = vpop.f32.mrb[28].mxu0 }
0x115e   :  { %v5487_v50 = vpop.f32.mrb[29].mxu0 }
0x1161   :  { %v1969_v52 = vpop.permute.xlu1 %1968 }
0x1162   :  { %v1967_v54 = vpop.permute.xlu0 %1966  ;;  %v1973_v15 = vmul.f32 %v4814_v29, %v1969_v52 }
0x1163   :  { %v1972_v39 = vmul.f32 %v4816_v27, %v1967_v54 }
0x1165   :  { %v4358_v51 = vpop.f32.mrb[30].mxu0 }
0x1166   :  { %v2423_v12 = vadd.f32 %v4358_v51, %v5001_v16  ;;  %v2417_v55 = vpop.f32.mrb[31].mxu0 }
0x1167   :  { %v2418_v14 = vadd.f32 %v2417_v55, %v5001_v16  ;;  %v1998_v55 = vmul.f32 %v4816_v27, %v5443_v61 }
0x1168   :  { %2444 = vrot.lane.b32.xlu1 %v2423_v12, %s4919_s13  ;;  %v2427_v28 = vadd.f32 %v2423_v12, %v250_v56 }
0x1169   :  { %2442 = vrot.lane.b32.xlu0 %v2418_v14, %s4919_s13  ;;  %v2426_v47 = vadd.f32 %v2418_v14, %v245_v43 }
0x116a   :  { %v3902_v57 = vmul.f32 -1.442695, %v2427_v28 }
0x116b   :  { %v3901_v9 = vmul.f32 -1.442695, %v2426_v47 }
0x116c   :  { %1978 = vrot.lane.b32.xlu1 %v1973_v15, %s4919_s13  ;;  %4817 = vpow2.f32 %v3902_v57 }
0x116d   :  { %1976 = vrot.lane.b32.xlu0 %v1972_v39, %s4919_s13  ;;  %4819 = vpow2.f32 %v3901_v9 }
0x1176   :  { %v4818_v41 = vpop.eup %4817 }
0x1177   :  { %v4820_v59 = vpop.eup %4819  ;;  %v2435_v40 = vadd.f32 1.0, %v4818_v41 }
0x1178   :  { %v2434_v5 = vadd.f32 1.0, %v4820_v59 }
0x1179   :  { %4821 = vrcp.f32 %v2435_v40 }
0x117a   :  { %4823 = vrcp.f32 %v2434_v5 }
0x1183   :  { %v4822_v19 = vpop.eup %4821 }
0x1184   :  { %v4824_v0 = vpop.eup %4823  ;;  %v2463_v15 = vsub.f32 1.0, %v4822_v19  ;;  %v2475_v60 = vmul.f32 %v4822_v19, %v5451_v1 }
0x1185   :  { %v2474_v61 = vmul.f32 %v4824_v0, %v5453_v10 }
0x11da   :  { %v2445_v44 = vpop.permute.xlu1 %2444 }
0x11db   :  { %v2449_v25 = vmul.f32 %v4822_v19, %v2445_v44  ;;  %v2443_v32 = vpop.permute.xlu0 %2442 }
0x11dc   :  { %v2448_v62 = vmul.f32 %v4824_v0, %v2443_v32 }
0x11dd   :  { %2454 = vrot.lane.b32.xlu1 %v2449_v25, %s4919_s13 }
0x11de   :  { %v1979_v18 = vpop.permute.xlu1 %1978  ;;  %2452 = vrot.lane.b32.xlu0 %v2448_v62, %s4919_s13 }
0x11df   :  { %v1983_v2 = vadd.f32 %v1979_v18, %v1862_v23  ;;  %v1977_v3 = vpop.permute.xlu0 %1976  ;;  %v1987_v23 = vsub.f32 1.0, %v4814_v29 }
0x11e0   :  { %v1982_v6 = vadd.f32 %v1977_v3, %v1857_v24 }
0x11e1   :  { %4825 = vtanh.f32 %v1983_v2 }
0x11e2   :  { %4827 = vtanh.f32 %v1982_v6 }
0x11eb   :  { %v4826_v35 = vpop.eup %4825 }
0x11ec   :  { %v4828_v42 = vpop.eup %4827  ;;  %1992 = vrot.lane.b32.xlu1 %v4826_v35, %s4920_s22 }
0x11ed   :  { %1990 = vrot.lane.b32.xlu0 %v4828_v42, %s4920_s22 }
0x124f   :  { %v2455_v31 = vpop.permute.xlu1 %2454 }
0x1250   :  { %v2459_v58 = vadd.f32 %v2455_v31, %v250_v56  ;;  %v2453_v17 = vpop.permute.xlu0 %2452  ;;  %v2462_v56 = vsub.f32 1.0, %v4824_v0 }
0x1251   :  { %v2458_v36 = vadd.f32 %v2453_v17, %v245_v43 }
0x1252   :  { %4829 = vtanh.f32 %v2459_v58 }
0x1253   :  { %4831 = vtanh.f32 %v2458_v36 }
0x125c   :  { %v4830_v63 = vpop.eup %4829 }
0x125d   :  { %v4832_v26 = vpop.eup %4831  ;;  %2468 = vrot.lane.b32.xlu1 %v4830_v63, %s4920_s22  ;;  %v260_v63 = vadd.f32 %v5198_v33, %v5012_v22 }
0x125e   :  { %v1993_v24 = vpop.permute.xlu1 %1992  ;;  %2466 = vrot.lane.b32.xlu0 %v4832_v26, %s4920_s22  ;;  %v255_v26 = vadd.f32 %v5200_v34, %v5012_v22 }
0x125f   :  { %v1997_v51 = vmul.f32 %v1993_v24, %v1987_v23  ;;  %v1991_v12 = vpop.permute.xlu0 %1990 }
0x1260   :  { %v1996_v52 = vmul.f32 %v1991_v12, %v1986_v30 }
0x1261   :  { %v5507_v14 = vadd.f32 %v1999_v45, %v1997_v51 }
0x1262   :  { %v5509_v54 = vadd.f32 %v1998_v55, %v1996_v52 }
0x1263   :  { %2218 = vrot.lane.b32.xlu1 %v5507_v14, %s4920_s22 }
0x1264   :  { %2216 = vrot.lane.b32.xlu0 %v5509_v54, %s4920_s22 }
0x12cf   :  { %v2469_v39 = vpop.permute.xlu1 %2468 }
0x12d0   :  { %v2473_v29 = vmul.f32 %v2469_v39, %v2463_v15  ;;  %v2467_v43 = vpop.permute.xlu0 %2466 }
0x12d1   :  { %v2472_v27 = vmul.f32 %v2467_v43, %v2462_v56 }
0x12d2   :  { %v5517_v28 = vadd.f32 %v2475_v60, %v2473_v29 }
0x12d3   :  { %v5519_v47 = vadd.f32 %v2474_v61, %v2472_v27 }
0x12d4   :  { %2482 = vrot.lane.b32.xlu1 %v5517_v28, %s4920_s22 }
0x12d5   :  { %2480 = vrot.lane.b32.xlu0 %v5519_v47, %s4920_s22  ;;  %v2219_v9 = vpop.permute.xlu1 %2218 }
0x12d6   :  { %v2217_v57 = vpop.permute.xlu0 %2216 }
0x12d7   :  { %4345 = vmatprep.mubr.msk.f32.mxu1 %vm263_vm1, %v2217_v57 }
0x12d8   :  { %4346 = vmatmul.mubr.msk.f32.vlgmr.msra.gmra.mrb[20].mxu1 %vm263_vm1, %v2219_v9 }
0x12d9   :  { %4619 = vmatpush3.bf16.msra.mxu1 %v5027_v46 }
0x12da   :  { %4621 = vmatprep.subr.bf16.mxu1 %v5032_v48 }
0x12dd   :  { %4623 = vmatpush3.bf16.msra.mxu1 %v5032_v48 }
0x12de   :  { %4633 = vmatprep.subr.bf16.mxu1 %v4966_v4 }
0x1346   :  { %v2483_v10 = vpop.permute.xlu1 %2482 }
0x1347   :  { %v2481_v1 = vpop.permute.xlu0 %2480 }
0x1348   :  { %4367 = vmatprep.mubr.msk.f32.mxu1 %vm263_vm1, %v2481_v1 }
0x1349   :  { %4368 = vmatmul.mubr.msk.f32.vlgmr.msra.gmra.mrb[22].mxu1 %vm263_vm1, %v2483_v10 }
0x134a   :  { %4635 = vmatpush3.bf16.msra.mxu1 %v4966_v4  ;;  %4389 = vmatprep.mubr.msk.f32.mxu1 %vm263_vm1, %v2481_v1 }
0x134b   :  { %4637 = vmatprep.subr.bf16.mxu1 %v4977_v8 }
0x134e   :  { %4639 = vmatpush3.bf16.msra.mxu1 %v4977_v8  ;;  %v2211_v8 = vadd.f32 %v5485_v49, %v5219_v38 }
0x134f   :  { %4649 = vmatprep.subr.bf16.mxu1 %v5051_v53 }
0x1351   :  { %4390 = vmatmul.mubr.msk.f32.vlgmr.msra.gmra.mrb[24].mxu1 %vm263_vm1, %v2483_v10 }
0x1352   :  { %4651 = vmatpush3.bf16.msra.mxu1 %v5051_v53  ;;  %v2206_v53 = vadd.f32 %v5487_v50, %v5219_v38 }
0x1353   :  { %4653 = vmatprep.subr.bf16.mxu1 %v5077_v7 }
0x1356   :  { %4655 = vmatpush3.bf16.msra.mxu1 %v5077_v7 }
0x13ab   :  { %v4347_v41 = vpop.f32.mrb[20].mxu1 }
0x13ac   :  { %v2296_v59 = vadd.f32 %v4347_v41, %v5166_v20  ;;  %v2290_v4 = vpop.f32.mrb[21].mxu1 }
0x13ad   :  { %v2291_v40 = vadd.f32 %v2290_v4, %v5166_v20 }
0x13ae   :  { %2317 = vrot.lane.b32.xlu1 %v2296_v59, %s4919_s13  ;;  %v2300_v5 = vadd.f32 %v2296_v59, %v2211_v8 }
0x13af   :  { %2315 = vrot.lane.b32.xlu0 %v2291_v40, %s4919_s13  ;;  %v2299_v19 = vadd.f32 %v2291_v40, %v2206_v53 }
0x13b0   :  { %v3898_v44 = vmul.f32 -1.442695, %v2300_v5 }
0x13b1   :  { %v3897_v7 = vmul.f32 -1.442695, %v2299_v19 }
0x13b2   :  { %4833 = vpow2.f32 %v3898_v44 }
0x13b3   :  { %4835 = vpow2.f32 %v3897_v7 }
0x13bc   :  { %v4834_v0 = vpop.eup %4833 }
0x13bd   :  { %v4836_v25 = vpop.eup %4835  ;;  %v2308_v32 = vadd.f32 1.0, %v4834_v0 }
0x13be   :  { %v2307_v62 = vadd.f32 1.0, %v4836_v25 }
0x13bf   :  { %4837 = vrcp.f32 %v2308_v32 }
0x13c0   :  { %4839 = vrcp.f32 %v2307_v62 }
0x13c9   :  { %v4838_v31 = vpop.eup %4837 }
0x13ca   :  { %v4840_v58 = vpop.eup %4839  ;;  %v2336_v4 = vsub.f32 1.0, %v4838_v31 }
0x13cb   :  { %v2347_v44 = vmul.f32 %v4840_v58, %v5509_v54 }
0x141c   :  { %v5550_v18 = vpop.f32.mrb[22].mxu1 }
0x141d   :  { %v5552_v2 = vpop.f32.mrb[23].mxu1 }
0x1420   :  { %v2318_v6 = vpop.permute.xlu1 %2317 }
0x1421   :  { %v2316_v42 = vpop.permute.xlu0 %2315  ;;  %v2322_v17 = vmul.f32 %v4838_v31, %v2318_v6 }
0x1422   :  { %v2321_v36 = vmul.f32 %v4840_v58, %v2316_v42 }
0x1424   :  { %v4391_v49 = vpop.f32.mrb[24].mxu1 }
0x1425   :  { %v2772_v3 = vadd.f32 %v4391_v49, %v5001_v16  ;;  %v2766_v50 = vpop.f32.mrb[25].mxu1 }
0x1426   :  { %v2767_v35 = vadd.f32 %v2766_v50, %v5001_v16 }
0x1427   :  { %2793 = vrot.lane.b32.xlu1 %v2772_v3, %s4919_s13  ;;  %v2776_v16 = vadd.f32 %v2772_v3, %v260_v63 }
0x1428   :  { %2791 = vrot.lane.b32.xlu0 %v2767_v35, %s4919_s13  ;;  %v2775_v23 = vadd.f32 %v2767_v35, %v255_v26 }
0x1429   :  { %v3912_v24 = vmul.f32 -1.442695, %v2776_v16 }
0x142a   :  { %v3911_v30 = vmul.f32 -1.442695, %v2775_v23 }
0x142b   :  { %2327 = vrot.lane.b32.xlu1 %v2322_v17, %s4919_s13  ;;  %4841 = vpow2.f32 %v3912_v24 }
0x142c   :  { %2325 = vrot.lane.b32.xlu0 %v2321_v36, %s4919_s13  ;;  %4843 = vpow2.f32 %v3911_v30 }
0x1435   :  { %v4842_v45 = vpop.eup %4841 }
0x1436   :  { %v4844_v51 = vpop.eup %4843  ;;  %v2784_v12 = vadd.f32 1.0, %v4842_v45 }
0x1437   :  { %v2783_v55 = vadd.f32 1.0, %v4844_v51 }
0x1438   :  { %4845 = vrcp.f32 %v2784_v12 }
0x1439   :  { %4847 = vrcp.f32 %v2783_v55 }
0x1442   :  { %v4846_v52 = vpop.eup %4845 }
0x1443   :  { %v4848_v39 = vpop.eup %4847  ;;  %v2812_v32 = vsub.f32 1.0, %v4846_v52 }
0x1444   :  { %v2811_v49 = vsub.f32 1.0, %v4848_v39  ;;  %v2823_v54 = vmul.f32 %v4848_v39, %v5519_v47 }
0x1499   :  { %v2794_v15 = vpop.permute.xlu1 %2793 }
0x149a   :  { %v2798_v56 = vmul.f32 %v4846_v52, %v2794_v15  ;;  %v2792_v33 = vpop.permute.xlu0 %2791 }
0x149b   :  { %v2797_v60 = vmul.f32 %v4848_v39, %v2792_v33 }
0x149c   :  { %2803 = vrot.lane.b32.xlu1 %v2798_v56, %s4919_s13 }
0x149d   :  { %v2328_v22 = vpop.permute.xlu1 %2327  ;;  %2801 = vrot.lane.b32.xlu0 %v2797_v60, %s4919_s13 }
0x149e   :  { %v2332_v34 = vadd.f32 %v2328_v22, %v2211_v8  ;;  %v2326_v29 = vpop.permute.xlu0 %2325  ;;  %v2335_v8 = vsub.f32 1.0, %v4840_v58 }
0x149f   :  { %v2331_v43 = vadd.f32 %v2326_v29, %v2206_v53  ;;  %v2348_v53 = vmul.f32 %v4838_v31, %v5507_v14  ;;  %v2824_v14 = vmul.f32 %v4846_v52, %v5517_v28  ;;  %v3049_v28 = vld [vmem:[%s5805_s4] sm:$0xff] }
0x14a0   :  { %4849 = vtanh.f32 %v2332_v34 }
0x14a1   :  { %4851 = vtanh.f32 %v2331_v43 }
0x14aa   :  { %v4850_v61 = vpop.eup %4849 }
0x14ab   :  { %v4852_v27 = vpop.eup %4851  ;;  %2341 = vrot.lane.b32.xlu1 %v4850_v61, %s4920_s22 }
0x14ac   :  { %2339 = vrot.lane.b32.xlu0 %v4852_v27, %s4920_s22 }
0x150e   :  { %v2804_v57 = vpop.permute.xlu1 %2803 }
0x150f   :  { %v2808_v9 = vadd.f32 %v2804_v57, %v260_v63  ;;  %v2802_v1 = vpop.permute.xlu0 %2801  ;;  %v3194_v57 = vld [vmem:[%s5806_s1] sm:$0xff] }
0x1510   :  { %v2807_v10 = vadd.f32 %v2802_v1, %v255_v26  ;;  %v5615_v26 = vld [vmem:[%s5805_s4 + $0x8] sm:$0xff]  ;;  %vm3196_vm2 = vcmp.gt.f32.partialorder %v3194_v57, 0.0 }
0x1511   :  { %4853 = vtanh.f32 %v2808_v9  ;;  %v3129_v24 = vrot.slane %v5615_v26, %v5008_v21  ;;  %v3141_v45 = vrot.slane %v5615_v26, %v4992_v13 }
0x1512   :  { %4855 = vtanh.f32 %v2807_v10 }
0x151b   :  { %v4854_v41 = vpop.eup %4853 }
0x151c   :  { %v4856_v59 = vpop.eup %4855  ;;  %2817 = vrot.lane.b32.xlu1 %v4854_v41, %s4920_s22  ;;  %v3195_v41 = vld [vmem:[%s5806_s1 + $0x8] sm:$0xff] }
0x151d   :  { %v2342_v40 = vpop.permute.xlu1 %2341  ;;  %2815 = vrot.lane.b32.xlu0 %v4856_v59, %s4920_s22  ;;  %vm3197_vm6 = vcmp.gt.f32.partialorder %v3195_v41, 0.0 }
0x151e   :  { %v2346_v5 = vmul.f32 %v2342_v40, %v2336_v4  ;;  %v2340_v19 = vpop.permute.xlu0 %2339 }
0x151f   :  { %v2345_v7 = vmul.f32 %v2340_v19, %v2335_v8 }
0x1520   :  { %v5572_v0 = vadd.f32 %v2348_v53, %v2346_v5 }
0x1521   :  { %v5574_v25 = vadd.f32 %v2347_v44, %v2345_v7 }
0x1522   :  { %2567 = vrot.lane.b32.xlu1 %v5572_v0, %s4920_s22 }
0x1523   :  { %2565 = vrot.lane.b32.xlu0 %v5574_v25, %s4920_s22 }
0x158e   :  { %v2818_v62 = vpop.permute.xlu1 %2817 }
0x158f   :  { %v2822_v3 = vmul.f32 %v2818_v62, %v2812_v32  ;;  %v2816_v50 = vpop.permute.xlu0 %2815 }
0x1590   :  { %v2821_v6 = vmul.f32 %v2816_v50, %v2811_v49 }
0x1591   :  { %v2826_v35 = vadd.f32 %v2824_v14, %v2822_v3 }
0x1592   :  { %v2825_v42 = vadd.f32 %v2823_v54, %v2821_v6 }
0x1593   :  { %2831 = vrot.lane.b32.xlu1 %v2826_v35, %s4920_s22 }
0x1594   :  { %2829 = vrot.lane.b32.xlu0 %v2825_v42, %s4920_s22  ;;  %v2568_v58 = vpop.permute.xlu1 %2567 }
0x1595   :  { %v2566_v31 = vpop.permute.xlu0 %2565 }
0x1596   :  { %4378 = vmatprep.mubr.msk.f32.mxu0 %vm263_vm1, %v2566_v31 }
0x1597   :  { %4379 = vmatmul.mubr.msk.f32.vlgmr.msra.gmra.mrb[32].mxu0 %vm263_vm1, %v2568_v58 }
0x1598   :  { %4643 = vmatpush3.bf16.msra.mxu0 %v5027_v46  ;;  %v5597_v46 = vld [vmem:[%s5803_s0 + $0x70] sm:$0xff] }
0x1599   :  { %4645 = vmatprep.subr.bf16.mxu0 %v5032_v48 }
0x159c   :  { %4647 = vmatpush3.bf16.msra.mxu0 %v5032_v48  ;;  %v5604_v48 = vld [vmem:[%s5803_s0 + $0x78] sm:$0xff] }
0x159d   :  { %4414 = vmatprep.subr.mxu0 %v3049_v28 }
0x1605   :  { %v2832_v17 = vpop.permute.xlu1 %2831 }
0x1606   :  { %v2830_v47 = vpop.permute.xlu0 %2829 }
0x1607   :  { %4400 = vmatprep.mubr.msk.f32.mxu0 %vm263_vm1, %v2830_v47 }
0x1608   :  { %4401 = vmatmul.mubr.msk.f32.vlgmr.msra.gmra.mrb[34].mxu0 %vm263_vm1, %v2832_v17  ;;  %v5654_v17 = vld [vmem:[%s5804_s3] sm:$0xff] }
0x1609   :  { %4415 = vmatpush3.msra.mxu0 %v3049_v28  ;;  %4416 = vmatprep.mubr.msk.f32.mxu0 %vm69_vm0, %v5597_v46  ;;  %v3404_v28 = vsub.s32 5, %v4989_v11 }
0x160c   :  { %4417 = vmatmul.mubr.msk.f32.vlgmr.msra.gmra.mrb[36].mxu0 %vm69_vm0, %v5604_v48 }
0x166a   :  { %v5608_v36 = vpop.f32.mrb[32].mxu0 }
0x166b   :  { %v5610_v63 = vpop.f32.mrb[33].mxu0  ;;  %v2645_v47 = vadd.f32 %v5608_v36, %v5166_v20  ;;  %v5665_v36 = vadd.f32 %v5550_v18, %v5219_v38 }
0x166c   :  { %v2640_v58 = vadd.f32 %v5610_v63, %v5166_v20  ;;  %v5660_v63 = vadd.f32 %v5552_v2, %v5219_v38 }
0x16db   :  { %v5617_v16 = vpop.f32.mrb[34].mxu0 }
0x16dc   :  { %v5619_v23 = vpop.f32.mrb[35].mxu0 }
0x16df   :  { %v4418_v30 = vpop.f32.mrb[36].mxu0 }
0x16e0   :  { %v3131_v51 = vmul.f32 %v4418_v30, %v3129_v24  ;;  %v3117_v12 = vpop.f32.mrb[37].mxu0  ;;  %v3143_v33 = vmul.f32 %v4418_v30, %v3141_v45 }
0x16e1   :  { %v3130_v55 = vmul.f32 %v3129_v24, %v3117_v12  ;;  %v4656_v52 = vpack.c.bf16 %v4418_v30, %v3117_v12  ;;  %v3142_v39 = vmul.f32 %v3141_v45, %v3117_v12  ;;  %v3405_v24 = vrot.slane %v5654_v17, %v3404_v28 }
0x16e2   :  { %v3135_v15 = vsel %vm69_vm0, %v3131_v51, 0.0  ;;  %v3147_v22 = vsel %vm69_vm0, %v3143_v33, 0.0  ;;  %v2648_v30 = vadd.f32 %v2640_v58, %v5660_v63  ;;  %v2649_v45 = vadd.f32 %v2645_v47, %v5665_v36 }
0x16e3   :  { %3136 = vadd.xlane.f32.xlu1 %v3135_v15  ;;  %4657 = vmatprep.subr.bf16.mxu0 %v4656_v52  ;;  %v3132_v56 = vsel %vm69_vm0, %v3130_v55, 0.0  ;;  %v3144_v60 = vsel %vm69_vm0, %v3142_v39, 0.0 }
0x16e4   :  { %4659 = vmatpush3.bf16.msra.mxu0 %v4656_v52  ;;  %3133 = vadd.xlane.f32.xlu0 %v3132_v56  ;;  %v3907_v51 = vmul.f32 -1.442695, %v2648_v30  ;;  %v3908_v12 = vmul.f32 -1.442695, %v2649_v45 }
0x16e8   :  { %3145 = vadd.xlane.f32.xlu0 %v3144_v60 }
0x16ec   :  { %3148 = vadd.xlane.f32.xlu0 %v3147_v22 }
0x1770   :  { %v3137_v29 = vpop.xlane.xlu1 %3136 }
0x1771   :  { %v3134_v34 = vpop.xlane.xlu0 %3133 }
0x1772   :  { %3150 = vxpose.xlu1.b32.start [1/2] (short) (narrow) %v3134_v34, 8 }
0x1775   :  { %v3146_v43 = vpop.xlane.xlu0 %3145 }
0x1776   :  { %3151 = vxpose.xlu1.b32.end [2/2] (short) (narrow) %v3137_v29, 8 }
0x1779   :  { %v3149_v9 = vpop.xlane.xlu0 %3148 }
0x17f2   :  { %v3166_v61 = vpop.trf.xlu1 }
0x17f3   :  { %v3185_v27 = vrot.slane %v3166_v61, %v5008_v21 }
0x17f5   :  { %v3186_v1 = vadd.f32 %v3185_v27, %v3146_v43  ;;  %v3187_v10 = vadd.f32 %v3185_v27, %v3149_v9  ;;  %v3310_v9 = vld [vmem:[%s5802_s2 + $0x68] sm:$0xff] }
0x17f6   :  { %4426 = vmatprep.subr.mxu0 %v3310_v9 }
0x17f7   :  { %v3190_v59 = vmul.f32 0.2, %v3186_v1  ;;  %v3191_v4 = vmul.f32 0.2, %v3187_v10  ;;  %vm3188_vm3 = vcmp.gt.f32.partialorder %v3186_v1, 0.0  ;;  %vm3189_vm4 = vcmp.gt.f32.partialorder %v3187_v10, 0.0 }
0x17f9   :  { %v3192_v40 = vsel %vm3188_vm3, %v3186_v1, %v3190_v59  ;;  %v3193_v8 = vsel %vm3189_vm4, %v3187_v10, %v3191_v4  ;;  %v3228_v1 = vrot.slane %v5615_v26, %v5215_v37 }
0x17fa   :  { %v3198_v53 = vsel %vm3196_vm2, %v3192_v40, -1e+30  ;;  %v3199_v19 = vsel %vm3197_vm6, %v3193_v8, -1e+30 }
0x17fb   :  { %v3201_v5 = vsel %vm3200_vm5, %v3198_v53, -inf  ;;  %v3204_v44 = vsel %vm3200_vm5, %v3199_v19, -inf }
0x17fc   :  { %3202 = vmax.xlane.f32.xlu0 %v3201_v5 }
0x1800   :  { %3205 = vmax.xlane.f32.xlu0 %v3204_v44 }
0x1889   :  { %v3203_v7 = vpop.xlane.xlu0 %3202 }
0x188a   :  { %v3207_v32 = vsub.f32 %v3198_v53, %v3203_v7  ;;  %v3319_v53 = vsub.s32 4, %v4989_v11 }
0x188c   :  { %v3209_v62 = vmul.f32 1.442695, %v3207_v32  ;;  %v3320_v5 = vrot.slane %v5654_v17, %v3319_v53 }
0x188d   :  { %v3206_v49 = vpop.xlane.xlu0 %3205 }
0x188e   :  { %4857 = vpow2.f32 %v3209_v62  ;;  %v3208_v14 = vsub.f32 %v3199_v19, %v3206_v49 }
0x1890   :  { %v3211_v3 = vmul.f32 1.442695, %v3208_v14 }
0x1892   :  { %4859 = vpow2.f32 %v3211_v3 }
0x1893   :  { %4861 = vpow2.f32 %v3907_v51 }
0x1894   :  { %4863 = vpow2.f32 %v3908_v12 }
0x1898   :  { %v4858_v50 = vpop.eup %4857 }
0x1899   :  { %v3213_v54 = vsel %vm3196_vm2, %v4858_v50, 0.0 }
0x189a   :  { %v3215_v6 = vsel %vm3200_vm5, %v3213_v54, 0.0 }
0x189b   :  { %3216 = vadd.xlane.f32.xlu0 %v3215_v6 }
0x189c   :  { %v4860_v35 = vpop.eup %4859 }
0x189d   :  { %v3214_v42 = vsel %vm3197_vm6, %v4860_v35, 0.0  ;;  %v4862_v55 = vpop.eup %4861 }
0x189e   :  { %v3218_v31 = vsel %vm3200_vm5, %v3214_v42, 0.0  ;;  %v2656_v52 = vadd.f32 1.0, %v4862_v55  ;;  %v4864_v15 = vpop.eup %4863 }
0x189f   :  { %3219 = vadd.xlane.f32.xlu0 %v3218_v31  ;;  %v2657_v39 = vadd.f32 1.0, %v4864_v15  ;;  %v3311_v15 = vld [vmem:[%s5802_s2 + $0x70] sm:$0xff] }
0x18a0   :  { %4865 = vrcp.f32 %v2656_v52 }
0x18aa   :  { %v5668_v33 = vpop.eup %4865 }
0x18b5   :  { %2664 = vrot.lane.b32.xlu0 %v2640_v58, %s4919_s13 }
0x18b9   :  { %2666 = vrot.lane.b32.xlu0 %v2645_v47, %s4919_s13 }
0x18bd   :  { %3421 = vrot.lane.b32.xlu0 %v3405_v24, %s4919_s13 }
0x1928   :  { %v3217_v56 = vpop.xlane.xlu0 %3216 }
0x1929   :  { %4867 = vrcp.f32 %v3217_v56  ;;  %v2684_v56 = vsub.f32 1.0, %v5668_v33 }
0x192a   :  { %4869 = vrcp.f32 %v2657_v39  ;;  %v3312_v39 = vld [vmem:[%s5802_s2 + $0x78] sm:$0xff] }
0x192c   :  { %v3220_v2 = vpop.xlane.xlu0 %3219 }
0x192d   :  { %4871 = vrcp.f32 %v3220_v2  ;;  %v4660_v2 = vpack.c.bf16 %v3312_v39, %v3311_v15 }
0x1930   :  { %v2665_v18 = vpop.permute.xlu0 %2664 }
0x1931   :  { %v2670_v60 = vmul.f32 %v5668_v33, %v2665_v18 }
0x1933   :  { %v4868_v22 = vpop.eup %4867  ;;  %2674 = vrot.lane.b32.xlu0 %v2670_v60, %s4919_s13 }
0x1934   :  { %v5672_v34 = vpop.eup %4869  ;;  %v2667_v29 = vpop.permute.xlu0 %2666  ;;  %v3223_v43 = vmul.f32 %v4868_v22, %v3213_v54 }
0x1935   :  { %v2671_v61 = vmul.f32 %v5672_v34, %v2667_v29  ;;  %v2696_v29 = vmul.f32 %v5668_v33, %v5574_v25  ;;  %v3313_v25 = vld [vmem:[%s5802_s2 + $0x80] sm:$0xff]  ;;  %v3314_v33 = vld [vmem:[%s5802_s2 + $0x88] sm:$0xff] }
0x1936   :  { %4423 = vmatprep.mubr.msk.f32.mxu0 %vm3200_vm5, %v3223_v43  ;;  %v2685_v43 = vsub.f32 1.0, %v5672_v34 }
0x1937   :  { %v4872_v27 = vpop.eup %4871  ;;  %2676 = vrot.lane.b32.xlu0 %v2671_v61, %s4919_s13 }
0x1938   :  { %v3224_v57 = vmul.f32 %v4872_v27, %v3214_v42 }
0x193a   :  { %4424 = vmatmul.mubr.msk.f32.vlgmr.msra.gmra.mrb[38].mxu0 %vm3200_vm5, %v3224_v57  ;;  %v2697_v57 = vmul.f32 %v5672_v34, %v5572_v0 }
0x193b   :  { %4427 = vmatpush3.msra.mxu0 %v3310_v9 }
0x193c   :  { %4661 = vmatprep.subr.bf16.mxu0 %v4660_v2 }
0x1a0d   :  { %v4425_v10 = vpop.f32.mrb[38].mxu0 }
0x1a0e   :  { %v3307_v41 = vadd.f32 %v4425_v10, %v3228_v1  ;;  %v3301_v59 = vpop.f32.mrb[39].mxu0 }
0x1a0f   :  { %v3302_v4 = vadd.f32 %v3301_v59, %v3228_v1  ;;  %v4664_v1 = vpack.c.bf16 %v3314_v33, %v3313_v25  ;;  %v3545_v59 = vsub.s32 7, %v4989_v11 }
0x1a10   :  { %v3316_v8 = vsub.f32 %v5604_v48, %v3307_v41 }
0x1a11   :  { %v3315_v40 = vsub.f32 %v5597_v46, %v3302_v4  ;;  %v3422_v46 = vpop.permute.xlu0 %3421 }
0x1a13   :  { %4428 = vmatprep.mubr.msk.f32.mxu0 %vm69_vm0, %v3315_v40 }
0x1a14   :  { %4429 = vmatmul.mubr.msk.f32.vlgmr.msra.gmra.mrb[40].mxu0 %vm69_vm0, %v3316_v8 }
0x1a15   :  { %v2675_v3 = vpop.permute.xlu0 %2674  ;;  %4663 = vmatpush3.bf16.msra.mxu0 %v4660_v2 }
0x1a16   :  { %v2680_v35 = vadd.f32 %v2675_v3, %v5660_v63  ;;  %4665 = vmatprep.subr.bf16.mxu0 %v4664_v1  ;;  %v3456_v3 = vsub.s32 6, %v4989_v11 }
0x1a19   :  { %v2677_v42 = vpop.permute.xlu0 %2676  ;;  %4667 = vmatpush3.bf16.msra.mxu0 %v4664_v1 }
0x1a1a   :  { %v2681_v31 = vadd.f32 %v2677_v42, %v5665_v36 }
0x1ae7   :  { %v4430_v19 = vpop.f32.mrb[40].mxu0 }
0x1ae8   :  { %v3399_v44 = vadd.f32 %v4430_v19, %v3320_v5  ;;  %v3393_v7 = vpop.f32.mrb[41].mxu0  ;;  %v3546_v19 = vrot.slane %v5654_v17, %v3545_v59  ;;  %v3599_v59 = vld [vmem:[%s5807_s5 + $0x20] sm:$0xff] }
0x1ae9   :  { %v3394_v26 = vadd.f32 %v3393_v7, %v3320_v5 }
0x1aea   :  { %v3407_v32 = vadd.f32 %v3405_v24, %v3399_v44 }
0x1aeb   :  { %v3406_v62 = vadd.f32 %v3405_v24, %v3394_v26 }
0x1aec   :  { %v3926_v49 = vmul.f32 -1.442695, %v3407_v32 }
0x1aed   :  { %v3925_v14 = vmul.f32 -1.442695, %v3406_v62 }
0x1aee   :  { %4873 = vpow2.f32 %v3926_v49 }
0x1aef   :  { %4875 = vpow2.f32 %v3925_v14 }
0x1af8   :  { %v4874_v48 = vpop.eup %4873 }
0x1af9   :  { %v4876_v50 = vpop.eup %4875  ;;  %v3415_v54 = vadd.f32 1.0, %v4874_v48 }
0x1afa   :  { %v3414_v6 = vadd.f32 1.0, %v4876_v50  ;;  %v2909_v50 = vadd.f32 %v5617_v16, %v5219_v38 }
0x1afb   :  { %4877 = vrcp.f32 %v3415_v54  ;;  %v2904_v54 = vadd.f32 %v5619_v23, %v5219_v38 }
0x1afc   :  { %4879 = vrcp.f32 %v3414_v6 }
0x1afd   :  { %4881 = vtanh.f32 %v2680_v35  ;;  %v3457_v35 = vrot.slane %v5654_v17, %v3456_v3 }
0x1afe   :  { %4883 = vtanh.f32 %v2681_v31 }
0x1b05   :  { %v4878_v58 = vpop.eup %4877 }
0x1b06   :  { %v4880_v28 = vpop.eup %4879  ;;  %v3425_v47 = vmul.f32 %v4878_v58, %v3422_v46  ;;  %v3439_v40 = vsub.f32 1.0, %v4878_v58  ;;  %v3451_v53 = vmul.f32 0.0, %v4878_v58 }
0x1b07   :  { %v3424_v24 = vmul.f32 %v4880_v28, %v3422_v46  ;;  %v4882_v30 = vpop.eup %4881  ;;  %v3438_v0 = vsub.f32 1.0, %v4880_v28  ;;  %v3450_v10 = vmul.f32 0.0, %v4880_v28 }
0x1b08   :  { %3430 = vrot.lane.b32.xlu0 %v3425_v47, %s4919_s13  ;;  %v4884_v45 = vpop.eup %4883 }
0x1b09   :  { %3428 = vrot.lane.b32.xlu1 %v3424_v24, %s4919_s13 }
0x1b0c   :  { %2688 = vrot.lane.b32.xlu0 %v4882_v30, %s4920_s22 }
0x1b10   :  { %2690 = vrot.lane.b32.xlu0 %v4884_v45, %s4920_s22 }
0x1b7a   :  { %v3431_v63 = vpop.permute.xlu0 %3430 }
0x1b7b   :  { %v3429_v51 = vpop.permute.xlu1 %3428  ;;  %v3435_v55 = vadd.f32 %v3431_v63, %v3399_v44 }
0x1b7c   :  { %v3434_v12 = vadd.f32 %v3429_v51, %v3394_v26 }
0x1b7e   :  { %4885 = vtanh.f32 %v3434_v12  ;;  %v2689_v36 = vpop.permute.xlu0 %2688 }
0x1b7f   :  { %4887 = vtanh.f32 %v3435_v55  ;;  %v2694_v18 = vmul.f32 %v2689_v36, %v2684_v56 }
0x1b81   :  { %v5707_v61 = vadd.f32 %v2696_v29, %v2694_v18 }
0x1b82   :  { %v2691_v22 = vpop.permute.xlu0 %2690 }
0x1b83   :  { %v2695_v27 = vmul.f32 %v2691_v22, %v2685_v43 }
0x1b85   :  { %v5713_v9 = vadd.f32 %v2697_v57, %v2695_v27 }
0x1b88   :  { %v4886_v52 = vpop.eup %4885 }
0x1b89   :  { %3442 = vrot.lane.b32.xlu0 %v4886_v52, %s4920_s22  ;;  %v4888_v60 = vpop.eup %4887 }
0x1b8d   :  { %3444 = vrot.lane.b32.xlu0 %v4888_v60, %s4920_s22 }
0x1b91   :  { %2914 = vrot.lane.b32.xlu0 %v5707_v61, %s4920_s22 }
0x1b95   :  { %2916 = vrot.lane.b32.xlu0 %v5713_v9, %s4920_s22 }
0x1bfb   :  { %v3443_v34 = vpop.permute.xlu0 %3442 }
0x1bfc   :  { %v3448_v41 = vmul.f32 %v3443_v34, %v3438_v0 }
0x1bfe   :  { %v3452_v4 = vadd.f32 %v3450_v10, %v3448_v41 }
0x1bff   :  { %v3445_v8 = vpop.permute.xlu0 %3444 }
0x1c00   :  { %v3449_v5 = vmul.f32 %v3445_v8, %v3439_v40  ;;  %3460 = vrot.lane.b32.xlu0 %v3452_v4, %s4920_s22  ;;  %v3600_v4 = vld [vmem:[%s5807_s5 + $0x28] sm:$0xff]  ;;  %v3601_v40 = vld [vmem:[%s5807_s5 + $0x30] sm:$0xff] }
0x1c01   :  { %v4668_v8 = vpack.c.bf16 %v3600_v4, %v3599_v59 }
0x1c02   :  { %v3453_v44 = vadd.f32 %v3451_v53, %v3449_v5  ;;  %v3602_v53 = vld [vmem:[%s5807_s5 + $0x38] sm:$0xff] }
0x1c03   :  { %v2915_v7 = vpop.permute.xlu0 %2914  ;;  %4669 = vmatprep.subr.bf16.mxu1 %v4668_v8 }
0x1c04   :  { %3462 = vrot.lane.b32.xlu1 %v3453_v44, %s4920_s22  ;;  %4411 = vmatprep.mubr.msk.f32.mxu1 %vm263_vm1, %v2915_v7 }
0x1c05   :  { %3562 = vrot.lane.b32.xlu0 %v3546_v19, %s4919_s13 }
0x1c07   :  { %v2917_v26 = vpop.permute.xlu0 %2916 }
0x1c08   :  { %4412 = vmatmul.mubr.msk.f32.vlgmr.msra.gmra.mrb[26].mxu1 %vm263_vm1, %v2917_v26 }
0x1c09   :  { %4671 = vmatpush3.bf16.msra.mxu1 %v4668_v8 }
0x1c72   :  { %v3461_v32 = vpop.permute.xlu0 %3460 }
0x1c73   :  { %4439 = vmatprep.mubr.msk.f32.mxu0 %vm263_vm1, %v3461_v32  ;;  %v3595_v32 = vld [vmem:[%s5807_s5] sm:$0xff] }
0x1c76   :  { %v3463_v62 = vpop.permute.xlu1 %3462 }
0x1c77   :  { %4440 = vmatmul.mubr.msk.f32.vlgmr.msra.gmra.mrb[42].mxu0 %vm263_vm1, %v3463_v62  ;;  %v3563_v52 = vpop.permute.xlu0 %3562  ;;  %v3596_v62 = vld [vmem:[%s5807_s5 + $0x8] sm:$0xff] }
0x1cdb   :  { %v4413_v49 = vpop.f32.mrb[26].mxu1 }
0x1cdc   :  { %v2994_v14 = vadd.f32 %v4413_v49, %v5166_v20  ;;  %v2988_v46 = vpop.f32.mrb[27].mxu1  ;;  %v4676_v49 = vpack.c.bf16 %v3596_v62, %v3595_v32 }
0x1cdd   :  { %v2989_v48 = vadd.f32 %v2988_v46, %v5166_v20 }
0x1cde   :  { %3015 = vrot.lane.b32.xlu0 %v2994_v14, %s4919_s13  ;;  %v2998_v6 = vadd.f32 %v2994_v14, %v2909_v50 }
0x1cdf   :  { %3013 = vrot.lane.b32.xlu1 %v2989_v48, %s4919_s13  ;;  %v2997_v42 = vadd.f32 %v2989_v48, %v2904_v54 }
0x1ce0   :  { %v3918_v58 = vmul.f32 -1.442695, %v2998_v6 }
0x1ce1   :  { %v3917_v47 = vmul.f32 -1.442695, %v2997_v42 }
0x1ce2   :  { %4889 = vpow2.f32 %v3918_v58 }
0x1ce3   :  { %4891 = vpow2.f32 %v3917_v47 }
0x1cec   :  { %v4890_v16 = vpop.eup %4889 }
0x1ced   :  { %v4892_v38 = vpop.eup %4891  ;;  %v3006_v55 = vadd.f32 1.0, %v4890_v16 }
0x1cee   :  { %v3005_v36 = vadd.f32 1.0, %v4892_v38  ;;  %v3597_v38 = vld [vmem:[%s5807_s5 + $0x10] sm:$0xff] }
0x1d4a   :  { %v4441_v31 = vpop.f32.mrb[42].mxu0 }
0x1d4b   :  { %v3540_v28 = vadd.f32 %v4441_v31, %v3457_v35  ;;  %v3534_v20 = vpop.f32.mrb[43].mxu0 }
0x1d4c   :  { %v3535_v24 = vadd.f32 %v3534_v20, %v3457_v35 }
0x1d4d   :  { %v3548_v30 = vadd.f32 %v3546_v19, %v3540_v28 }
0x1d4e   :  { %v3547_v45 = vadd.f32 %v3546_v19, %v3535_v24  ;;  %v4672_v19 = vpack.c.bf16 %v3602_v53, %v3601_v40 }
0x1d4f   :  { %v3930_v11 = vmul.f32 -1.442695, %v3548_v30 }
0x1d50   :  { %v3929_v63 = vmul.f32 -1.442695, %v3547_v45  ;;  %v3016_v18 = vpop.permute.xlu0 %3015  ;;  %4673 = vmatprep.subr.bf16.mxu1 %v4672_v19 }
0x1d51   :  { %4893 = vpow2.f32 %v3930_v11  ;;  %v3014_v60 = vpop.permute.xlu1 %3013  ;;  %4675 = vmatpush3.bf16.msra.mxu1 %v4672_v19 }
0x1d52   :  { %4895 = vpow2.f32 %v3929_v63  ;;  %4677 = vmatprep.subr.bf16.mxu1 %v4676_v49 }
0x1d5b   :  { %v4894_v23 = vpop.eup %4893 }
0x1d5c   :  { %v4896_v51 = vpop.eup %4895  ;;  %v3556_v17 = vadd.f32 1.0, %v4894_v23 }
0x1d5d   :  { %v3555_v12 = vadd.f32 1.0, %v4896_v51 }
0x1d5e   :  { %4897 = vrcp.f32 %v3556_v17 }
0x1d5f   :  { %4899 = vrcp.f32 %v3555_v12 }
0x1d60   :  { %4901 = vrcp.f32 %v3006_v55  ;;  %v3603_v55 = vld [vmem:[%s5807_s5 + $0x40] sm:$0xff] }
0x1d61   :  { %4903 = vrcp.f32 %v3005_v36  ;;  %v3777_v36 = vrot.slane %v3603_v55, %v5008_v21  ;;  %v3818_v62 = vrot.slane %v3603_v55, %v5215_v37 }
0x1d68   :  { %v4898_v15 = vpop.eup %4897 }
0x1d69   :  { %v4900_v39 = vpop.eup %4899  ;;  %v3566_v56 = vmul.f32 %v4898_v15, %v3563_v52  ;;  %v3580_v14 = vsub.f32 1.0, %v4898_v15  ;;  %v3592_v3 = vmul.f32 0.0, %v4898_v15 }
0x1d6a   :  { %v3565_v2 = vmul.f32 %v4900_v39, %v3563_v52  ;;  %v4902_v22 = vpop.eup %4901  ;;  %v3579_v48 = vsub.f32 1.0, %v4900_v39  ;;  %v3591_v6 = vmul.f32 0.0, %v4900_v39 }
0x1d6b   :  { %3571 = vrot.lane.b32.xlu0 %v3566_v56, %s4919_s13  ;;  %v4904_v29 = vpop.eup %4903  ;;  %v3020_v43 = vmul.f32 %v4902_v22, %v3016_v18  ;;  %v3034_v31 = vsub.f32 1.0, %v4902_v22  ;;  %v3046_v47 = vmul.f32 %v4902_v22, %v5713_v9  ;;  %v3598_v9 = vld [vmem:[%s5807_s5 + $0x18] sm:$0xff] }
0x1d6c   :  { %3569 = vrot.lane.b32.xlu1 %v3565_v2, %s4919_s13  ;;  %v3019_v27 = vmul.f32 %v4904_v29, %v3014_v60  ;;  %v3033_v20 = vsub.f32 1.0, %v4904_v29  ;;  %v3045_v45 = vmul.f32 %v4904_v29, %v5707_v61  ;;  %v4680_v51 = vpack.c.bf16 %v3598_v9, %v3597_v38 }
0x1d6f   :  { %3025 = vrot.lane.b32.xlu0 %v3020_v43, %s4919_s13 }
0x1d70   :  { %3023 = vrot.lane.b32.xlu1 %v3019_v27, %s4919_s13 }
0x1ddd   :  { %v3572_v57 = vpop.permute.xlu0 %3571 }
0x1dde   :  { %v3576_v25 = vadd.f32 %v3572_v57, %v3540_v28  ;;  %v3570_v33 = vpop.permute.xlu1 %3569 }
0x1ddf   :  { %v3575_v1 = vadd.f32 %v3570_v33, %v3535_v24 }
0x1de0   :  { %4905 = vtanh.f32 %v3576_v25 }
0x1de1   :  { %4907 = vtanh.f32 %v3575_v1  ;;  %v3026_v0 = vpop.permute.xlu0 %3025 }
0x1de2   :  { %v3030_v34 = vadd.f32 %v3026_v0, %v2909_v50  ;;  %v3024_v10 = vpop.permute.xlu1 %3023 }
0x1de3   :  { %v3029_v41 = vadd.f32 %v3024_v10, %v2904_v54 }
0x1de4   :  { %4909 = vtanh.f32 %v3030_v34 }
0x1de5   :  { %4911 = vtanh.f32 %v3029_v41 }
0x1dea   :  { %v4906_v5 = vpop.eup %4905 }
0x1deb   :  { %v4908_v44 = vpop.eup %4907  ;;  %3585 = vrot.lane.b32.xlu0 %v4906_v5, %s4920_s22 }
0x1dec   :  { %3583 = vrot.lane.b32.xlu1 %v4908_v44, %s4920_s22 }
0x1dee   :  { %v4910_v7 = vpop.eup %4909 }
0x1def   :  { %v4912_v26 = vpop.eup %4911  ;;  %3039 = vrot.lane.b32.xlu0 %v4910_v7, %s4920_s22 }
0x1df0   :  { %3037 = vrot.lane.b32.xlu1 %v4912_v26, %s4920_s22  ;;  %v3812_v26 = vrot.slane %v3603_v55, %v4992_v13 }
0x1e5d   :  { %v3586_v46 = vpop.permute.xlu0 %3585 }
0x1e5e   :  { %v3590_v50 = vmul.f32 %v3586_v46, %v3580_v14  ;;  %v3584_v54 = vpop.permute.xlu1 %3583 }
0x1e5f   :  { %v3589_v35 = vmul.f32 %v3584_v54, %v3579_v48 }
0x1e60   :  { %v3594_v42 = vadd.f32 %v3592_v3, %v3590_v50 }
0x1e61   :  { %v3593_v58 = vadd.f32 %v3591_v6, %v3589_v35  ;;  %v3040_v28 = vpop.permute.xlu0 %3039 }
0x1e62   :  { %v3044_v24 = vmul.f32 %v3040_v28, %v3034_v31  ;;  %3608 = vrot.lane.b32.xlu0 %v3594_v42, %s4920_s22  ;;  %v3038_v30 = vpop.permute.xlu1 %3037 }
0x1e63   :  { %v3043_v11 = vmul.f32 %v3038_v30, %v3033_v20  ;;  %3606 = vrot.lane.b32.xlu1 %v3593_v58, %s4920_s22 }
0x1e64   :  { %v3048_v63 = vadd.f32 %v3046_v47, %v3044_v24 }
0x1e65   :  { %v3047_v16 = vadd.f32 %v3045_v45, %v3043_v11 }
0x1e66   :  { %3693 = vrot.lane.b32.xlu0 %v3048_v63, %s4920_s22 }
0x1e67   :  { %3691 = vrot.lane.b32.xlu1 %v3047_v16, %s4920_s22 }
0x1ed4   :  { %v3609_v61 = vpop.permute.xlu0 %3608 }
0x1ed5   :  { %v3607_v23 = vpop.permute.xlu1 %3606 }
0x1ed6   :  { %4450 = vmatprep.mubr.msk.f32.mxu1 %vm263_vm1, %v3607_v23 }
0x1ed7   :  { %4451 = vmatmul.mubr.msk.f32.vlgmr.msra.gmra.mrb[28].mxu1 %vm263_vm1, %v3609_v61 }
0x1ed8   :  { %4679 = vmatpush3.bf16.msra.mxu1 %v4676_v49  ;;  %v3694_v12 = vpop.permute.xlu0 %3693 }
0x1ed9   :  { %v3692_v17 = vpop.permute.xlu1 %3691  ;;  %4681 = vmatprep.subr.bf16.mxu1 %v4680_v51 }
0x1eda   :  { %4461 = vmatprep.mubr.msk.f32.mxu1 %vm263_vm1, %v3692_v17 }
0x1edc   :  { %4683 = vmatpush3.bf16.msra.mxu1 %v4680_v51 }
0x1edf   :  { %4462 = vmatmul.mubr.msk.f32.vlgmr.msra.gmra.mrb[28].mxu1 %vm263_vm1, %v3694_v12 }
0x1fb2   :  { %v4463_v52 = vpop.f32.mrb[28].mxu1 }
0x1fb3   :  { %v3779_v15 = vadd.f32 %v4463_v52, %v3777_v36  ;;  %v3765_v39 = vpop.f32.mrb[29].mxu1 }
0x1fb4   :  { %v3778_v56 = vadd.f32 %v3777_v36, %v3765_v39 }
0x1fb5   :  { %v3781_v2 = vsel %vm69_vm0, %v3779_v15, 0.0 }
0x1fb6   :  { %v3780_v18 = vsel %vm69_vm0, %v3778_v56, 0.0 }
0x1fb7   :  { %v3782_v60 = vadd.f32 %v3781_v2, %v3780_v18 }
0x1fb9   :  { %v3783_v22 = vrot.slane %v3782_v60, 4 }
0x1fbb   :  { %v3784_v29 = vadd.f32 %v3783_v22, %v3782_v60 }
0x1fbd   :  { %v3785_v43 = vrot.slane %v3784_v29, 2 }
0x1fbf   :  { %v3786_v27 = vadd.f32 %v3785_v43, %v3784_v29 }
0x1fc1   :  { %v3787_v57 = vrot.slane %v3786_v27, 1 }
0x1fc3   :  { %v3788_v25 = vadd.f32 %v3787_v57, %v3786_v27 }
0x1fc5   :  { %v3790_v33 = vmul.f32 0.0625, %v3788_v25 }
0x1fc7   :  { %v3791_v1 = vsub.f32 %v3778_v56, %v3790_v33  ;;  %v3792_v0 = vsub.f32 %v3779_v15, %v3790_v33 }
0x1fc9   :  { %v3793_v34 = vmul.f32 %v3791_v1, %v3791_v1  ;;  %v3794_v21 = vmul.f32 %v3792_v0, %v3792_v0 }
0x1fcb   :  { %v3795_v10 = vsel %vm69_vm0, %v3793_v34, 0.0  ;;  %v3796_v41 = vsel %vm69_vm0, %v3794_v21, 0.0 }
0x1fcc   :  { %v3797_v59 = vadd.f32 %v3796_v41, %v3795_v10 }
0x1fce   :  { %v3798_v4 = vrot.slane %v3797_v59, 4 }
0x1fd0   :  { %v3799_v40 = vadd.f32 %v3798_v4, %v3797_v59 }
0x1fd2   :  { %v3800_v8 = vrot.slane %v3799_v40, 2 }
0x1fd4   :  { %v3801_v53 = vadd.f32 %v3800_v8, %v3799_v40 }
0x1fd6   :  { %v3802_v5 = vrot.slane %v3801_v53, 1 }
0x1fd8   :  { %v3803_v19 = vadd.f32 %v3802_v5, %v3801_v53 }
0x1fda   :  { %v3804_v44 = vmul.f32 0.0625, %v3803_v19 }
0x1fdc   :  { %v3805_v7 = vadd.f32 1e-05, %v3804_v44 }
0x1fde   :  { %4913 = vrsqrt.f32 %v3805_v7 }
0x1fe8   :  { %v4914_v32 = vpop.eup %4913 }
0x1fe9   :  { %v3807_v49 = vmul.f32 %v4914_v32, %v3791_v1  ;;  %v3808_v14 = vmul.f32 %v4914_v32, %v3792_v0 }
0x1feb   :  { %v3813_v46 = vmul.f32 %v3812_v26, %v3807_v49  ;;  %v3814_v48 = vmul.f32 %v3812_v26, %v3808_v14 }
0x1fed   :  { %v3819_v3 = vadd.f32 %v3818_v62, %v3813_v46  ;;  %v3820_v50 = vadd.f32 %v3818_v62, %v3814_v48 }
0x1fef   :  { %3821 = vst.msk [vmem:[%s5808_s6] sm:$0xff] %vm69_vm0, %v3819_v3  ;;  %3822 = vst.msk [vmem:[%s5808_s6 + $0x8] sm:$0xff] %vm69_vm0, %v3820_v50 }

</bundles_post_ra>
